<compile_context>
chip_gen: v5e
topology: v5e:2x2
jax: 0.10.0
libtpu: 0.0.40
codegen_flags: <defaults>
</compile_context>

<pallas_src>
import jax
import jax.numpy as jnp
from jax.experimental import pallas as pl
from jax.experimental.pallas import tpu as pltpu


def _round_up(x, m):
    return ((x + m - 1) // m) * m


def _choose_tiling(B, tile_b):
    """Pick a lane-aligned batch tile and padded batch with >= 2 grid steps."""
    B = max(int(B), 1)
    b_128 = _round_up(B, 128)                      # lane-axis alignment
    tile_b = max(128, _round_up(int(tile_b), 128))
    tile_b = min(tile_b, b_128)
    # Keep the "parallel" grid at >= 2 steps so v7x's two TensorCores split it.
    if b_128 <= tile_b:
        tile_b = max(128, _round_up((b_128 + 1) // 2, 128))
    b_pad = _round_up(B, tile_b)
    if b_pad // tile_b < 2:
        b_pad = 2 * tile_b
    return tile_b, b_pad


def _make_mlp_kernel(n_layers, out_dim):
    """Fused MLP kernel: n_layers Linear layers, sin between all but the last."""

    def kernel(*refs):
        x_ref = refs[0]                 # (in_dim, tile_b): batch on lanes
        o_ref = refs[-1]                # (out_dim, tile_b)
        p_refs = refs[1:-1]             # w1, b1, w2, b2, ..., wn, bn

        h = x_ref[...]
        # Hidden layers: MXU matmul (N = tile_b fully lane-dense) + bias + sin.
        for li in range(n_layers - 1):
            w_ref = p_refs[2 * li]          # (out, in) torch-native
            b_ref = p_refs[2 * li + 1]      # (out, 1)
            h = jnp.dot(w_ref[...], h,
                        preferred_element_type=jnp.float32,
                        precision=jax.lax.Precision.HIGHEST) + b_ref[...]
            h = jnp.sin(h)                  # VPU polynomial, lane-dense

        w_ref = p_refs[2 * (n_layers - 1)]
        b_ref = p_refs[2 * (n_layers - 1) + 1]
        if out_dim == 1:
            # Final layer on VPU + XLU: (K,1) weight column broadcast-multiplied
            # with (K, tile_b), sublane-reduced to a lane-dense (1, tile_b) row.
            o_ref[...] = (jnp.sum(h * w_ref[...], axis=0, keepdims=True)
                          + b_ref[...])
        else:
            o_ref[...] = (jnp.dot(w_ref[...], h,
                                  preferred_element_type=jnp.float32,
                                  precision=jax.lax.Precision.HIGHEST)
                          + b_ref[...])

    return kernel


def mlp_forward(x, params, *, tile_b=2048):
    """Fused MLP forward.

    x:      (B, in_dim) array.
    params: list of (W, b) with W shaped (out, in) (torch-native), b shaped
            (out,). Any number of layers >= 1; sin between all but the last.
    tile_b: batch-tile size (columns per grid step); rounded to a multiple of
            128 and clamped so the grid keeps >= 2 steps.
    """
    n_layers = len(params)
    assert n_layers >= 1
    B, in_dim = x.shape
    out_dim = params[-1][0].shape[0]

    tile_b, b_pad = _choose_tiling(B, tile_b)
    grid = (b_pad // tile_b,)

    # Batch-on-lanes: present x transposed, padded along the lane (batch) axis.
    xt = x.astype(jnp.float32).T                       # (in_dim, B)
    if b_pad != B:
        xt = jnp.pad(xt, ((0, 0), (0, b_pad - B)))     # padded cols sliced later

    args = [xt]
    in_specs = [pl.BlockSpec((in_dim, tile_b), lambda i: (0, i))]
    for li, (w, b) in enumerate(params):
        w = jnp.asarray(w, jnp.float32)                # (out, in)
        b2 = jnp.asarray(b, jnp.float32).reshape(-1, 1)  # (out, 1) column
        if li == n_layers - 1 and out_dim == 1:
            w = w.reshape(-1, 1)                       # (K, 1) for VPU reduce
        args.append(w)
        args.append(b2)
        # Full-array blocks + constant index_map: DMA'd once, VMEM-resident.
        in_specs.append(pl.BlockSpec(w.shape, lambda i: (0, 0)))
        in_specs.append(pl.BlockSpec(b2.shape, lambda i: (0, 0)))

    # Lane-dense output slab: (out_dim, tile_b) row(s) per grid step.
    out_spec = pl.BlockSpec((out_dim, tile_b), lambda i: (0, i))

    kernel = _make_mlp_kernel(n_layers, out_dim)

    y = pl.pallas_call(
        kernel,
        out_shape=jax.ShapeDtypeStruct((out_dim, b_pad), jnp.float32),
        grid_spec=pltpu.PrefetchScalarGridSpec(
            num_scalar_prefetch=0,
            grid=grid,
            in_specs=in_specs,
            out_specs=out_spec,
        ),
        compiler_params=pltpu.CompilerParams(
            dimension_semantics=("parallel",),   # batch tiles split across TCs
        ),
    )(*args)
    return y[:, :B].T                                  # back to (B, out_dim)


def init_mlp_params(key, layer_sizes):
    """Deterministic init mimicking torch.nn.Linear default U(-1/sqrt(fan_in), +).

    Returns torch-native (out, in) weights and (out,) biases.
    """
    params = []
    for fan_in, fan_out in zip(layer_sizes[:-1], layer_sizes[1:]):
        key, kw, kb = jax.random.split(key, 3)
        bound = 1.0 / jnp.sqrt(jnp.float32(fan_in))
        w = jax.random.uniform(kw, (fan_out, fan_in), jnp.float32,
                               minval=-bound, maxval=bound)
        b = jax.random.uniform(kb, (fan_out,), jnp.float32,
                               minval=-bound, maxval=bound)
        params.append((w, b))
    return params


def mlp_reference(x, params):
    """Pure-JAX reference for correctness check (same precision settings)."""
    h = x.astype(jnp.float32)
    for i, (w, b) in enumerate(params):
        h = jnp.dot(h, w.T, precision=jax.lax.Precision.HIGHEST) + b
        if i < len(params) - 1:
            h = jnp.sin(h)
    return h


if __name__ == "__main__":
    key = jax.random.PRNGKey(0)

    # Module defaults: input_layer_size=8, output_layer_size=1, 3 hidden
    # layers, sin activation. Small hidden width for the check.
    input_size, hidden, output_size = 8, [32, 32, 32], 1
    layer_sizes = [input_size] + hidden + [output_size]

    key, kp = jax.random.split(key)
    params = init_mlp_params(kp, layer_sizes)

    # --- small batch (pads to two 128-wide tiles) ----------------------------
    key, kx = jax.random.split(key)
    x_small = jax.random.normal(kx, (8, input_size), jnp.float32)
    y_small = mlp_forward(x_small, params)
    jax.block_until_ready(y_small)
    y_small_ref = mlp_reference(x_small, params)
    assert y_small.shape == (8, output_size)
    assert jnp.allclose(y_small, y_small_ref, atol=1e-5, rtol=1e-5), \
        "small-batch mismatch vs reference"

    # --- larger batch: exercises the multi-tile parallel grid + padding ------
    key, kx2 = jax.random.split(key)
    x_big = jax.random.normal(kx2, (300, input_size), jnp.float32)
    y_big = mlp_forward(x_big, params, tile_b=2048)
    jax.block_until_ready(y_big)
    y_big_ref = mlp_reference(x_big, params)
    assert y_big.shape == (300, output_size)
    assert jnp.allclose(y_big, y_big_ref, atol=1e-4, rtol=1e-4), \
        "large-batch mismatch vs reference"

    print("KERNEL_OK")
</pallas_src>

<mosaic_0001>
module attributes {stable_mosaic.version = 11 : i64} {
  func.func @kernel(%arg0: i32, %arg1: memref<8x128xf32, #tpu.memory_space<vmem>>, %arg2: memref<32x8xf32, #tpu.memory_space<vmem>>, %arg3: memref<32x1xf32, #tpu.memory_space<vmem>>, %arg4: memref<32x32xf32, #tpu.memory_space<vmem>>, %arg5: memref<32x1xf32, #tpu.memory_space<vmem>>, %arg6: memref<32x32xf32, #tpu.memory_space<vmem>>, %arg7: memref<32x1xf32, #tpu.memory_space<vmem>>, %arg8: memref<32x1xf32, #tpu.memory_space<vmem>>, %arg9: memref<1x1xf32, #tpu.memory_space<vmem>>, %arg10: memref<1x128xf32, #tpu.memory_space<vmem>>) attributes {dimension_semantics = [#tpu.dimension_semantics<parallel>], iteration_bounds = array<i64: 2>, scalar_prefetch = 0 : i64, scratch_operands = 0 : i64, tpu.core_type = #tpu.core_type<tc>, window_params = [{transform_indices = @transform_0, window_bounds = array<i64: 8, 128>}, {pipeline_mode = #tpu.pipeline_mode<synchronous>, transform_indices = @transform_1, window_bounds = array<i64: 32, 8>}, {pipeline_mode = #tpu.pipeline_mode<synchronous>, transform_indices = @transform_2, window_bounds = array<i64: 32, 1>}, {pipeline_mode = #tpu.pipeline_mode<synchronous>, transform_indices = @transform_3, window_bounds = array<i64: 32, 32>}, {pipeline_mode = #tpu.pipeline_mode<synchronous>, transform_indices = @transform_4, window_bounds = array<i64: 32, 1>}, {pipeline_mode = #tpu.pipeline_mode<synchronous>, transform_indices = @transform_5, window_bounds = array<i64: 32, 32>}, {pipeline_mode = #tpu.pipeline_mode<synchronous>, transform_indices = @transform_6, window_bounds = array<i64: 32, 1>}, {pipeline_mode = #tpu.pipeline_mode<synchronous>, transform_indices = @transform_7, window_bounds = array<i64: 32, 1>}, {pipeline_mode = #tpu.pipeline_mode<synchronous>, transform_indices = @transform_8, window_bounds = array<i64: 1, 1>}, {transform_indices = @transform_9, window_bounds = array<i64: 1, 128>}]} {
    %c0 = arith.constant 0 : index
    %c0_0 = arith.constant 0 : index
    %0 = vector.load %arg1[%c0, %c0_0] : memref<8x128xf32, #tpu.memory_space<vmem>>, vector<8x128xf32>
    %c0_1 = arith.constant 0 : index
    %c0_2 = arith.constant 0 : index
    %1 = vector.load %arg2[%c0_1, %c0_2] : memref<32x8xf32, #tpu.memory_space<vmem>>, vector<32x8xf32>
    %cst = arith.constant dense<0.000000e+00> : vector<32x128xf32>
    %2 = tpu.matmul %1, %0, %cst {dimension_numbers = #tpu.dot_dimension_numbers<[1], [0], [0], [1], [0, 0, 1, 1], [], []>, precision = #tpu.contract_precision<fp32>} : vector<32x8xf32>, vector<8x128xf32>, vector<32x128xf32> -> vector<32x128xf32>
    %c0_3 = arith.constant 0 : index
    %c0_4 = arith.constant 0 : index
    %3 = vector.load %arg3[%c0_3, %c0_4] : memref<32x1xf32, #tpu.memory_space<vmem>>, vector<32x1xf32>
    %4 = vector.broadcast %3 : vector<32x1xf32> to vector<32x128xf32>
    %5 = arith.addf %2, %4 : vector<32x128xf32>
    %6 = math.sin %5 : vector<32x128xf32>
    %c0_5 = arith.constant 0 : index
    %c0_6 = arith.constant 0 : index
    %7 = vector.load %arg4[%c0_5, %c0_6] : memref<32x32xf32, #tpu.memory_space<vmem>>, vector<32x32xf32>
    %cst_7 = arith.constant dense<0.000000e+00> : vector<32x128xf32>
    %8 = tpu.matmul %7, %6, %cst_7 {dimension_numbers = #tpu.dot_dimension_numbers<[1], [0], [0], [1], [0, 0, 1, 1], [], []>, precision = #tpu.contract_precision<fp32>} : vector<32x32xf32>, vector<32x128xf32>, vector<32x128xf32> -> vector<32x128xf32>
    %c0_8 = arith.constant 0 : index
    %c0_9 = arith.constant 0 : index
    %9 = vector.load %arg5[%c0_8, %c0_9] : memref<32x1xf32, #tpu.memory_space<vmem>>, vector<32x1xf32>
    %10 = vector.broadcast %9 : vector<32x1xf32> to vector<32x128xf32>
    %11 = arith.addf %8, %10 : vector<32x128xf32>
    %12 = math.sin %11 : vector<32x128xf32>
    %c0_10 = arith.constant 0 : index
    %c0_11 = arith.constant 0 : index
    %13 = vector.load %arg6[%c0_10, %c0_11] : memref<32x32xf32, #tpu.memory_space<vmem>>, vector<32x32xf32>
    %cst_12 = arith.constant dense<0.000000e+00> : vector<32x128xf32>
    %14 = tpu.matmul %13, %12, %cst_12 {dimension_numbers = #tpu.dot_dimension_numbers<[1], [0], [0], [1], [0, 0, 1, 1], [], []>, precision = #tpu.contract_precision<fp32>} : vector<32x32xf32>, vector<32x128xf32>, vector<32x128xf32> -> vector<32x128xf32>
    %c0_13 = arith.constant 0 : index
    %c0_14 = arith.constant 0 : index
    %15 = vector.load %arg7[%c0_13, %c0_14] : memref<32x1xf32, #tpu.memory_space<vmem>>, vector<32x1xf32>
    %16 = vector.broadcast %15 : vector<32x1xf32> to vector<32x128xf32>
    %17 = arith.addf %14, %16 : vector<32x128xf32>
    %18 = math.sin %17 : vector<32x128xf32>
    %c0_15 = arith.constant 0 : index
    %c0_16 = arith.constant 0 : index
    %19 = vector.load %arg8[%c0_15, %c0_16] : memref<32x1xf32, #tpu.memory_space<vmem>>, vector<32x1xf32>
    %20 = vector.broadcast %19 : vector<32x1xf32> to vector<32x128xf32>
    %21 = arith.mulf %18, %20 : vector<32x128xf32>
    %cst_17 = arith.constant dense<0.000000e+00> : vector<128xf32>
    %22 = vector.multi_reduction <add>, %21, %cst_17 [0] : vector<32x128xf32> to vector<128xf32>
    %23 = vector.shape_cast %22 : vector<128xf32> to vector<1x128xf32>
    %c0_18 = arith.constant 0 : index
    %c0_19 = arith.constant 0 : index
    %24 = vector.load %arg9[%c0_18, %c0_19] : memref<1x1xf32, #tpu.memory_space<vmem>>, vector<1x1xf32>
    %25 = vector.broadcast %24 : vector<1x1xf32> to vector<1x128xf32>
    %26 = arith.addf %23, %25 : vector<1x128xf32>
    %c0_20 = arith.constant 0 : index
    %c0_21 = arith.constant 0 : index
    %27 = vector.load %arg10[%c0_20, %c0_21] : memref<1x128xf32, #tpu.memory_space<vmem>>, vector<1x128xf32>
    tpu.vector_store %arg10[%c0_20, %c0_21], %26 {strides = array<i32>} : memref<1x128xf32, #tpu.memory_space<vmem>>, vector<1x128xf32>,
    return
  }
  func.func @transform_0(%arg0: i32) -> (i32, i32) {
    %c0_i32 = arith.constant 0 : i32
    %c0_i32_0 = arith.constant 0 : i32
    return %c0_i32, %arg0 : i32, i32
  }
  func.func @transform_1(%arg0: i32) -> (i32, i32) {
    %c0_i32 = arith.constant 0 : i32
    %c0_i32_0 = arith.constant 0 : i32
    %c0_i32_1 = arith.constant 0 : i32
    return %c0_i32, %c0_i32_0 : i32, i32
  }
  func.func @transform_2(%arg0: i32) -> (i32, i32) {
    %c0_i32 = arith.constant 0 : i32
    %c0_i32_0 = arith.constant 0 : i32
    %c0_i32_1 = arith.constant 0 : i32
    return %c0_i32, %c0_i32_0 : i32, i32
  }
  func.func @transform_3(%arg0: i32) -> (i32, i32) {
    %c0_i32 = arith.constant 0 : i32
    %c0_i32_0 = arith.constant 0 : i32
    %c0_i32_1 = arith.constant 0 : i32
    return %c0_i32, %c0_i32_0 : i32, i32
  }
  func.func @transform_4(%arg0: i32) -> (i32, i32) {
    %c0_i32 = arith.constant 0 : i32
    %c0_i32_0 = arith.constant 0 : i32
    %c0_i32_1 = arith.constant 0 : i32
    return %c0_i32, %c0_i32_0 : i32, i32
  }
  func.func @transform_5(%arg0: i32) -> (i32, i32) {
    %c0_i32 = arith.constant 0 : i32
    %c0_i32_0 = arith.constant 0 : i32
    %c0_i32_1 = arith.constant 0 : i32
    return %c0_i32, %c0_i32_0 : i32, i32
  }
  func.func @transform_6(%arg0: i32) -> (i32, i32) {
    %c0_i32 = arith.constant 0 : i32
    %c0_i32_0 = arith.constant 0 : i32
    %c0_i32_1 = arith.constant 0 : i32
    return %c0_i32, %c0_i32_0 : i32, i32
  }
  func.func @transform_7(%arg0: i32) -> (i32, i32) {
    %c0_i32 = arith.constant 0 : i32
    %c0_i32_0 = arith.constant 0 : i32
    %c0_i32_1 = arith.constant 0 : i32
    return %c0_i32, %c0_i32_0 : i32, i32
  }
  func.func @transform_8(%arg0: i32) -> (i32, i32) {
    %c0_i32 = arith.constant 0 : i32
    %c0_i32_0 = arith.constant 0 : i32
    %c0_i32_1 = arith.constant 0 : i32
    return %c0_i32, %c0_i32_0 : i32, i32
  }
  func.func @transform_9(%arg0: i32) -> (i32, i32) {
    %c0_i32 = arith.constant 0 : i32
    %c0_i32_0 = arith.constant 0 : i32
    return %c0_i32, %arg0 : i32, i32
  }
}

</mosaic_0001>

<bundles_post_ra>
// kernel: tpu_custom_call.1
= control target key start
LH: loop header
LB: loop body
LE: loop exit
PB: predicated region body
PF: predicated region fallthrough
CT: control target
= control target key end

     0   :  { %s5131_s0 = inlined_call_operand.vmem [shape: f32[8,256], index: 0, kind: input, shape index: {}]   ;;  %s5132_s1 = inlined_call_operand.vmem [shape: f32[32,8], index: 1, kind: input, shape index: {}]   ;;  %s5133_s2 = inlined_call_operand.vmem [shape: f32[32,1], index: 2, kind: input, shape index: {}]   ;;  %s5134_s3 = inlined_call_operand.vmem [shape: f32[32,32], index: 3, kind: input, shape index: {}]   ;;  %s5135_s4 = inlined_call_operand.vmem [shape: f32[32,1], index: 4, kind: input, shape index: {}]   ;;  %s5136_s5 = inlined_call_operand.vmem [shape: f32[32,32], index: 5, kind: input, shape index: {}]   ;;  %s5137_s6 = inlined_call_operand.vmem [shape: f32[32,1], index: 6, kind: input, shape index: {}]   ;;  %s5138_s7 = inlined_call_operand.vmem [shape: f32[32,1], index: 7, kind: input, shape index: {}]   ;;  %s5139_s8 = inlined_call_operand.<no memory space> [shape: f32[1,1], index: 8, kind: input, shape index: {}]   ;;  %s5140_s9 = inlined_call_operand.hbm [shape: f32[1,256], index: 9, kind: output, shape index: {}]  }
   0x1   :  { %v14_v0 = vstv %s5139_s8 }
   0x2   :  { %15 = vst [vmem:[#allocation2] sm:$0x1] %v14_v0 }
   0x3   :  { %16 = vsyncpa [#allocation4], 0 }
   0x4   :  { %18 = vsyncpa [#allocation4 + $0x1], 0  ;;  %s3439_s11 = smov 0   ;;  %s3441_s12 = smov 0  }
   0x5   :  { %s3443_s13 = smov 0   ;;  %s3445_s14 = smov 0  }
   0x6 LB: > { %s3460_s8 = sadd.s32 4294967295, %s3377_s14   ;;  %s3221_s15 = sadd.s32 4294967294, %s3377_s14   ;;  %s3377_s14 = sphi %s3445_s14, %s5170_s14   ;;  %s3373_s13 = sphi %s3443_s13, %s5169_s13   ;;  %s3369_s12 = sphi %s3441_s12, %s5168_s12   ;;  %s3365_s11 = sphi %s3439_s11, %s5167_s11  }
   0x7   : > { %s3464_s16 = sadd.s32 1, %s3377_s14   ;;  %s225_s17 = sadd.s32 1, %s3373_s13 }
   0x8   : > { %s222_s18 = ssub.s32 %s3377_s14, %s3464_s16  ;;  %p235_p0 = scmp.ne.s32.totalorder %s3373_s13, %s3369_s12 }
   0x9   : > { %p223_p1 = scmp.eq.s32.totalorder %s222_s18, 0  ;;  %p236_p2 = scmp.eq.s32.totalorder %s3460_s8, 1 }
   0xa   : > { %p241_p3 = scmp.ne.s32.totalorder %s3369_s12, %s3365_s11  ;;  %p242_p4 = scmp.eq.s32.totalorder %s3221_s15, 1 }
   0xb   : > { %s3475_s19 = scalar_select %p223_p1, %s3373_s13, %s225_s17  }
   0xc   : > { %p3477_p5 = por %p236_p2, %p235_p0  ;;  %p3481_p6 = por %p242_p4, %p241_p3 }
   0xd   : > { %p3224_p7 = scmp.ge.s32.totalorder %s3377_s14, 1  ;;  %p291_p8 = scmp.lt.s32.totalorder %s3377_s14, 3 }
   0xf   : > { %p292_p9 = pnand %p3224_p7, %p291_p8 }
  0x10   : > { %p325_p10 = scmp.lt.s32.totalorder (!%p292_p9), %s3460_s8, 1  ;;  %s323_s10 = sand.u32 (!%p292_p9), 1, %s3369_s12  }
  0x11   : > { %295 = sbr.rel (%p292_p9) target bundleno = 1110 (0x456), region = 56  ;;  %s3162_s18 = scalar_lea.hbm (!%p292_p9), %s5140_s9, %s3460_s8 }
  0x12   : > { %s3166_s24 = sshll.u32 (!%p292_p9), %s3162_s18, 4  ;;  %s3335_s29 = scalar_lea.hbm (!%p292_p9), %s5140_s9, 2  ;;  %s3167_s24 = int_to_ptr.hbm [resolvable:$true] %s3166_s24 }
  0x13   : > { %s3329_s26 = sshra.s32 (!%p292_p9), %s3167_s24, 4  ;;  %s3330_s26 = int_to_ptr.hbm [resolvable:$true] %s3329_s26 }
  0x14   : > { %s3331_s27 = scalar_lea.hbm (!%p292_p9), %s3330_s26, 1  ;;  %p3336_p0 = scmp.lt.s32.totalorder (!%p292_p9), %s3330_s26, %s5140_s9 }
  0x15   : > { %p3332_p11 = scmp.ne.s32.totalorder (!%p292_p9), %s3330_s26, %s3331_s27  ;;  %p3337_p1 = scmp.lt.s32.totalorder (!%p292_p9), %s3335_s29, %s3331_s27 }
  0x16   : > { %v332_v1 = vld [vmem:[%s5132_s1 + $0x10] sm:$0xff]  ;;  %vm358_vm0 = vcmask 64512   ;;  %v333_v2 = vld [vmem:[%s5132_s1 + $0x18] sm:$0xff]  ;;  %v3379_v6 = vmov 0   ;;  %v330_v7 = vld [vmem:[%s5132_s1] sm:$0xff]  ;;  %s326_s15 = scalar_select %p325_p10, %s3460_s8, 1 }
  0x17   : > { %v337_v3 = vld [vmem:[%s5133_s2 + $0x18] sm:$0xff]  ;;  %v366_v4 = vsel %vm358_vm0, %v332_v1, 0  ;;  %v369_v5 = vsel %vm358_vm0, %v333_v2, 0  ;;  %3312 = vset.pattern.permute.xlu0 %v3379_v6  ;;  %3313 = vset.pattern.permute.xlu1 %v3379_v6  ;;  %v335_v8 = vld [vmem:[%s5133_s2 + $0x8] sm:$0xff]  ;;  %v360_v11 = vsel %vm358_vm0, %v330_v7, 0  ;;  %v336_v24 = vld [vmem:[%s5133_s2 + $0x10] sm:$0xff]  ;;  %p3333_p12 = pnand %p3332_p11, %p3477_p5  ;;  %p3338_p2 = por %p3337_p1, %p3336_p0 }
  0x18   : > { %v3508_v9 = vand.u32 4294901760, %v366_v4  ;;  %v3510_v10 = vand.u32 4294901760, %v369_v5  ;;  %355 = vperm.xlu0 %3312, %v337_v3   ;;  %345 = vperm.xlu1 %3313, %v335_v8   ;;  %v331_v12 = vld [vmem:[%s5132_s1 + $0x8] sm:$0xff]  ;;  %v388_v13 = vand.u32 4294901760, %v360_v11  ;;  %s3225_s22 = sshll.u32 %s326_s15, 3  ;;  %v334_v25 = vld [vmem:[%s5133_s2] sm:$0xff] }
  0x19   : > { %v363_v14 = vsel %vm358_vm0, %v331_v12, 0  ;;  %3314 = vset.pattern.permute.xlu2 %v3379_v6  ;;  %s328_s25 = scalar_lea.vmem %s5131_s0, %s3225_s22  ;;  %v1235_v39 = vld [vmem:[%s5135_s4 + $0x8] sm:$0xff]  ;;  %v1234_v41 = vld [vmem:[%s5135_s4] sm:$0xff]  ;;  %v2175_v43 = vld [vmem:[%s5137_s6 + $0x10] sm:$0xff]  ;;  %s324_s22 = scalar_lea.vmem [#allocation3], %s323_s10 }
  0x1a   : > { %v3519_v15 = vsub.f32 %v366_v4, %v3508_v9  ;;  %v3522_v16 = vsub.f32 %v369_v5, %v3510_v10  ;;  %v396_v17 = vand.u32 4294901760, %v363_v14  ;;  %v389_v18 = vsub.f32 %v360_v11, %v388_v13  ;;  %v329_v19 = vld [vmem:[%s328_s25] sm:$0xff]  ;;  %v2174_v42 = vld [vmem:[%s5137_s6 + $0x8] sm:$0xff]  ;;  %v3110_v46 = vld [vmem:[%s5138_s7 + $0x18] sm:$0xff]  ;;  %s3164_s23 = sshll.u32 %s324_s22, 4  ;;  %s3154_s25 = scalar_lea.sflag [#allocation4], %s323_s10  ;;  %s3165_s23 = int_to_ptr.vmem [resolvable:$true] %s3164_s23 }
  0x1b   : > { %v386_v22 = vand.u32 4294901760, %v329_v19  ;;  %v3107_v44 = vld [vmem:[%s5138_s7] sm:$0xff]  ;;  %v3108_v45 = vld [vmem:[%s5138_s7 + $0x8] sm:$0xff]  ;;  %p3334_p13 = pneg %p3333_p12 }
  0x1c   : > { %v406_v20 = vand.u32 4294901760, %v3519_v15  ;;  %v397_v21 = vsub.f32 %v363_v14, %v396_v17  ;;  %v390_v23 = vand.u32 4294901760, %v389_v18  ;;  %v414_v27 = vand.u32 4294901760, %v3522_v16  ;;  %v3144_v47 = vld [vmem:[#allocation2] sm:$0x1] }
  0x1d   : > { %3264 = vmatpush.msra.mxu2 %v386_v22  ;;  %v437_v28 = vsub.f32 %v329_v19, %v386_v22  ;;  %387 = vmatpush.msra.mxu0 %v386_v22  ;;  %p3339_p3 = pnand %p3338_p2, %p3334_p13 }
  0x1e   : > { %v407_v26 = vsub.f32 %v3519_v15, %v406_v20  ;;  %v391_v29 = vsub.f32 %v389_v18, %v390_v23  ;;  %v398_v30 = vand.u32 4294901760, %v397_v21  ;;  %v415_v34 = vsub.f32 %v3522_v16, %v414_v27 }
  0x1f   : > { %v438_v32 = vand.u32 4294901760, %v437_v28  ;;  %476 = vmatpush.msrb.mxu2 %v437_v28 }
  0x20   : > { %v408_v31 = vand.u32 4294901760, %v407_v26  ;;  %350 = vperm.xlu0 %3312, %v336_v24   ;;  %340 = vperm.xlu1 %3313, %v334_v25   ;;  %v392_v33 = vand.u32 4294901760, %v391_v29  ;;  %v399_v36 = vsub.f32 %v397_v21, %v398_v30  ;;  %v416_v38 = vand.u32 4294901760, %v415_v34 }
  0x21   : > { %v439_v35 = vsub.f32 %v437_v28, %v438_v32  ;;  %558 = vmatpush.msrb.mxu0 %v438_v32 }
  0x22   : > { %409 = vmatmul.f32.vlgmr.msra.gmra.mxu2 %v408_v31  ;;  %393 = vmatmul.f32.vlgmr.msra.gmra.mxu0 %v392_v33  ;;  %v400_v40 = vand.u32 4294901760, %v399_v36  ;;  %v3380_v36 = vmov 683565275  }
  0x23   : > { %v440_v37 = vand.u32 4294901760, %v439_v35 }
  0x25   : > { %3265 = vmatpush.msra.mxu3 %v440_v37  ;;  %441 = vmatpush.msra.mxu1 %v440_v37 }
  0x26   : > { %451 = vmatmul.f32.vlgmr.msra.gmra.mxu3 %v3508_v9  ;;  %443 = vmatmul.f32.vlgmr.msra.gmra.mxu1 %v388_v13 }
  0x27   : > { %514 = vmatpush.msrb.mxu3 %v386_v22  ;;  %592 = vmatpush.msrb.mxu1 %v386_v22 }
  0x28   : > { %1245 = vperm.xlu0 %3312, %v1235_v39   ;;  %1240 = vperm.xlu1 %3313, %v1234_v41  }
  0x2a   : > { %417 = vmatmul.f32.gmra.mxu2 %v416_v38  ;;  %401 = vmatmul.f32.gmra.mxu0 %v400_v40  ;;  %v3381_v38 = vmov 2475754826  }
  0x2e   : > { %455 = vmatmul.f32.gmra.mxu3 %v3510_v10  ;;  %447 = vmatmul.f32.gmra.mxu1 %v396_v17 }
  0x30   : > { %2184 = vperm.xlu0 %3312, %v2174_v42   ;;  %2189 = vperm.xlu1 %3313, %v2175_v43   ;;  %v3382_v42 = vmov 2131351028  }
  0x32   : > { %479 = vmatmul.f32.vlgmr.msrb.gmra.mxu2 %v389_v18  ;;  %560 = vmatmul.f32.vlgmr.msrb.gmra.mxu0 %v388_v13 }
  0x36   : > { %518 = vmatmul.f32.vlgmr.msrb.gmra.mxu3 %v390_v23  ;;  %594 = vmatmul.f32.vlgmr.msrb.gmra.mxu1 %v388_v13 }
  0x38   : > { %3113 = vperm.xlu0 %3312, %v3107_v44   ;;  %3118 = vperm.xlu1 %3313, %v3108_v45   ;;  %v3383_v45 = vmov 2102212464  }
  0x3a   : > { %484 = vmatmul.f32.gmra.mxu2 %v397_v21  ;;  %564 = vmatmul.f32.gmra.mxu0 %v396_v17 }
  0x3e   : > { %524 = vmatmul.f32.gmra.mxu3 %v398_v30  ;;  %598 = vmatmul.f32.gmra.mxu1 %v396_v17 }
  0x40   : > { %3128 = vperm.xlu0 %3312, %v3110_v46   ;;  %3147 = vperm.xlu1 %3313, %v3144_v47  }
  0x42   : > { %489 = vmatmul.f32.gmra.mxu2 %v3519_v15  ;;  %568 = vmatmul.f32.gmra.mxu0 %v3508_v9 }
  0x46   : > { %530 = vmatmul.f32.gmra.mxu3 %v406_v20  ;;  %602 = vmatmul.f32.gmra.mxu1 %v3508_v9 }
  0x4a   : > { %494 = vmatmul.f32.gmra.mxu2 %v3522_v16  ;;  %572 = vmatmul.f32.gmra.mxu0 %v3510_v10 }
  0x4e   : > { %536 = vmatmul.f32.gmra.mxu3 %v414_v27  ;;  %606 = vmatmul.f32.gmra.mxu1 %v3510_v10 }
  0x8a   : > { %v346_v51 = vpop.permute.xlu1 %345  ;;  %v3574_v3 = vpop.permute.xlu0 %355 }
  0x92   : > { %v341_v56 = vpop.permute.xlu1 %340  ;;  %v351_v21 = vpop.permute.xlu0 %350 }
  0x9f   : > { %v394_v49 = vpop.f32.mrf.mxu0 }
  0xa0   : > { %v395_v58 = vadd.f32 %v394_v49, %v341_v56 }
  0xa3   : > { %v444_v50 = vpop.f32.mrf.mxu1 }
  0xa4   : > { %v445_v60 = vadd.f32 %v444_v50, %v395_v58 }
  0xa5   : > { %v410_v48 = vpop.f32.mrf.mxu2 }
  0xa6   : > { %v411_v24 = vadd.f32 %v410_v48, %v351_v21  ;;  %v3384_v48 = vmov 920167782  }
  0xa7   : > { %v402_v54 = vpop.f32.mrf.mxu0 }
  0xa8   : > { %v403_v1 = vadd.f32 %v402_v54, %v346_v51  ;;  %v3385_v51 = vmov 1326507024  }
  0xa9   : > { %v452_v52 = vpop.f32.mrf.mxu3 }
  0xaa   : > { %v453_v30 = vadd.f32 %v452_v52, %v411_v24 }
  0xab   : > { %v448_v55 = vpop.f32.mrf.mxu1 }
  0xac   : > { %v449_v7 = vadd.f32 %v448_v55, %v403_v1 }
  0xad   : > { %v3570_v53 = vpop.f32.mrf.mxu2 }
  0xaf   : > { %v561_v61 = vpop.f32.mrf.mxu0 }
  0xb1   : > { %v3572_v57 = vpop.f32.mrf.mxu3 }
  0xb3   : > { %v595_v0 = vpop.f32.mrf.mxu1 }
  0xb5   : > { %v480_v59 = vpop.f32.mrf.mxu2 }
  0xb6   : > { %v481_v62 = vadd.f32 %v480_v59, %v445_v60 }
  0xb7   : > { %v565_v13 = vpop.f32.mrf.mxu0 }
  0xb9   : > { %v519_v63 = vpop.f32.mrf.mxu3 }
  0xba   : > { %v520_v2 = vadd.f32 %v519_v63, %v481_v62 }
  0xbb   : > { %v599_v17 = vpop.f32.mrf.mxu1 }
  0xbc   : > { %v562_v4 = vadd.f32 %v561_v61, %v520_v2 }
  0xbd   : > { %v485_v5 = vpop.f32.mrf.mxu2 }
  0xbe   : > { %v3576_v8 = vadd.f32 %v595_v0, %v562_v4  ;;  %v486_v9 = vadd.f32 %v485_v5, %v449_v7 }
  0xc0   : > { %v610_v10 = vand.u32 2147483647, %v3576_v8  ;;  %v613_v11 = vand.u32 2139095040, %v3576_v8 }
  0xc1   : > { %v525_v12 = vpop.f32.mrf.mxu3 }
  0xc2   : > { %v614_v14 = vshrl.u32 %v613_v11, 23  ;;  %v617_v15 = vand.u32 8388607, %v610_v10  ;;  %v526_v16 = vadd.f32 %v525_v12, %v486_v9 }
  0xc4   : > { %v3226_v18 = vadd.s32 4294967169, %v614_v14  ;;  %v618_v19 = vor.u32 8388608, %v617_v15  ;;  %v566_v20 = vadd.f32 %v565_v13, %v526_v16 }
  0xc5   : > { %v490_v11 = vpop.f32.mrf.mxu2 }
  0xc6   : > { %v620_v22 = vadd.s32 1, %v3226_v18  ;;  %v3582_v23 = vadd.f32 %v599_v17, %v566_v20  ;;  %v3584_v25 = vshll.u32 %v618_v19, 8  ;;  %v491_v19 = vadd.f32 %v490_v11, %v453_v30 }
  0xc8   : > { %vm621_vm1 = vcmp.gt.s32.totalorder %v620_v22, 0  ;;  %v765_v27 = vand.u32 2147483647, %v3582_v23  ;;  %v768_v28 = vand.u32 2139095040, %v3582_v23  ;;  %v659_v32 = vand.u32 65535, %v3584_v25 }
  0xc9   : > { %v622_v26 = vsel %vm621_vm1, %v620_v22, 0  ;;  %v660_v33 = vshrl.u32 %v3584_v25, 16 }
  0xca   : > { %v624_v29 = vand.u32 31, %v622_v26  ;;  %v769_v34 = vshrl.u32 %v768_v28, 23  ;;  %v623_v35 = vshrl.u32 %v622_v26, 5  ;;  %v3594_v40 = vand.u32 8388607, %v765_v27 }
  0xcc   : > { %v625_v31 = vsub.s32 32, %v624_v29  ;;  %v627_v37 = vshll.u32 %v3380_v36, %v624_v29  ;;  %v630_v39 = vshll.u32 %v3381_v38, %v624_v29  ;;  %v633_v44 = vshll.u32 %v3382_v42, %v624_v29 }
  0xcd   : > { %v636_v47 = vshll.u32 %v3383_v45, %v624_v29  ;;  %v639_v50 = vshll.u32 %v3384_v48, %v624_v29  ;;  %v3229_v58 = vadd.s32 4294967169, %v769_v34  ;;  %vm642_vm2 = vcmp.lt.s32.totalorder %v623_v35, 1 }
  0xce   : > { %v628_v41 = vshrl.u32 %v3381_v38, %v625_v31  ;;  %v631_v43 = vshrl.u32 %v3382_v42, %v625_v31  ;;  %v634_v46 = vshrl.u32 %v3383_v45, %v625_v31  ;;  %v637_v49 = vshrl.u32 %v3384_v48, %v625_v31 }
  0xcf   : > { %v640_v52 = vshrl.u32 %v3385_v51, %v625_v31  ;;  %vm645_vm3 = vcmp.lt.s32.totalorder %v623_v35, 4  ;;  %v626_v61 = vshrl.u32 %v3380_v36, %v625_v31  ;;  %vm644_vm4 = vcmp.lt.s32.totalorder %v623_v35, 3 }
  0xd0   : > { %v629_v54 = vor.u32 %v628_v41, %v627_v37  ;;  %v632_v55 = vor.u32 %v631_v43, %v630_v39  ;;  %v635_v56 = vor.u32 %v634_v46, %v633_v44  ;;  %v638_v59 = vor.u32 %v637_v49, %v636_v47 }
  0xd1   : > { %v641_v60 = vor.u32 %v640_v52, %v639_v50  ;;  %v775_v4 = vadd.s32 1, %v3229_v58  ;;  %vm643_vm5 = vcmp.lt.s32.totalorder %v623_v35, 2  ;;  %v773_v20 = vor.u32 8388608, %v3594_v40 }
  0xd2   : > { %v647_v62 = vsel %vm645_vm3, %v635_v56, 2102212464  ;;  %v650_v63 = vsel %vm642_vm2, %v629_v54, %v632_v55  ;;  %v654_v0 = vsel %vm642_vm2, %v632_v55, %v635_v56  ;;  %v651_v1 = vsel %vm645_vm3, %v638_v59, 920167782 }
  0xd3   : > { %v655_v2 = vsel %vm645_vm3, %v641_v60, 1326507024  ;;  %v646_v5 = vsel %vm642_vm2, %v626_v61, %v629_v54  ;;  %v652_v7 = vsel %vm644_vm4, %v635_v56, %v651_v1  ;;  %v648_v12 = vsel %vm644_vm4, %v632_v55, %v647_v62 }
  0xd4   : > { %v656_v9 = vsel %vm644_vm4, %v638_v59, %v655_v2  ;;  %v653_v13 = vsel %vm643_vm5, %v650_v63, %v652_v7  ;;  %vm776_vm6 = vcmp.gt.s32.totalorder %v775_v4, 0  ;;  %v3606_v21 = vsel %vm643_vm5, %v646_v5, %v648_v12  ;;  %v531_v12 = vpop.f32.mrf.mxu3 }
  0xd5   : > { %v657_v14 = vsel %vm643_vm5, %v654_v0, %v656_v9  ;;  %v683_v17 = vand.u32 65535, %v653_v13  ;;  %v684_v18 = vshrl.u32 %v653_v13, 16  ;;  %v777_v26 = vsel %vm776_vm6, %v775_v4, 0 }
  0xd6   : > { %v661_v15 = vand.u32 65535, %v657_v14  ;;  %v662_v16 = vshrl.u32 %v657_v14, 16  ;;  %v779_v49 = vand.u32 31, %v777_v26  ;;  %v3613_v59 = vshrl.u32 %v777_v26, 5 }
  0xd7   : > { %v686_v31 = vmul.u32 %v684_v18, %v659_v32  ;;  %v687_v34 = vmul.u32 %v683_v17, %v660_v33  ;;  %v685_v39 = vmul.u32 %v683_v17, %v659_v32  ;;  %v688_v41 = vmul.u32 %v684_v18, %v660_v33 }
  0xd8   : > { %v664_v22 = vmul.u32 %v662_v16, %v659_v32  ;;  %v665_v24 = vmul.u32 %v661_v15, %v660_v33  ;;  %v663_v28 = vmul.u32 %v661_v15, %v659_v32  ;;  %v666_v29 = vmul.u32 %v662_v16, %v660_v33 }
  0xd9   : > { %v689_v46 = vshll.u32 %v686_v31, 16  ;;  %v690_v47 = vshrl.u32 %v686_v31, 16  ;;  %v691_v40 = vshll.u32 %v687_v34, 16  ;;  %v692_v52 = vshrl.u32 %v687_v34, 16 }
  0xda   : > { %v667_v35 = vshll.u32 %v664_v22, 16  ;;  %v668_v37 = vshrl.u32 %v664_v22, 16  ;;  %v669_v43 = vshll.u32 %v665_v24, 16  ;;  %v670_v44 = vshrl.u32 %v665_v24, 16 }
  0xdb   : > { %vm693_vm8 = vc.u32 %v685_v39, %v689_v46  ;;  %v695_v54 = vadd.s32 %v689_v46, %v685_v39  ;;  %v3610_v58 = vsub.s32 32, %v779_v49  ;;  %v782_v63 = vshll.u32 %v3380_v36, %v779_v49 }
  0xdc   : > { %vm671_vm7 = vc.u32 %v663_v28, %v667_v35  ;;  %v673_v30 = vadd.s32 %v667_v35, %v663_v28  ;;  %v694_v56 = vsel %vm693_vm8, 1, %v3379_v6  ;;  %v785_v2 = vshll.u32 %v3381_v38, %v779_v49 }
  0xdd   : > { %v672_v50 = vsel %vm671_vm7, 1, %v3379_v6  ;;  %v696_v33 = vadd.s32 %v694_v56, %v688_v41  ;;  %vm697_vm10 = vc.u32 %v695_v54, %v691_v40  ;;  %v3616_v62 = vadd.s32 %v695_v54, %v691_v40  ;;  %v569_v54 = vpop.f32.mrf.mxu0 }
  0xde   : > { %v674_v55 = vadd.s32 %v672_v50, %v666_v29  ;;  %vm675_vm9 = vc.u32 %v673_v30, %v669_v43  ;;  %v698_v61 = vsel %vm697_vm10, 1, %v3379_v6  ;;  %v783_v1 = vshrl.u32 %v3381_v38, %v3610_v58 }
  0xdf   : > { %v676_v32 = vsel %vm675_vm9, 1, %v3379_v6  ;;  %v700_v0 = vadd.s32 %v698_v61, %v696_v33  ;;  %v786_v4 = vshrl.u32 %v3382_v42, %v3610_v58  ;;  %v788_v7 = vshll.u32 %v3382_v42, %v779_v49 }
  0xe0   : > { %v678_v60 = vadd.s32 %v676_v32, %v674_v55  ;;  %v789_v9 = vshrl.u32 %v3383_v45, %v3610_v58  ;;  %v791_v11 = vshll.u32 %v3383_v45, %v779_v49  ;;  %v3628_v14 = vor.u32 %v783_v1, %v782_v63  ;;  %v603_v1 = vpop.f32.mrf.mxu1 }
  0xe1   : > { %v701_v13 = vadd.s32 %v700_v0, %v690_v47  ;;  %v3630_v15 = vor.u32 %v786_v4, %v785_v2  ;;  %v792_v16 = vshrl.u32 %v3384_v48, %v3610_v58  ;;  %v794_v22 = vshll.u32 %v3384_v48, %v779_v49 }
  0xe2   : > { %v679_v5 = vadd.s32 %v678_v60, %v668_v37  ;;  %v3636_v18 = vor.u32 %v789_v9, %v788_v7  ;;  %v795_v24 = vshrl.u32 %v3385_v51, %v3610_v58  ;;  %v532_v29 = vadd.f32 %v531_v12, %v491_v19 }
  0xe3   : > { %v702_v26 = vadd.s32 %v701_v13, %v692_v52  ;;  %v793_v28 = vor.u32 %v792_v16, %v791_v11  ;;  %vm797_vm12 = vcmp.lt.s32.totalorder %v3613_v59, 1  ;;  %v3644_v34 = vshll.u32 %v773_v20, 8 }
  0xe4   : > { %v3634_v17 = vadd.s32 %v679_v5, %v670_v44  ;;  %v796_v31 = vor.u32 %v795_v24, %v794_v22  ;;  %v703_v35 = vmul.u32 %v3584_v25, %v3606_v21  ;;  %vm800_vm13 = vcmp.lt.s32.totalorder %v3613_v59, 4 }
  0xe5   : > { %v706_v37 = vadd.s32 1, %v702_v26  ;;  %v805_v39 = vsel %vm797_vm12, %v3628_v14, %v3630_v15  ;;  %vm799_vm14 = vcmp.lt.s32.totalorder %v3613_v59, 3  ;;  %v806_v19 = vsel %vm800_vm13, %v793_v28, 920167782 }
  0xe6   : > { %vm705_vm11 = vc.u32 %v3634_v17, %v3616_v62  ;;  %v809_v20 = vsel %vm797_vm12, %v3630_v15, %v3636_v18  ;;  %v810_v25 = vsel %vm800_vm13, %v796_v31, 1326507024  ;;  %vm798_vm15 = vcmp.lt.s32.totalorder %v3613_v59, 2 }
  0xe7   : > { %v707_v21 = vsel %vm705_vm11, %v706_v37, %v702_v26  ;;  %v807_v41 = vsel %vm799_vm14, %v3636_v18, %v806_v19  ;;  %v811_v43 = vsel %vm799_vm14, %v793_v28, %v810_v25  ;;  %v814_v47 = vand.u32 65535, %v3644_v34 }
  0xe8   : > { %v808_v44 = vsel %vm798_vm15, %v805_v39, %v807_v41  ;;  %v812_v46 = vsel %vm798_vm15, %v809_v20, %v811_v43  ;;  %v815_v30 = vshrl.u32 %v3644_v34, 16  ;;  %v708_v40 = vadd.s32 %v707_v21, %v703_v35 }
  0xe9   : > { %v816_v49 = vand.u32 65535, %v812_v46  ;;  %v817_v50 = vshrl.u32 %v812_v46, 16  ;;  %v839_v52 = vshrl.u32 %v808_v44, 16  ;;  %v838_v55 = vand.u32 65535, %v808_v44 }
  0xea   : > { %v570_v60 = vadd.f32 %v569_v54, %v532_v29  ;;  %v709_v61 = vadd.s32 536870912, %v708_v40  ;;  %v802_v25 = vsel %vm800_vm13, %v3636_v18, 2102212464  ;;  %v781_v41 = vshrl.u32 %v3380_v36, %v3610_v58 }
  0xeb   : > { %v819_v56 = vmul.u32 %v817_v50, %v814_v47  ;;  %v820_v32 = vmul.u32 %v816_v49, %v815_v30  ;;  %v841_v33 = vmul.u32 %v839_v52, %v814_v47  ;;  %v818_v63 = vmul.u32 %v816_v49, %v814_v47 }
  0xec   : > { %v821_v2 = vmul.u32 %v817_v50, %v815_v30  ;;  %v840_v4 = vmul.u32 %v838_v55, %v814_v47  ;;  %v842_v11 = vmul.u32 %v838_v55, %v815_v30  ;;  %v3675_v13 = vadd.f32 %v603_v1, %v570_v60  ;;  %v495_v1 = vpop.f32.mrf.mxu2 }
  0xed   : > { %v822_v0 = vshll.u32 %v819_v56, 16  ;;  %v844_v5 = vshll.u32 %v841_v33, 16  ;;  %v824_v7 = vshll.u32 %v820_v32, 16  ;;  %v3677_v16 = vshrl.u32 %v709_v61, 30 }
  0xee   : > { %v823_v24 = vshrl.u32 %v819_v56, 16  ;;  %v843_v28 = vmul.u32 %v839_v52, %v815_v30  ;;  %v846_v31 = vshll.u32 %v842_v11, 16  ;;  %v923_v19 = vand.u32 2139095040, %v3675_v13 }
  0xef   : > { %vm826_vm0 = vc.u32 %v818_v63, %v822_v0  ;;  %v828_v9 = vadd.s32 %v822_v0, %v818_v63  ;;  %vm848_vm2 = vc.u32 %v840_v4, %v844_v5  ;;  %v850_v37 = vadd.s32 %v844_v5, %v840_v4 }
  0xf0   : > { %v827_v12 = vsel %vm826_vm0, 1, %v3379_v6  ;;  %v849_v35 = vsel %vm848_vm2, 1, %v3379_v6  ;;  %v711_v20 = vshll.u32 %v3677_v16, 30  ;;  %v825_v43 = vshrl.u32 %v820_v32, 16 }
  0xf1   : > { %v829_v22 = vadd.s32 %v827_v12, %v821_v2  ;;  %vm830_vm1 = vc.u32 %v828_v9, %v824_v7  ;;  %v851_v39 = vadd.s32 %v849_v35, %v843_v28  ;;  %vm852_vm3 = vc.u32 %v850_v37, %v846_v31 }
  0xf2   : > { %v831_v26 = vsel %vm830_vm1, 1, %v3379_v6  ;;  %v853_v44 = vsel %vm852_vm3, 1, %v3379_v6  ;;  %v924_v46 = vshrl.u32 %v923_v19, 23  ;;  %v845_v47 = vshrl.u32 %v841_v33, 16 }
  0xf3   : > { %v833_v29 = vadd.s32 %v831_v26, %v829_v22  ;;  %v855_v30 = vadd.s32 %v853_v44, %v851_v39  ;;  %v801_v49 = vsel %vm797_vm12, %v781_v41, %v3628_v14  ;;  %v803_v50 = vsel %vm799_vm14, %v3630_v15, %v802_v25  ;;  %v537_v39 = vpop.f32.mrf.mxu3 }
  0xf4   : > { %v3232_v52 = vadd.s32 4294967169, %v924_v46  ;;  %v3697_v54 = vsub.s32 %v708_v40, %v711_v20  ;;  %v847_v58 = vshrl.u32 %v842_v11, 16  ;;  %v3699_v56 = vadd.s32 %v850_v37, %v846_v31 }
  0xf5   : > { %v834_v21 = vadd.s32 %v833_v29, %v823_v24  ;;  %v856_v55 = vadd.s32 %v855_v30, %v845_v47  ;;  %v419_v33 = vadd.f32 %v3570_v53, %v3574_v3  ;;  %v804_v14 = vsel %vm798_vm15, %v801_v49, %v803_v50  ;;  %v573_v50 = vpop.f32.mrf.mxu0 }
  0xf6   : > { %v930_v32 = vadd.s32 1, %v3232_v52  ;;  %v714_v15 = vsub.s32 0, %v3697_v54  ;;  %v920_v61 = vand.u32 2147483647, %v3675_v13  ;;  %vm713_vm6 = vcmp.lt.s32.totalorder %v3697_v54, 0 }
  0xf7   : > { %v3695_v18 = vadd.s32 %v834_v21, %v825_v43  ;;  %v857_v60 = vadd.s32 %v856_v55, %v847_v58  ;;  %v858_v0 = vmul.u32 %v3644_v34, %v804_v14  ;;  %v457_v3 = vadd.f32 %v3572_v57, %v419_v33 }
  0xf8   : > { %vm931_vm5 = vcmp.gt.s32.totalorder %v930_v32, 0  ;;  %v715_v5 = vsel %vm713_vm6, %v714_v15, %v3697_v54  ;;  %v927_v9 = vand.u32 8388607, %v920_v61 }
  0xf9   : > { %vm860_vm4 = vc.u32 %v3695_v18, %v3699_v56  ;;  %v861_v40 = vadd.s32 1, %v857_v60  ;;  %v932_v63 = vsel %vm931_vm5, %v930_v32, 0  ;;  %v496_v7 = vadd.f32 %v495_v1, %v457_v3  ;;  %v607_v1 = vpop.f32.mrf.mxu1 }
  0xfa   : > { %v934_v53 = vand.u32 31, %v932_v63  ;;  %v716_v29 = vclz %v715_v5  ;;  %v3730_v35 = vshrl.u32 %v932_v63, 5  ;;  %v928_v43 = vor.u32 8388608, %v927_v9 }
  0xfb   : > { %v862_v59 = vsel %vm860_vm4, %v861_v40, %v857_v60  ;;  %v538_v47 = vadd.f32 %v537_v39, %v496_v7 }
  0xfc   : > { %v863_v2 = vadd.s32 %v862_v59, %v858_v0  ;;  %v3712_v4 = vsub.s32 32, %v934_v53  ;;  %v937_v12 = vshll.u32 %v3380_v36, %v934_v53  ;;  %v940_v57 = vshll.u32 %v3381_v38, %v934_v53 }
  0xfd   : > { %v946_v26 = vshll.u32 %v3383_v45, %v934_v53  ;;  %v943_v25 = vshll.u32 %v3382_v42, %v934_v53  ;;  %v949_v44 = vshll.u32 %v3384_v48, %v934_v53  ;;  %vm952_vm7 = vcmp.lt.s32.totalorder %v3730_v35, 1 }
  0xfe   : > { %v864_v11 = vadd.s32 536870912, %v863_v2  ;;  %v938_v34 = vshrl.u32 %v3381_v38, %v3712_v4  ;;  %v941_v22 = vshrl.u32 %v3382_v42, %v3712_v4  ;;  %v944_v24 = vshrl.u32 %v3383_v45, %v3712_v4 }
  0xff   : > { %v947_v28 = vshrl.u32 %v3384_v48, %v3712_v4  ;;  %v950_v37 = vshrl.u32 %v3385_v51, %v3712_v4  ;;  %vm955_vm8 = vcmp.lt.s32.totalorder %v3730_v35, 4  ;;  %v3227_v52 = vadd.s32 4294967294, %v716_v29 }
 0x100   : > { %v3728_v31 = vshrl.u32 %v864_v11, 30  ;;  %v3734_v19 = vor.u32 %v938_v34, %v937_v12  ;;  %v3736_v20 = vor.u32 %v941_v22, %v940_v57  ;;  %v945_v46 = vor.u32 %v944_v24, %v943_v25 }
 0x101   : > { %v948_v21 = vor.u32 %v947_v28, %v946_v26  ;;  %v951_v49 = vor.u32 %v950_v37, %v949_v44  ;;  %vm954_vm10 = vcmp.lt.s32.totalorder %v3730_v35, 3  ;;  %v3754_v33 = vshll.u32 %v928_v43, 8 }
 0x102   : > { %v866_v41 = vshll.u32 %v3728_v31, 30  ;;  %v960_v58 = vsel %vm952_vm7, %v3734_v19, %v3736_v20  ;;  %vm953_vm11 = vcmp.lt.s32.totalorder %v3730_v35, 2  ;;  %v964_v60 = vsel %vm952_vm7, %v3736_v20, %v945_v46 }
 0x103   : > { %v961_v55 = vsel %vm955_vm8, %v948_v21, 920167782  ;;  %v574_v15 = vadd.f32 %v573_v50, %v538_v47  ;;  %v965_v0 = vsel %vm955_vm8, %v951_v49, 1326507024  ;;  %vm3228_vm12 = vcmp.lt.s32.totalorder %v3227_v52, 0 }
 0x104   : > { %v3741_v30 = vsub.s32 %v863_v2, %v866_v41  ;;  %v962_v14 = vsel %vm954_vm10, %v945_v46, %v961_v55  ;;  %v966_v3 = vsel %vm954_vm10, %v948_v21, %v965_v0  ;;  %v969_v2 = vand.u32 65535, %v3754_v33 }
 0x105   : > { %v963_v63 = vsel %vm953_vm11, %v960_v58, %v962_v14  ;;  %v967_v59 = vsel %vm953_vm11, %v964_v60, %v966_v3  ;;  %v3772_v12 = vadd.f32 %v607_v1, %v574_v15  ;;  %v970_v34 = vshrl.u32 %v3754_v33, 16 }
 0x106   : > { %vm868_vm9 = vcmp.lt.s32.totalorder %v3741_v30, 0  ;;  %v869_v32 = vsub.s32 0, %v3741_v30  ;;  %v994_v5 = vshrl.u32 %v963_v63, 16  ;;  %v971_v7 = vand.u32 65535, %v967_v59 }
 0x107   : > { %v972_v9 = vshrl.u32 %v967_v59, 16  ;;  %v993_v11 = vand.u32 65535, %v963_v63  ;;  %v3775_v26 = vsel %vm3228_vm12, 0, %v3227_v52  ;;  %v1078_v37 = vand.u32 2139095040, %v3772_v12 }
 0x108   : > { %v870_v40 = vsel %vm868_vm9, %v869_v32, %v3741_v30  ;;  %v996_v22 = vmul.u32 %v994_v5, %v969_v2  ;;  %v975_v28 = vmul.u32 %v971_v7, %v970_v34  ;;  %v973_v39 = vmul.u32 %v971_v7, %v969_v2 }
 0x109   : > { %v871_v53 = vclz %v870_v40  ;;  %v974_v24 = vmul.u32 %v972_v9, %v969_v2  ;;  %v997_v29 = vmul.u32 %v993_v11, %v970_v34  ;;  %v724_v41 = vsub.s32 4294967266, %v3775_v26 }
 0x10a   : > { %v999_v21 = vshll.u32 %v996_v22, 16  ;;  %v995_v43 = vmul.u32 %v993_v11, %v969_v2  ;;  %v1075_v44 = vand.u32 2147483647, %v3772_v12  ;;  %v976_v47 = vmul.u32 %v972_v9, %v970_v34 }
 0x10b   : > { %v3230_v57 = vadd.s32 4294967294, %v871_v53  ;;  %v977_v25 = vshll.u32 %v974_v24, 16  ;;  %v979_v49 = vshll.u32 %v975_v28, 16  ;;  %v957_v52 = vsel %vm955_vm8, %v945_v46, 2102212464 }
 0x10c   : > { %v1001_v55 = vshll.u32 %v997_v29, 16  ;;  %v1079_v32 = vshrl.u32 %v1078_v37, 23  ;;  %vm1003_vm0 = vc.u32 %v995_v43, %v999_v21  ;;  %v1005_v60 = vadd.s32 %v999_v21, %v995_v43 }
 0x10d   : > { %vm3231_vm13 = vcmp.lt.s32.totalorder %v3230_v57, 0  ;;  %vm981_vm14 = vc.u32 %v973_v39, %v977_v25  ;;  %v983_v50 = vadd.s32 %v977_v25, %v973_v39  ;;  %v936_v40 = vshrl.u32 %v3380_v36, %v3712_v4 }
 0x10e   : > { %v982_v58 = vsel %vm981_vm14, 1, %v3379_v6  ;;  %v3783_v15 = vsel %vm3231_vm13, 0, %v3230_v57  ;;  %v998_v0 = vmul.u32 %v994_v5, %v970_v34  ;;  %v978_v1 = vshrl.u32 %v974_v24, 16 }
 0x10f   : > { %v984_v14 = vadd.s32 %v982_v58, %v976_v47  ;;  %vm985_vm15 = vc.u32 %v983_v50, %v979_v49  ;;  %v1004_v46 = vsel %vm1003_vm0, 1, %v3379_v6  ;;  %vm1007_vm1 = vc.u32 %v1005_v60, %v1001_v55 }
 0x110   : > { %v986_v63 = vsel %vm985_vm15, 1, %v3379_v6  ;;  %v956_v3 = vsel %vm952_vm7, %v936_v40, %v3734_v19  ;;  %v958_v59 = vsel %vm954_vm10, %v3736_v20, %v957_v52  ;;  %v1006_v2 = vadd.s32 %v1004_v46, %v998_v0 }
 0x111   : > { %v988_v53 = vadd.s32 %v986_v63, %v984_v14  ;;  %v1008_v7 = vsel %vm1007_vm1, 1, %v3379_v6  ;;  %v879_v4 = vsub.s32 4294967266, %v3783_v15  ;;  %v980_v9 = vshrl.u32 %v975_v28, 16 }
 0x112   : > { %v3235_v11 = vadd.s32 4294967169, %v1079_v32  ;;  %v1000_v34 = vshrl.u32 %v996_v22, 16  ;;  %v1010_v57 = vadd.s32 %v1008_v7, %v1006_v2  ;;  %v720_v24 = vsub.s32 32, %v3775_v26 }
 0x113   : > { %v989_v5 = vadd.s32 %v988_v53, %v978_v1  ;;  %v725_v19 = vadd.s32 127, %v724_v41  ;;  %v959_v25 = vsel %vm953_vm11, %v956_v3, %v958_v59  ;;  %v1002_v20 = vshrl.u32 %v997_v29, 16 }
 0x114   : > { %v1085_v39 = vadd.s32 1, %v3235_v11  ;;  %v1011_v21 = vadd.s32 %v1010_v57, %v1000_v34  ;;  %v880_v43 = vadd.s32 127, %v879_v4  ;;  %v3802_v47 = vadd.s32 %v1005_v60, %v1001_v55 }
 0x115   : > { %v3798_v37 = vadd.s32 %v989_v5, %v980_v9  ;;  %v1082_v28 = vand.u32 8388607, %v1075_v44  ;;  %v704_v22 = vadd.s32 %v3616_v62, %v3634_v17  ;;  %v721_v41 = vshll.u32 %v3697_v54, %v3775_v26 }
 0x116   : > { %vm1086_vm2 = vcmp.gt.s32.totalorder %v1085_v39, 0  ;;  %v1012_v49 = vadd.s32 %v1011_v21, %v1002_v20  ;;  %v859_v35 = vadd.s32 %v3699_v56, %v3695_v18  ;;  %v726_v58 = vshll.u32 %v725_v19, 23 }
 0x117   : > { %v1087_v50 = vsel %vm1086_vm2, %v1085_v39, 0  ;;  %vm1015_vm3 = vc.u32 %v3798_v37, %v3802_v47  ;;  %v722_v52 = vshrl.u32 %v704_v22, %v720_v24  ;;  %v1013_v55 = vmul.u32 %v3754_v33, %v959_v25 }
 0x118   : > { %v1089_v29 = vand.u32 31, %v1087_v50  ;;  %v1016_v32 = vadd.s32 1, %v1012_v49  ;;  %v875_v14 = vsub.s32 32, %v3783_v15  ;;  %v881_v62 = vshll.u32 %v880_v43, 23 }
 0x119   : > { %v1083_v17 = vor.u32 8388608, %v1082_v28  ;;  %v3818_v54 = vshrl.u32 %v1087_v50, 5  ;;  %v723_v9 = vor.u32 %v722_v52, %v721_v41  ;;  %v727_v5 = vor.u32 4788187, %v726_v58 }
 0x11a   : > { %v3816_v60 = vsub.s32 32, %v1089_v29  ;;  %v1017_v40 = vsel %vm1015_vm3, %v1016_v32, %v1012_v49  ;;  %v1092_v18 = vshll.u32 %v3380_v36, %v1089_v29  ;;  %v1095_v56 = vshll.u32 %v3381_v38, %v1089_v29 }
 0x11b   : > { %v1018_v26 = vadd.s32 %v1017_v40, %v1013_v55  ;;  %v1098_v0 = vshll.u32 %v3382_v42, %v1089_v29  ;;  %v1101_v53 = vshll.u32 %v3383_v45, %v1089_v29  ;;  %v1104_v4 = vshll.u32 %v3384_v48, %v1089_v29 }
 0x11c   : > { %v1093_v63 = vshrl.u32 %v3381_v38, %v3816_v60  ;;  %v1096_v33 = vshrl.u32 %v3382_v42, %v3816_v60  ;;  %v1099_v1 = vshrl.u32 %v3383_v45, %v3816_v60  ;;  %v1102_v46 = vshrl.u32 %v3384_v48, %v3816_v60 }
 0x11d   : > { %v1105_v3 = vshrl.u32 %v3385_v51, %v3816_v60  ;;  %v1019_v59 = vadd.s32 536870912, %v1018_v26  ;;  %v877_v57 = vshrl.u32 %v859_v35, %v875_v14  ;;  %vm1107_vm4 = vcmp.lt.s32.totalorder %v3818_v54, 1 }
 0x11e   : > { %v3834_v2 = vor.u32 %v1093_v63, %v1092_v18  ;;  %v3836_v7 = vor.u32 %v1096_v33, %v1095_v56  ;;  %v1100_v11 = vor.u32 %v1099_v1, %v1098_v0  ;;  %v1103_v34 = vor.u32 %v1102_v46, %v1101_v53 }
 0x11f   : > { %v3839_v24 = vshrl.u32 %v1019_v59, 30  ;;  %v1106_v39 = vor.u32 %v1105_v3, %v1104_v4  ;;  %v876_v19 = vshll.u32 %v3741_v30, %v3783_v15  ;;  %v882_v25 = vor.u32 4788187, %v881_v62 }
 0x120   : > { %vm1110_vm5 = vcmp.lt.s32.totalorder %v3818_v54, 4  ;;  %v1115_v20 = vsel %vm1107_vm4, %v3834_v2, %v3836_v7  ;;  %vm1109_vm6 = vcmp.lt.s32.totalorder %v3818_v54, 3  ;;  %v3853_v28 = vshll.u32 %v1083_v17, 8 }
 0x121   : > { %v1021_v21 = vshll.u32 %v3839_v24, 30  ;;  %v1116_v43 = vsel %vm1110_vm5, %v1103_v34, 920167782  ;;  %v730_v22 = vcvt.s32.f32 %v723_v9  ;;  %vm1108_vm7 = vcmp.lt.s32.totalorder %v3818_v54, 2 }
 0x122   : > { %v1117_v30 = vsel %vm1109_vm6, %v1100_v11, %v1116_v43  ;;  %v1119_v15 = vsel %vm1107_vm4, %v3836_v7, %v1100_v11  ;;  %v878_v49 = vor.u32 %v877_v57, %v876_v19  ;;  %v1120_v35 = vsel %vm1110_vm5, %v1106_v39, 1326507024 }
 0x123   : > { %v1022_v50 = vsub.s32 %v1018_v26, %v1021_v21  ;;  %v1118_v41 = vsel %vm1108_vm7, %v1115_v20, %v1117_v30  ;;  %v728_v29 = vand.u32 2147483647, %v727_v5  ;;  %v883_v52 = vand.u32 2147483647, %v882_v25 }
 0x124   : > { %v1121_v58 = vsel %vm1109_vm6, %v1103_v34, %v1120_v35  ;;  %v1148_v55 = vand.u32 65535, %v1118_v41  ;;  %v1125_v62 = vshrl.u32 %v3853_v28, 16  ;;  %v1124_v17 = vand.u32 65535, %v3853_v28 }
 0x125   : > { %vm1023_vm8 = vcmp.lt.s32.totalorder %v1022_v50, 0  ;;  %v1024_v32 = vsub.s32 0, %v1022_v50  ;;  %v1122_v14 = vsel %vm1108_vm7, %v1119_v15, %v1121_v58  ;;  %v1149_v56 = vshrl.u32 %v1118_v41, 16 }
 0x126   : > { %v1126_v40 = vand.u32 65535, %v1122_v14  ;;  %v1127_v18 = vshrl.u32 %v1122_v14, 16  ;;  %v885_v26 = vcvt.s32.f32 %v878_v49  ;;  %v1152_v33 = vmul.u32 %v1148_v55, %v1125_v62 }
 0x127   : > { %v1025_v63 = vsel %vm1023_vm8, %v1024_v32, %v1022_v50  ;;  %v3871_v0 = vmul.f32 %v730_v22, %v728_v29  ;;  %v1014_v3 = vadd.s32 %v3802_v47, %v3798_v37  ;;  %v1151_v4 = vmul.u32 %v1149_v56, %v1124_v17 }
 0x128   : > { %v1026_v1 = vclz %v1025_v63  ;;  %v1129_v53 = vmul.u32 %v1127_v18, %v1124_v17  ;;  %v886_v46 = vmul.f32 %v885_v26, %v883_v52  ;;  %v1130_v59 = vmul.u32 %v1126_v40, %v1125_v62 }
 0x129   : > { %v1112_v5 = vsel %vm1110_vm5, %v1100_v11, 2102212464  ;;  %v1128_v34 = vmul.u32 %v1126_v40, %v1124_v17  ;;  %v1131_v39 = vmul.u32 %v1127_v18, %v1125_v62  ;;  %v1150_v19 = vmul.u32 %v1148_v55, %v1124_v17 }
 0x12a   : > { %v3233_v9 = vadd.s32 4294967294, %v1026_v1  ;;  %v1132_v57 = vshll.u32 %v1129_v53, 16  ;;  %v1154_v25 = vshll.u32 %v1151_v4, 16  ;;  %v1156_v20 = vshll.u32 %v1152_v33, 16 }
 0x12b   : > { %v1134_v21 = vshll.u32 %v1130_v59, 16  ;;  %v1153_v41 = vmul.u32 %v1149_v56, %v1125_v62  ;;  %v1091_v32 = vshrl.u32 %v3380_v36, %v3816_v60  ;;  %v1133_v14 = vshrl.u32 %v1129_v53, 16 }
 0x12c   : > { %vm3234_vm9 = vcmp.lt.s32.totalorder %v3233_v9, 0  ;;  %vm1136_vm10 = vc.u32 %v1128_v34, %v1132_v57  ;;  %v1138_v43 = vadd.s32 %v1132_v57, %v1128_v34  ;;  %vm1158_vm11 = vc.u32 %v1150_v19, %v1154_v25 }
 0x12d   : > { %v1029_v22 = vsel %vm3234_vm9, 0, %v3233_v9  ;;  %v1137_v30 = vsel %vm1136_vm10, 1, %v3379_v6  ;;  %v1160_v37 = vadd.s32 %v1154_v25, %v1150_v19  ;;  %v1159_v35 = vsel %vm1158_vm11, 1, %v3379_v6 }
 0x12e   : > { %v1030_v47 = vsub.s32 32, %v1029_v22  ;;  %v1034_v15 = vsub.s32 4294967266, %v1029_v22  ;;  %v1139_v49 = vadd.s32 %v1137_v30, %v1131_v39  ;;  %v1031_v11 = vshll.u32 %v1022_v50, %v1029_v22 }
 0x12f   : > { %vm1140_vm12 = vc.u32 %v1138_v43, %v1134_v21  ;;  %vm1162_vm13 = vc.u32 %v1160_v37, %v1156_v20  ;;  %v1161_v55 = vadd.s32 %v1159_v35, %v1153_v41  ;;  %v1155_v62 = vshrl.u32 %v1151_v4, 16 }
 0x130   : > { %v1032_v29 = vshrl.u32 %v1014_v3, %v1030_v47  ;;  %v1035_v52 = vadd.s32 127, %v1034_v15  ;;  %v1141_v58 = vsel %vm1140_vm12, 1, %v3379_v6  ;;  %v1163_v40 = vsel %vm1162_vm13, 1, %v3379_v6 }
 0x131   : > { %v1143_v17 = vadd.s32 %v1141_v58, %v1139_v49  ;;  %v1165_v50 = vadd.s32 %v1163_v40, %v1161_v55  ;;  %v1111_v56 = vsel %vm1107_vm4, %v1091_v32, %v3834_v2  ;;  %v1113_v63 = vsel %vm1109_vm6, %v3836_v7, %v1112_v5 }
 0x132   : > { %v1033_v18 = vor.u32 %v1032_v29, %v1031_v11  ;;  %v1036_v26 = vshll.u32 %v1035_v52, 23  ;;  %v1135_v1 = vshrl.u32 %v1130_v59, 16  ;;  %v1157_v60 = vshrl.u32 %v1152_v33, 16 }
 0x133   : > { %v1144_v3 = vadd.s32 %v1143_v17, %v1133_v14  ;;  %v1166_v53 = vadd.s32 %v1165_v50, %v1155_v62  ;;  %v732_v34 = vxor.u32 2147483648, %v3871_v0  ;;  %v887_v57 = vxor.u32 2147483648, %v886_v46 }
 0x134   : > { %v1037_v9 = vor.u32 4788187, %v1036_v26  ;;  %v1164_v19 = vadd.s32 %v1160_v37, %v1156_v20  ;;  %v1040_v25 = vcvt.s32.f32 %v1033_v18  ;;  %v1114_v21 = vsel %vm1108_vm7, %v1111_v56, %v1113_v63 }
 0x135   : > { %v1145_v39 = vadd.s32 %v1144_v3, %v1135_v1  ;;  %v1167_v2 = vadd.s32 %v1166_v53, %v1157_v60  ;;  %vm612_vm15 = vcmp.lt.s32.totalorder %v3576_v8, 0  ;;  %vm767_vm0 = vcmp.lt.s32.totalorder %v3582_v23, 0 }
 0x136   : > { %v1038_v4 = vand.u32 2147483647, %v1037_v9  ;;  %v733_v33 = vsel %vm612_vm15, %v732_v34, %v3871_v0  ;;  %v888_v5 = vsel %vm767_vm0, %v887_v57, %v886_v46  ;;  %v1168_v20 = vmul.u32 %v3853_v28, %v1114_v21 }
 0x137   : > { %vm1170_vm14 = vc.u32 %v1145_v39, %v1164_v19  ;;  %v1171_v59 = vadd.s32 1, %v1167_v2  ;;  %vm3902_vm1 = vcmp.le.f32.partialorder %v610_v10, 0.7853982  ;;  %vm3908_vm2 = vcmp.le.f32.partialorder %v765_v27, 0.7853982 }
 0x138   : > { %v1041_v7 = vmul.f32 %v1040_v25, %v1038_v4  ;;  %vm922_vm3 = vcmp.lt.s32.totalorder %v3675_v13, 0  ;;  %v3916_v28 = vsel %vm3902_vm1, %v3576_v8, %v733_v33  ;;  %v3921_v10 = vsel %vm3908_vm2, %v3582_v23, %v888_v5 }
 0x139   : > { %v1172_v54 = vsel %vm1170_vm14, %v1171_v59, %v1167_v2  ;;  %vm3925_vm4 = vcmp.le.f32.partialorder %v920_v61, 0.7853982  ;;  %v3938_v15 = vmul.f32 %v3916_v28, %v3916_v28  ;;  %v3942_v49 = vmul.f32 %v3921_v10, %v3921_v10 }
 0x13a   : > { %v1042_v43 = vxor.u32 2147483648, %v1041_v7  ;;  %v1173_v0 = vadd.s32 %v1172_v54, %v1168_v20  ;;  %v734_v50 = vsub.s32 4, %v3677_v16  ;;  %v889_v34 = vsub.s32 4, %v3728_v31 }
 0x13b   : > { %v746_v35 = vmul.f32 -0.00019511016, %v3938_v15  ;;  %v901_v29 = vmul.f32 -0.00019511016, %v3942_v49  ;;  %v894_v1 = vmul.f32 -0.001358992, %v3942_v49  ;;  %v1169_v57 = vadd.s32 %v1164_v19, %v1145_v39 }
 0x13c   : > { %v1043_v46 = vsel %vm922_vm3, %v1042_v43, %v1041_v7  ;;  %v1174_v47 = vadd.s32 536870912, %v1173_v0  ;;  %v739_v53 = vmul.f32 -0.001358992, %v3938_v15  ;;  %v735_v21 = vsel %vm612_vm15, %v734_v50, %v3677_v16 }
 0x13d   : > { %v3934_v37 = vsel %vm3925_vm4, %v3675_v13, %v1043_v46  ;;  %v747_v32 = vadd.f32 0.008332121, %v746_v35  ;;  %v902_v14 = vadd.f32 0.008332121, %v901_v29  ;;  %v895_v59 = vadd.f32 0.041655596, %v894_v1 }
 0x13e   : > { %v3944_v61 = vshrl.u32 %v1174_v47, 30  ;;  %v1048_v41 = vmul.f32 %v3934_v37, %v3934_v37  ;;  %v1044_v54 = vsub.s32 4, %v3839_v24  ;;  %v740_v46 = vadd.f32 0.041655596, %v739_v53 }
 0x13f   : > { %v748_v56 = vmul.f32 %v747_v32, %v3938_v15  ;;  %v903_v63 = vmul.f32 %v902_v14, %v3942_v49  ;;  %v737_v39 = vsel %vm3902_vm1, 0, %v735_v21  ;;  %v896_v16 = vmul.f32 %v895_v59, %v3942_v49 }
 0x140   : > { %v1176_v11 = vshll.u32 %v3944_v61, 30  ;;  %v1056_v58 = vmul.f32 -0.00019511016, %v1048_v41  ;;  %v1049_v26 = vmul.f32 -0.001358992, %v1048_v41  ;;  %v890_v35 = vsel %vm767_vm0, %v889_v34, %v3728_v31 }
 0x141   : > { %v749_v2 = vadd.f32 -0.16666654, %v748_v56  ;;  %v904_v7 = vadd.f32 -0.16666654, %v903_v63  ;;  %v741_v22 = vmul.f32 %v740_v46, %v3938_v15  ;;  %vm1077_vm7 = vcmp.lt.s32.totalorder %v3772_v12, 0 }
 0x142   : > { %v1177_v52 = vsub.s32 %v1173_v0, %v1176_v11  ;;  %v1057_v40 = vadd.f32 0.008332121, %v1056_v58  ;;  %v1050_v60 = vadd.f32 0.041655596, %v1049_v26  ;;  %v892_v26 = vsel %vm3908_vm2, 0, %v890_v35 }
 0x143   : > { %v750_v19 = vmul.f32 %v749_v2, %v3938_v15  ;;  %v905_v29 = vmul.f32 %v904_v7, %v3942_v49  ;;  %vm3981_vm8 = vcmp.le.f32.partialorder %v1075_v44, 0.7853982  ;;  %vm1258_vm10 = vcmask 261120  }
 0x144   : > { %vm1178_vm5 = vcmp.lt.s32.totalorder %v1177_v52, 0  ;;  %v1179_v55 = vsub.s32 0, %v1177_v52  ;;  %v1058_v3 = vmul.f32 %v1057_v40, %v1048_v41  ;;  %v1051_v0 = vmul.f32 %v1050_v60, %v1048_v41 }
 0x145   : > { %v751_v40 = vadd.f32 1.0, %v750_v19  ;;  %v906_v31 = vadd.f32 1.0, %v905_v29  ;;  %vm1063_vm1 = vweird.f32 %v3675_v13 }
 0x146   : > { %v1180_v17 = vsel %vm1178_vm5, %v1179_v55, %v1177_v52  ;;  %v1059_v33 = vadd.f32 -0.16666654, %v1058_v3  ;;  %v1045_v55 = vsel %vm922_vm3, %v1044_v54, %v3839_v24  ;;  %v1052_v32 = vadd.f32 -0.4999988, %v1051_v0 }
 0x147   : > { %v1181_v18 = vclz %v1180_v17  ;;  %v1047_v50 = vsel %vm3925_vm4, 0, %v1045_v55  ;;  %v742_v3 = vadd.f32 -0.4999988, %v741_v22  ;;  %v909_v24 = vadd.s32 3, %v892_v26 }
 0x148   : > { %v1053_v1 = vmul.f32 %v1052_v32, %v1048_v41  ;;  %v752_v60 = vmul.f32 %v751_v40, %v3916_v28  ;;  %v1064_v53 = vadd.s32 3, %v1047_v50  ;;  %v907_v34 = vmul.f32 %v906_v31, %v3921_v10 }
 0x149   : > { %v3236_v62 = vadd.s32 4294967294, %v1181_v18  ;;  %v754_v18 = vadd.s32 3, %v737_v39  ;;  %v743_v21 = vmul.f32 %v742_v3, %v3938_v15  ;;  %v910_v10 = vand.u32 3, %v909_v24  ;;  %v1230_v15 = vld [vmem:[%s5134_s3] sm:$0xff]  ;;  %v1231_v3 = vld [vmem:[%s5134_s3 + $0x8] sm:$0xff] }
 0x14a   : > { %v1054_v44 = vadd.f32 1.0, %v1053_v1  ;;  %v758_v7 = vxor.u32 2147483648, %v752_v60  ;;  %v1260_v29 = vsel %vm1258_vm10, %v1230_v15, 0  ;;  %vm908_vm4 = vweird.f32 %v3582_v23 }
 0x14b   : > { %vm3237_vm6 = vcmp.lt.s32.totalorder %v3236_v62, 0  ;;  %v744_v0 = vadd.f32 1.0, %v743_v21  ;;  %vm912_vm13 = vcmp.eq.s32.totalorder %v910_v10, 0  ;;  %vm915_vm15 = vcmp.eq.s32.totalorder %v910_v10, 2 }
 0x14c   : > { %v1184_v9 = vsel %vm3237_vm6, 0, %v3236_v62  ;;  %v897_v62 = vadd.f32 -0.4999988, %v896_v16  ;;  %v1071_v54 = vxor.u32 2147483648, %v1054_v44  ;;  %vm911_vm0 = vcmp.lt.s32.totalorder %v910_v10, 2 }
 0x14d   : > { %v1185_v4 = vsub.s32 32, %v1184_v9  ;;  %v1189_v25 = vsub.s32 4294967266, %v1184_v9  ;;  %v1186_v5 = vshll.u32 %v1177_v52, %v1184_v9  ;;  %v1060_v52 = vmul.f32 %v1059_v33, %v1048_v41 }
 0x14e   : > { %v898_v27 = vmul.f32 %v897_v62, %v3942_v49  ;;  %v1065_v49 = vand.u32 3, %v1064_v53  ;;  %v761_v32 = vxor.u32 2147483648, %v744_v0  ;;  %v4006_v62 = vand.u32 4294901760, %v1260_v29 }
 0x14f   : > { %v1187_v20 = vshrl.u32 %v1169_v57, %v1185_v4  ;;  %v1190_v43 = vadd.s32 127, %v1189_v25  ;;  %v1061_v56 = vadd.f32 1.0, %v1060_v52  ;;  %v755_v4 = vand.u32 3, %v754_v18 }
 0x150   : > { %v1199_v25 = vsub.s32 4, %v3944_v61  ;;  %v899_v59 = vadd.f32 1.0, %v898_v27  ;;  %vm1066_vm11 = vcmp.lt.s32.totalorder %v1065_v49, 2  ;;  %vm1067_vm12 = vcmp.eq.s32.totalorder %v1065_v49, 0 }
 0x151   : > { %v1188_v47 = vor.u32 %v1187_v20, %v1186_v5  ;;  %v1191_v11 = vshll.u32 %v1190_v43, 23  ;;  %v1062_v41 = vmul.f32 %v1061_v56, %v3934_v37  ;;  %vm757_vm9 = vcmp.eq.s32.totalorder %v755_v4, 0 }
 0x152   : > { %v913_v20 = vxor.u32 2147483648, %v907_v34  ;;  %v1200_v43 = vsel %vm1077_vm7, %v1199_v25, %v3944_v61  ;;  %vm1070_vm14 = vcmp.eq.s32.totalorder %v1065_v49, 2  ;;  %v759_v26 = vsel %vm757_vm9, %v744_v0, %v758_v7  ;;  %v1232_v49 = vld [vmem:[%s5134_s3 + $0x10] sm:$0xff] }
 0x153   : > { %v1192_v58 = vor.u32 4788187, %v1191_v11  ;;  %v1195_v17 = vcvt.s32.f32 %v1188_v47  ;;  %v1068_v33 = vxor.u32 2147483648, %v1062_v41  ;;  %v916_v11 = vxor.u32 2147483648, %v899_v59 }
 0x154   : > { %v1202_v39 = vsel %vm3981_vm8, 0, %v1200_v43  ;;  %v914_v61 = vsel %vm912_vm13, %v899_v59, %v913_v20  ;;  %v1072_v55 = vsel %vm1070_vm14, %v1071_v54, %v1062_v41  ;;  %vm756_vm2 = vcmp.lt.s32.totalorder %v755_v4, 2 }
 0x155   : > { %v1193_v14 = vand.u32 2147483647, %v1192_v58  ;;  %v1069_v35 = vsel %vm1067_vm12, %v1054_v44, %v1068_v33  ;;  %v1219_v22 = vadd.s32 3, %v1202_v39  ;;  %vm760_vm3 = vcmp.eq.s32.totalorder %v755_v4, 2 }
 0x156   : > { %v762_v1 = vsel %vm760_vm3, %v761_v32, %v752_v60  ;;  %v4014_v13 = vsub.f32 %v1260_v29, %v4006_v62  ;;  %vm753_vm5 = vweird.f32 %v3576_v8  ;;  %v1263_v60 = vsel %vm1258_vm10, %v1231_v3, 0 }
 0x157   : > { %v1196_v63 = vmul.f32 %v1195_v17, %v1193_v14  ;;  %v1073_v14 = vsel %vm1066_vm11, %v1069_v35, %v1072_v55  ;;  %v917_v17 = vsel %vm915_vm15, %v916_v11, %v907_v34  ;;  %v1220_v24 = vand.u32 3, %v1219_v22 }
 0x158   : > { %v918_v31 = vsel %vm911_vm0, %v914_v61, %v917_v17  ;;  %v4023_v44 = vand.u32 4294901760, %v1263_v60  ;;  %vm1218_vm9 = vweird.f32 %v3772_v12  ;;  %v1266_v43 = vsel %vm1258_vm10, %v1232_v49, 0 }
 0x159   : > { %v1197_v9 = vxor.u32 2147483648, %v1196_v63  ;;  %v919_v27 = vsel %vm908_vm4, nan, %v918_v31  ;;  %vm1221_vm6 = vcmp.lt.s32.totalorder %v1220_v24, 2  ;;  %v4039_v15 = vand.u32 4294901760, %v1266_v43 }
 0x15a   : > { %v4020_v4 = vand.u32 4294901760, %v919_v27 }
 0x15b   : > { %v1198_v57 = vsel %vm1077_vm7, %v1197_v9, %v1196_v63  ;;  %v1074_v63 = vsel %vm1063_vm1, nan, %v1073_v14  ;;  %v763_v9 = vsel %vm756_vm2, %v759_v26, %v762_v1  ;;  %vm1222_vm7 = vcmp.eq.s32.totalorder %v1220_v24, 0  ;;  %v1237_v1 = vld [vmem:[%s5135_s4 + $0x18] sm:$0xff] }
 0x15c   : > { %v1201_v28 = vsel %vm3981_vm8, %v3772_v12, %v1198_v57  ;;  %v4016_v34 = vand.u32 4294901760, %v1074_v63  ;;  %v764_v57 = vsel %vm753_vm5, nan, %v763_v9  ;;  %vm1225_vm8 = vcmp.eq.s32.totalorder %v1220_v24, 2  ;;  %1255 = vperm.xlu2 %3314, %v1237_v1   ;;  %v1236_v24 = vld [vmem:[%s5135_s4 + $0x10] sm:$0xff]  ;;  %v2173_v9 = vld [vmem:[%s5137_s6] sm:$0xff] }
 0x15d   : > { %v1203_v2 = vmul.f32 %v1201_v28, %v1201_v28  ;;  %v1349_v10 = vsub.f32 %v919_v27, %v4020_v4 }
 0x15e   : > { %v1343_v8 = vsub.f32 %v1074_v63, %v4016_v34 }
 0x15f   : > { %v1211_v37 = vmul.f32 -0.00019511016, %v1203_v2  ;;  %v1204_v5 = vmul.f32 -0.001358992, %v1203_v2  ;;  %v1350_v0 = vand.u32 4294901760, %v1349_v10 }
 0x160   : > { %v1344_v20 = vand.u32 4294901760, %v1343_v8 }
 0x161   : > { %v1212_v46 = vadd.f32 0.008332121, %v1211_v37  ;;  %v1205_v47 = vadd.f32 0.041655596, %v1204_v5  ;;  %v1300_v37 = vsub.f32 %v1263_v60, %v4023_v44  ;;  %v1351_v61 = vsub.f32 %v1349_v10, %v1350_v0 }
 0x162   : > { %v1345_v39 = vsub.f32 %v1343_v8, %v1344_v20 }
 0x163   : > { %v1213_v19 = vmul.f32 %v1212_v46, %v1203_v2  ;;  %v1206_v16 = vmul.f32 %v1205_v47, %v1203_v2  ;;  %v1301_v47 = vand.u32 4294901760, %v1300_v37  ;;  %v1352_v22 = vand.u32 4294901760, %v1351_v61 }
 0x164   : > { %1250 = vperm.xlu2 %3314, %v1236_v24  }
 0x165   : > { %v1214_v52 = vadd.f32 -0.16666654, %v1213_v19  ;;  %v1207_v58 = vadd.f32 -0.4999988, %v1206_v16  ;;  %v1233_v16 = vld [vmem:[%s5134_s3 + $0x18] sm:$0xff]  ;;  %v1302_v29 = vsub.f32 %v1300_v37, %v1301_v47 }
 0x166   : > { %v1269_v32 = vsel %vm1258_vm10, %v1233_v16, 0 }
 0x167   : > { %v1215_v40 = vmul.f32 %v1214_v52, %v1203_v2  ;;  %v1208_v18 = vmul.f32 %v1207_v58, %v1203_v2  ;;  %v4027_v2 = vand.u32 4294901760, %v764_v57  ;;  %v1308_v52 = vsub.f32 %v1266_v43, %v4039_v15 }
 0x168   : > { %v1346_v58 = vand.u32 4294901760, %v1345_v39  ;;  %v1303_v14 = vand.u32 4294901760, %v1302_v29 }
 0x169   : > { %v1216_v50 = vadd.f32 1.0, %v1215_v40  ;;  %v1209_v56 = vadd.f32 1.0, %v1208_v18  ;;  %v1355_v5 = vsub.f32 %v764_v57, %v4027_v2  ;;  %v1309_v17 = vand.u32 4294901760, %v1308_v52 }
 0x16a   : > { %v1315_v40 = vand.u32 4294901760, %v1269_v32 }
 0x16b   : > { %v1217_v53 = vmul.f32 %v1216_v50, %v1201_v28  ;;  %v1226_v30 = vxor.u32 2147483648, %v1209_v56  ;;  %v1293_v28 = vand.u32 4294901760, %v4014_v13  ;;  %v1356_v19 = vand.u32 4294901760, %v1355_v5 }
 0x16c   : > { %v1310_v26 = vsub.f32 %v1308_v52, %v1309_v17  ;;  %v1316_v31 = vsub.f32 %v1269_v32, %v1315_v40  ;;  %2179 = vperm.xlu2 %3314, %v2173_v9  }
 0x16d   : > { %v1223_v41 = vxor.u32 2147483648, %v1217_v53  ;;  %v1227_v25 = vsel %vm1225_vm8, %v1226_v30, %v1217_v53  ;;  %v1294_v33 = vsub.f32 %v4014_v13, %v1293_v28  ;;  %v1357_v55 = vsub.f32 %v1355_v5, %v1356_v19  ;;  %v2176_v53 = vld [vmem:[%s5137_s6 + $0x18] sm:$0xff]  ;;  %v3109_v30 = vld [vmem:[%s5138_s7 + $0x10] sm:$0xff] }
 0x16e   : > { %v1311_v50 = vand.u32 4294901760, %v1310_v26 }
 0x16f   : > { %v1224_v23 = vsel %vm1222_vm7, %v1209_v56, %v1223_v41  ;;  %v1295_v46 = vand.u32 4294901760, %v1294_v33  ;;  %v1358_v18 = vand.u32 4294901760, %v1357_v55  ;;  %v1317_v56 = vand.u32 4294901760, %v1316_v31 }
 0x170   : > { %v1228_v21 = vsel %vm1221_vm6, %v1224_v23, %v1227_v25 }
 0x171   : > { %v1229_v7 = vsel %vm1218_vm9, nan, %v1228_v21  ;;  %v1318_v63 = vsub.f32 %v1316_v31, %v1317_v56 }
 0x172   : > { %v1283_v59 = vand.u32 4294901760, %v1229_v7 }
 0x173   : > { %v1319_v3 = vand.u32 4294901760, %v1318_v63 }
 0x174   : > { %1284 = vmatpush.msra.mxu2 %v1283_v59  ;;  %1435 = vmatpush.msra.mxu1 %v1283_v59  ;;  %v1337_v12 = vsub.f32 %v1229_v7, %v1283_v59 }
 0x175   : > { %2194 = vperm.xlu2 %3314, %v2176_v53  }
 0x176   : > { %1286 = vmatpush.msra.mxu2 %v4016_v34  ;;  %1391 = vmatpush.msra.mxu0 %v1337_v12  ;;  %v1338_v54 = vand.u32 4294901760, %v1337_v12 }
 0x177   : > { %1437 = vmatpush.msra.mxu1 %v4016_v34 }
 0x178   : > { %1288 = vmatpush.msra.mxu2 %v4020_v4  ;;  %1394 = vmatpush.msra.mxu0 %v1343_v8  ;;  %v1339_v11 = vsub.f32 %v1337_v12, %v1338_v54 }
 0x179   : > { %1439 = vmatpush.msra.mxu1 %v4020_v4 }
 0x17a   : > { %1290 = vmatpush.msra.mxu2 %v4027_v2  ;;  %1397 = vmatpush.msra.mxu0 %v1349_v10  ;;  %v1340_v35 = vand.u32 4294901760, %v1339_v11 }
 0x17b   : > { %1441 = vmatpush.msra.mxu1 %v4027_v2  ;;  %1296 = vmatmul.f32.vlgmr.msra.gmra.mxu2 %v1295_v46 }
 0x17c   : > { %1482 = vmatpush.msrb.mxu2 %v1338_v54  ;;  %1341 = vmatpush.msra.mxu3 %v1340_v35 }
 0x17d   : > { %1400 = vmatpush.msra.mxu0 %v1355_v5  ;;  %1445 = vmatmul.f32.vlgmr.msra.gmra.mxu1 %v1293_v28 }
 0x17e   : > { %1486 = vmatpush.msrb.mxu2 %v1344_v20  ;;  %1347 = vmatpush.msra.mxu3 %v1346_v58 }
 0x17f   : > { %1403 = vmatmul.f32.vlgmr.msra.gmra.mxu0 %v4014_v13  ;;  %3123 = vperm.xlu2 %3314, %v3109_v30  }
 0x180   : > { %1490 = vmatpush.msrb.mxu2 %v1350_v0  ;;  %1353 = vmatpush.msra.mxu3 %v1352_v22 }
 0x182   : > { %1494 = vmatpush.msrb.mxu2 %v1356_v19  ;;  %1359 = vmatpush.msra.mxu3 %v1358_v18 }
 0x183   : > { %1304 = vmatmul.f32.gmra.mxu2 %v1303_v14  ;;  %1361 = vmatmul.f32.vlgmr.msra.gmra.mxu3 %v4006_v62 }
 0x184   : > { %1525 = vmatpush.msrb.mxu3 %v1283_v59 }
 0x185   : > { %1451 = vmatmul.f32.gmra.mxu1 %v1301_v47 }
 0x186   : > { %1527 = vmatpush.msrb.mxu3 %v4016_v34 }
 0x187   : > { %1408 = vmatmul.f32.gmra.mxu0 %v1300_v37 }
 0x188   : > { %1529 = vmatpush.msrb.mxu3 %v4020_v4  ;;  %v1241_v4 = vpop.permute.xlu1 %1240 }
 0x18a   : > { %1531 = vmatpush.msrb.mxu3 %v4027_v2  ;;  %v1246_v2 = vpop.permute.xlu0 %1245 }
 0x18b   : > { %1312 = vmatmul.f32.gmra.mxu2 %v1311_v50  ;;  %1365 = vmatmul.f32.gmra.mxu3 %v4023_v44 }
 0x18d   : > { %1457 = vmatmul.f32.gmra.mxu1 %v1309_v17 }
 0x18f   : > { %1413 = vmatmul.f32.gmra.mxu0 %v1308_v52 }
 0x193   : > { %1320 = vmatmul.f32.gmra.mxu2 %v1319_v3  ;;  %1369 = vmatmul.f32.gmra.mxu3 %v4039_v15 }
 0x195   : > { %1463 = vmatmul.f32.gmra.mxu1 %v1317_v56 }
 0x197   : > { %1418 = vmatmul.f32.gmra.mxu0 %v1316_v31 }
 0x19b   : > { %1373 = vmatmul.f32.gmra.mxu3 %v1315_v40  ;;  %1496 = vmatmul.f32.vlgmr.msrb.gmra.mxu2 %v4006_v62 }
 0x1a3   : > { %1500 = vmatmul.f32.gmra.mxu2 %v4023_v44  ;;  %1533 = vmatmul.f32.vlgmr.msrb.gmra.mxu3 %v4006_v62 }
 0x1ab   : > { %1504 = vmatmul.f32.gmra.mxu2 %v4039_v15  ;;  %1537 = vmatmul.f32.gmra.mxu3 %v4023_v44 }
 0x1b3   : > { %1508 = vmatmul.f32.gmra.mxu2 %v1315_v40  ;;  %1541 = vmatmul.f32.gmra.mxu3 %v4039_v15 }
 0x1b6   : > { %v4084_v5 = vpop.permute.xlu2 %1255 }
 0x1bb   : > { %1545 = vmatmul.f32.gmra.mxu3 %v1315_v40 }
 0x1be   : > { %v1251_v58 = vpop.permute.xlu2 %1250 }
 0x1fa   : > { %v1446_v21 = vpop.f32.mrf.mxu1 }
 0x1fc   : > { %v1404_v25 = vpop.f32.mrf.mxu0 }
 0x1fe   : > { %v1297_v27 = vpop.f32.mrf.mxu2 }
 0x1ff   : > { %v1298_v23 = vadd.f32 %v1297_v27, %v1241_v4 }
 0x202   : > { %v1452_v54 = vpop.f32.mrf.mxu1 }
 0x204   : > { %v1409_v33 = vpop.f32.mrf.mxu0 }
 0x206   : > { %v1305_v13 = vpop.f32.mrf.mxu2  ;;  %v1362_v34 = vpop.f32.mrf.mxu3 }
 0x207   : > { %v1363_v28 = vadd.f32 %v1362_v34, %v1298_v23  ;;  %v1306_v49 = vadd.f32 %v1305_v13, %v1246_v2 }
 0x209   : > { %v1405_v8 = vadd.f32 %v1404_v25, %v1363_v28 }
 0x20b   : > { %v1447_v59 = vadd.f32 %v1446_v21, %v1405_v8 }
 0x20e   : > { %v1313_v60 = vpop.f32.mrf.mxu2  ;;  %v1366_v41 = vpop.f32.mrf.mxu3 }
 0x20f   : > { %v1367_v10 = vadd.f32 %v1366_v41, %v1306_v49  ;;  %v1314_v40 = vadd.f32 %v1313_v60, %v1251_v58 }
 0x211   : > { %v1410_v20 = vadd.f32 %v1409_v33, %v1367_v10 }
 0x213   : > { %v1453_v15 = vadd.f32 %v1452_v54, %v1410_v20 }
 0x216   : > { %v4078_v62 = vpop.f32.mrf.mxu2  ;;  %v4080_v57 = vpop.f32.mrf.mxu3 }
 0x21e   : > { %v4082_v44 = vpop.f32.mrf.mxu3  ;;  %v1497_v7 = vpop.f32.mrf.mxu2 }
 0x21f   : > { %v1498_v37 = vadd.f32 %v1497_v7, %v1447_v59 }
 0x226   : > { %v1534_v12 = vpop.f32.mrf.mxu3  ;;  %v1501_v47 = vpop.f32.mrf.mxu2 }
 0x227   : > { %v4086_v43 = vadd.f32 %v1534_v12, %v1498_v37  ;;  %v1502_v19 = vadd.f32 %v1501_v47, %v1453_v15 }
 0x229   : > { %v1549_v0 = vand.u32 2147483647, %v4086_v43  ;;  %v1552_v46 = vand.u32 2139095040, %v4086_v43 }
 0x22b   : > { %v1553_v11 = vshrl.u32 %v1552_v46, 23  ;;  %v1556_v39 = vand.u32 8388607, %v1549_v0 }
 0x22d   : > { %v3238_v16 = vadd.s32 4294967169, %v1553_v11  ;;  %v1557_v35 = vor.u32 8388608, %v1556_v39 }
 0x22e   : > { %v1538_v61 = vpop.f32.mrf.mxu3 }
 0x22f   : > { %v1559_v29 = vadd.s32 1, %v3238_v16  ;;  %v4092_v52 = vadd.f32 %v1538_v61, %v1502_v19  ;;  %v4094_v55 = vshll.u32 %v1557_v35, 8  ;;  %v1371_v16 = vadd.f32 %v4080_v57, %v1314_v40 }
 0x231   : > { %vm1560_vm11 = vcmp.gt.s32.totalorder %v1559_v29, 0  ;;  %v1704_v22 = vand.u32 2147483647, %v4092_v52  ;;  %v1707_v14 = vand.u32 2139095040, %v4092_v52  ;;  %v1598_v26 = vand.u32 65535, %v4094_v55 }
 0x232   : > { %v1561_v32 = vsel %vm1560_vm11, %v1559_v29, 0  ;;  %v1599_v31 = vshrl.u32 %v4094_v55, 16 }
 0x233   : > { %v1563_v17 = vand.u32 31, %v1561_v32  ;;  %v1708_v50 = vshrl.u32 %v1707_v14, 23  ;;  %v1562_v56 = vshrl.u32 %v1561_v32, 5  ;;  %v4104_v3 = vand.u32 8388607, %v1704_v22 }
 0x235   : > { %v1564_v18 = vsub.s32 32, %v1563_v17  ;;  %v1566_v63 = vshll.u32 %v3380_v36, %v1563_v17  ;;  %v1569_v1 = vshll.u32 %v3381_v38, %v1563_v17  ;;  %v1572_v53 = vshll.u32 %v3382_v42, %v1563_v17 }
 0x236   : > { %v1575_v27 = vshll.u32 %v3383_v45, %v1563_v17  ;;  %v1578_v34 = vshll.u32 %v3384_v48, %v1563_v17  ;;  %v3241_v25 = vadd.s32 4294967169, %v1708_v50  ;;  %vm1581_vm12 = vcmp.lt.s32.totalorder %v1562_v56, 1 }
 0x237   : > { %v1567_v24 = vshrl.u32 %v3381_v38, %v1564_v18  ;;  %v1570_v9 = vshrl.u32 %v3382_v42, %v1564_v18  ;;  %v1573_v30 = vshrl.u32 %v3383_v45, %v1564_v18  ;;  %v1576_v13 = vshrl.u32 %v3384_v48, %v1564_v18 }
 0x238   : > { %v1579_v60 = vshrl.u32 %v3385_v51, %v1564_v18  ;;  %vm1584_vm13 = vcmp.lt.s32.totalorder %v1562_v56, 4  ;;  %v1565_v8 = vshrl.u32 %v3380_v36, %v1564_v18  ;;  %vm1583_vm14 = vcmp.lt.s32.totalorder %v1562_v56, 3 }
 0x239   : > { %v1568_v41 = vor.u32 %v1567_v24, %v1566_v63  ;;  %v1571_v4 = vor.u32 %v1570_v9, %v1569_v1  ;;  %v1574_v23 = vor.u32 %v1573_v30, %v1572_v53  ;;  %v1577_v28 = vor.u32 %v1576_v13, %v1575_v27 }
 0x23a   : > { %v1580_v21 = vor.u32 %v1579_v60, %v1578_v34  ;;  %v1714_v33 = vadd.s32 1, %v3241_v25  ;;  %vm1582_vm15 = vcmp.lt.s32.totalorder %v1562_v56, 2  ;;  %v1712_v35 = vor.u32 8388608, %v4104_v3 }
 0x23b   : > { %v1586_v2 = vsel %vm1584_vm13, %v1574_v23, 2102212464  ;;  %v1589_v7 = vsel %vm1581_vm12, %v1568_v41, %v1571_v4  ;;  %v1593_v49 = vsel %vm1581_vm12, %v1571_v4, %v1574_v23  ;;  %v1590_v59 = vsel %vm1584_vm13, %v1577_v28, 920167782 }
 0x23c   : > { %v1594_v10 = vsel %vm1584_vm13, %v1580_v21, 1326507024  ;;  %v1585_v37 = vsel %vm1581_vm12, %v1565_v8, %v1568_v41  ;;  %v1591_v12 = vsel %vm1583_vm14, %v1574_v23, %v1590_v59  ;;  %v1587_v54 = vsel %vm1583_vm14, %v1571_v4, %v1586_v2 }
 0x23d   : > { %v1595_v20 = vsel %vm1583_vm14, %v1577_v28, %v1594_v10  ;;  %v1592_v46 = vsel %vm1582_vm15, %v1589_v7, %v1591_v12  ;;  %vm1715_vm0 = vcmp.gt.s32.totalorder %v1714_v33, 0  ;;  %v4117_v61 = vsel %vm1582_vm15, %v1585_v37, %v1587_v54 }
 0x23e   : > { %v1596_v47 = vsel %vm1582_vm15, %v1593_v49, %v1595_v20  ;;  %v1622_v39 = vand.u32 65535, %v1592_v46  ;;  %v1623_v19 = vshrl.u32 %v1592_v46, 16  ;;  %v1716_v32 = vsel %vm1715_vm0, %v1714_v33, 0  ;;  %v1414_v33 = vpop.f32.mrf.mxu0 }
 0x23f   : > { %v1600_v15 = vand.u32 65535, %v1596_v47  ;;  %v1601_v11 = vshrl.u32 %v1596_v47, 16  ;;  %v1718_v3 = vand.u32 31, %v1716_v32  ;;  %v4124_v25 = vshrl.u32 %v1716_v32, 5 }
 0x240   : > { %v1625_v18 = vmul.u32 %v1623_v19, %v1598_v26  ;;  %v1626_v50 = vmul.u32 %v1622_v39, %v1599_v31  ;;  %v1624_v1 = vmul.u32 %v1622_v39, %v1598_v26  ;;  %v1627_v24 = vmul.u32 %v1623_v19, %v1599_v31 }
 0x241   : > { %v1603_v29 = vmul.u32 %v1601_v11, %v1598_v26  ;;  %v1604_v58 = vmul.u32 %v1600_v15, %v1599_v31  ;;  %v1602_v14 = vmul.u32 %v1600_v15, %v1598_v26  ;;  %v1605_v17 = vmul.u32 %v1601_v11, %v1599_v31 }
 0x242   : > { %v1628_v30 = vshll.u32 %v1625_v18, 16  ;;  %v1629_v27 = vshrl.u32 %v1625_v18, 16  ;;  %v1630_v40 = vshll.u32 %v1626_v50, 16  ;;  %v1631_v34 = vshrl.u32 %v1626_v50, 16 }
 0x243   : > { %v1606_v56 = vshll.u32 %v1603_v29, 16  ;;  %v1607_v63 = vshrl.u32 %v1603_v29, 16  ;;  %v1608_v9 = vshll.u32 %v1604_v58, 16  ;;  %v1609_v53 = vshrl.u32 %v1604_v58, 16 }
 0x244   : > { %vm1632_vm2 = vc.u32 %v1624_v1, %v1628_v30  ;;  %v1634_v60 = vadd.s32 %v1628_v30, %v1624_v1  ;;  %v4121_v23 = vsub.s32 32, %v1718_v3  ;;  %v1721_v2 = vshll.u32 %v3380_v36, %v1718_v3 }
 0x245   : > { %vm1610_vm1 = vc.u32 %v1602_v14, %v1606_v56  ;;  %v1612_v57 = vadd.s32 %v1606_v56, %v1602_v14  ;;  %v1633_v4 = vsel %vm1632_vm2, 1, %v3379_v6  ;;  %v1724_v59 = vshll.u32 %v3381_v38, %v1718_v3 }
 0x246   : > { %v1611_v13 = vsel %vm1610_vm1, 1, %v3379_v6  ;;  %v1635_v31 = vadd.s32 %v1633_v4, %v1627_v24  ;;  %vm1636_vm4 = vc.u32 %v1634_v60, %v1630_v40  ;;  %v4127_v8 = vadd.s32 %v1634_v60, %v1630_v40 }
 0x247   : > { %v1613_v41 = vadd.s32 %v1611_v13, %v1605_v17  ;;  %vm1614_vm3 = vc.u32 %v1612_v57, %v1608_v9  ;;  %v1637_v21 = vsel %vm1636_vm4, 1, %v3379_v6  ;;  %v1722_v49 = vshrl.u32 %v3381_v38, %v4121_v23  ;;  %v1505_v13 = vpop.f32.mrf.mxu2 }
 0x248   : > { %v1615_v26 = vsel %vm1614_vm3, 1, %v3379_v6  ;;  %v1639_v7 = vadd.s32 %v1637_v21, %v1635_v31  ;;  %v1725_v10 = vshrl.u32 %v3382_v42, %v4121_v23  ;;  %v1727_v12 = vshll.u32 %v3382_v42, %v1718_v3  ;;  %v1542_v21 = vpop.f32.mrf.mxu3 }
 0x249   : > { %v1617_v28 = vadd.s32 %v1615_v26, %v1613_v41  ;;  %v1728_v20 = vshrl.u32 %v3383_v45, %v4121_v23  ;;  %v1730_v54 = vshll.u32 %v3383_v45, %v1718_v3  ;;  %v4139_v47 = vor.u32 %v1722_v49, %v1721_v2 }
 0x24a   : > { %v1640_v46 = vadd.s32 %v1639_v7, %v1629_v27  ;;  %v4141_v15 = vor.u32 %v1725_v10, %v1724_v59  ;;  %v1731_v11 = vshrl.u32 %v3384_v48, %v4121_v23  ;;  %v1733_v29 = vshll.u32 %v3384_v48, %v1718_v3 }
 0x24b   : > { %v1618_v37 = vadd.s32 %v1617_v28, %v1607_v63  ;;  %v4147_v19 = vor.u32 %v1728_v20, %v1727_v12  ;;  %v1734_v58 = vshrl.u32 %v3385_v51, %v4121_v23  ;;  %v1415_v32 = vadd.f32 %v1414_v33, %v1371_v16 }
 0x24c   : > { %v1641_v14 = vadd.s32 %v1640_v46, %v1631_v34  ;;  %v1732_v17 = vor.u32 %v1731_v11, %v1730_v54  ;;  %vm1736_vm6 = vcmp.lt.s32.totalorder %v4124_v25, 1  ;;  %v4155_v50 = vshll.u32 %v1712_v35, 8 }
 0x24d   : > { %v4145_v39 = vadd.s32 %v1618_v37, %v1609_v53  ;;  %v1735_v18 = vor.u32 %v1734_v58, %v1733_v29  ;;  %v1642_v56 = vmul.u32 %v4094_v55, %v4117_v61  ;;  %vm1739_vm7 = vcmp.lt.s32.totalorder %v4124_v25, 4  ;;  %v1458_v61 = vpop.f32.mrf.mxu1 }
 0x24e   : > { %v1645_v63 = vadd.s32 1, %v1641_v14  ;;  %v1744_v16 = vsel %vm1736_vm6, %v4139_v47, %v4141_v15  ;;  %vm1738_vm8 = vcmp.lt.s32.totalorder %v4124_v25, 3  ;;  %v1745_v1 = vsel %vm1739_vm7, %v1732_v17, 920167782 }
 0x24f   : > { %vm1644_vm5 = vc.u32 %v4145_v39, %v4127_v8  ;;  %v1748_v35 = vsel %vm1736_vm6, %v4141_v15, %v4147_v19  ;;  %v1749_v55 = vsel %vm1739_vm7, %v1735_v18, 1326507024  ;;  %vm1737_vm9 = vcmp.lt.s32.totalorder %v4124_v25, 2 }
 0x250   : > { %v1646_v24 = vsel %vm1644_vm5, %v1645_v63, %v1641_v14  ;;  %v1746_v9 = vsel %vm1738_vm8, %v4147_v19, %v1745_v1  ;;  %v1750_v53 = vsel %vm1738_vm8, %v1732_v17, %v1749_v55  ;;  %v1753_v57 = vand.u32 65535, %v4155_v50 }
 0x251   : > { %v1747_v30 = vsel %vm1737_vm9, %v1744_v16, %v1746_v9  ;;  %v1751_v27 = vsel %vm1737_vm9, %v1748_v35, %v1750_v53  ;;  %v1754_v40 = vshrl.u32 %v4155_v50, 16  ;;  %v1647_v3 = vadd.s32 %v1646_v24, %v1642_v56 }
 0x252   : > { %v1755_v34 = vand.u32 65535, %v1751_v27  ;;  %v1756_v60 = vshrl.u32 %v1751_v27, 16  ;;  %v1778_v41 = vshrl.u32 %v1747_v30, 16  ;;  %v1459_v4 = vadd.f32 %v1458_v61, %v1415_v32 }
 0x253   : > { %v1777_v26 = vand.u32 65535, %v1747_v30  ;;  %v1648_v49 = vadd.s32 536870912, %v1647_v3  ;;  %v1322_v29 = vadd.f32 %v4078_v62, %v4084_v5  ;;  %v1741_v5 = vsel %vm1739_vm7, %v4147_v19, 2102212464 }
 0x254   : > { %v1758_v31 = vmul.u32 %v1756_v60, %v1753_v57  ;;  %v1759_v28 = vmul.u32 %v1755_v34, %v1754_v40  ;;  %v1506_v2 = vadd.f32 %v1505_v13, %v1459_v4  ;;  %v1780_v7 = vmul.u32 %v1778_v41, %v1753_v57 }
 0x255   : > { %v1757_v59 = vmul.u32 %v1755_v34, %v1753_v57  ;;  %v1760_v33 = vmul.u32 %v1756_v60, %v1754_v40  ;;  %v1781_v37 = vmul.u32 %v1777_v26, %v1754_v40  ;;  %v1779_v11 = vmul.u32 %v1777_v26, %v1753_v57  ;;  %v1419_v34 = vpop.f32.mrf.mxu0 }
 0x256   : > { %v1761_v10 = vshll.u32 %v1758_v31, 16  ;;  %v1783_v12 = vshll.u32 %v1780_v7, 16  ;;  %v4185_v20 = vadd.f32 %v1542_v21, %v1506_v2  ;;  %v1763_v54 = vshll.u32 %v1759_v28, 16 }
 0x257   : > { %v4190_v32 = vshrl.u32 %v1648_v49, 30  ;;  %v1762_v17 = vshrl.u32 %v1758_v31, 16  ;;  %v1782_v56 = vmul.u32 %v1778_v41, %v1754_v40  ;;  %v1785_v63 = vshll.u32 %v1781_v37, 16 }
 0x258   : > { %vm1765_vm11 = vc.u32 %v1757_v59, %v1761_v10  ;;  %v1767_v46 = vadd.s32 %v1761_v10, %v1757_v59  ;;  %vm1787_vm13 = vc.u32 %v1779_v11, %v1783_v12  ;;  %v1789_v35 = vadd.s32 %v1783_v12, %v1779_v11 }
 0x259   : > { %v1766_v58 = vsel %vm1765_vm11, 1, %v3379_v6  ;;  %v1788_v1 = vsel %vm1787_vm13, 1, %v3379_v6  ;;  %v1862_v55 = vand.u32 2139095040, %v4185_v20  ;;  %v1650_v62 = vshll.u32 %v4190_v32, 30 }
 0x25a   : > { %v1768_v14 = vadd.s32 %v1766_v58, %v1760_v33  ;;  %vm1769_vm12 = vc.u32 %v1767_v46, %v1763_v54  ;;  %v1790_v61 = vadd.s32 %v1788_v1, %v1782_v56  ;;  %vm1791_vm14 = vc.u32 %v1789_v35, %v1785_v63  ;;  %v1509_v33 = vpop.f32.mrf.mxu2 }
 0x25b   : > { %v1770_v18 = vsel %vm1769_vm12, 1, %v3379_v6  ;;  %v1720_v9 = vshrl.u32 %v3380_v36, %v4121_v23  ;;  %v1764_v53 = vshrl.u32 %v1759_v28, 16  ;;  %v1792_v30 = vsel %vm1791_vm14, 1, %v3379_v6 }
 0x25c   : > { %v1772_v16 = vadd.s32 %v1770_v18, %v1768_v14  ;;  %v1863_v27 = vshrl.u32 %v1862_v55, 23  ;;  %v1375_v57 = vadd.f32 %v4082_v44, %v1322_v29  ;;  %v1784_v40 = vshrl.u32 %v1780_v7, 16 }
 0x25d   : > { %v1794_v13 = vadd.s32 %v1792_v30, %v1790_v61  ;;  %v1740_v60 = vsel %vm1736_vm6, %v1720_v9, %v4139_v47  ;;  %v1742_v19 = vsel %vm1738_vm8, %v4141_v15, %v1741_v5  ;;  %v4211_v4 = vsub.s32 %v1647_v3, %v1650_v62  ;;  %v1464_v47 = vpop.f32.mrf.mxu1  ;;  %v1546_v5 = vpop.f32.mrf.mxu3 }
 0x25e   : > { %v1773_v24 = vadd.s32 %v1772_v16, %v1762_v17  ;;  %v3244_v23 = vadd.s32 4294967169, %v1863_v27  ;;  %v1786_v26 = vshrl.u32 %v1781_v37, 16  ;;  %v4213_v28 = vadd.s32 %v1789_v35, %v1785_v63 }
 0x25f   : > { %v1795_v31 = vadd.s32 %v1794_v13, %v1784_v40  ;;  %v1420_v21 = vadd.f32 %v1419_v34, %v1375_v57  ;;  %v1743_v2 = vsel %vm1737_vm9, %v1740_v60, %v1742_v19  ;;  %v1653_v15 = vsub.s32 0, %v4211_v4 }
 0x260   : > { %v4209_v41 = vadd.s32 %v1773_v24, %v1764_v53  ;;  %v1869_v44 = vadd.s32 1, %v3244_v23  ;;  %v1859_v3 = vand.u32 2147483647, %v4185_v20  ;;  %vm1652_vm1 = vcmp.lt.s32.totalorder %v4211_v4, 0 }
 0x261   : > { %v1796_v7 = vadd.s32 %v1795_v31, %v1786_v26  ;;  %v1797_v10 = vmul.u32 %v4155_v50, %v1743_v2  ;;  %v1465_v25 = vadd.f32 %v1464_v47, %v1420_v21  ;;  %v1654_v11 = vsel %vm1652_vm1, %v1653_v15, %v4211_v4 }
 0x262   : > { %vm1799_vm15 = vc.u32 %v4209_v41, %v4213_v28  ;;  %vm1870_vm0 = vcmp.gt.s32.totalorder %v1869_v44, 0  ;;  %v1866_v58 = vand.u32 8388607, %v1859_v3  ;;  %v1655_v35 = vclz %v1654_v11 }
 0x263   : > { %v1800_v49 = vadd.s32 1, %v1796_v7  ;;  %v1871_v59 = vsel %vm1870_vm0, %v1869_v44, 0  ;;  %v1510_v29 = vadd.f32 %v1509_v33, %v1465_v25 }
 0x264   : > { %v1873_v37 = vand.u32 31, %v1871_v59  ;;  %v4241_v61 = vshrl.u32 %v1871_v59, 5  ;;  %v1867_v57 = vor.u32 8388608, %v1866_v58  ;;  %v3239_v23 = vadd.s32 4294967294, %v1655_v35 }
 0x265   : > { %v1801_v12 = vsel %vm1799_vm15, %v1800_v49, %v1796_v7  ;;  %v4250_v34 = vadd.f32 %v1546_v5, %v1510_v29 }
 0x266   : > { %v1802_v54 = vadd.s32 %v1801_v12, %v1797_v10  ;;  %v4223_v46 = vsub.s32 32, %v1873_v37  ;;  %v1876_v17 = vshll.u32 %v3380_v36, %v1873_v37  ;;  %v1879_v56 = vshll.u32 %v3381_v38, %v1873_v37 }
 0x267   : > { %v1885_v16 = vshll.u32 %v3383_v45, %v1873_v37  ;;  %v1882_v53 = vshll.u32 %v3382_v42, %v1873_v37  ;;  %v1888_v40 = vshll.u32 %v3384_v48, %v1873_v37  ;;  %vm1891_vm2 = vcmp.lt.s32.totalorder %v4241_v61, 1 }
 0x268   : > { %v1803_v14 = vadd.s32 536870912, %v1802_v54  ;;  %v1877_v18 = vshrl.u32 %v3381_v38, %v4223_v46  ;;  %v1880_v50 = vshrl.u32 %v3382_v42, %v4223_v46  ;;  %v1883_v63 = vshrl.u32 %v3383_v45, %v4223_v46 }
 0x269   : > { %v1886_v1 = vshrl.u32 %v3384_v48, %v4223_v46  ;;  %v1889_v62 = vshrl.u32 %v3385_v51, %v4223_v46  ;;  %vm1894_vm3 = vcmp.lt.s32.totalorder %v4241_v61, 4  ;;  %vm1893_vm5 = vcmp.lt.s32.totalorder %v4241_v61, 3 }
 0x26a   : > { %v4239_v55 = vshrl.u32 %v1803_v14, 30  ;;  %v1878_v24 = vor.u32 %v1877_v18, %v1876_v17  ;;  %v4245_v9 = vor.u32 %v1880_v50, %v1879_v56  ;;  %v1884_v13 = vor.u32 %v1883_v63, %v1882_v53 }
 0x26b   : > { %v1887_v30 = vor.u32 %v1886_v1, %v1885_v16  ;;  %v1890_v19 = vor.u32 %v1889_v62, %v1888_v40  ;;  %v4264_v21 = vshll.u32 %v1867_v57, 8  ;;  %vm1892_vm6 = vcmp.lt.s32.totalorder %v4241_v61, 2 }
 0x26c   : > { %v1805_v27 = vshll.u32 %v4239_v55, 30  ;;  %v1899_v26 = vsel %vm1891_vm2, %v1878_v24, %v4245_v9  ;;  %v1903_v7 = vsel %vm1891_vm2, %v4245_v9, %v1884_v13  ;;  %v2017_v47 = vand.u32 2139095040, %v4250_v34 }
 0x26d   : > { %v1900_v31 = vsel %vm1894_vm3, %v1887_v30, 920167782  ;;  %v1904_v59 = vsel %vm1894_vm3, %v1890_v19, 1326507024  ;;  %vm3240_vm7 = vcmp.lt.s32.totalorder %v3239_v23, 0  ;;  %v1908_v25 = vand.u32 65535, %v4264_v21 }
 0x26e   : > { %v4252_v60 = vsub.s32 %v1802_v54, %v1805_v27  ;;  %v1901_v2 = vsel %vm1893_vm5, %v1884_v13, %v1900_v31  ;;  %v1905_v33 = vsel %vm1893_vm5, %v1887_v30, %v1904_v59  ;;  %v2018_v58 = vshrl.u32 %v2017_v47, 23 }
 0x26f   : > { %v1902_v49 = vsel %vm1892_vm6, %v1899_v26, %v1901_v2  ;;  %v1906_v37 = vsel %vm1892_vm6, %v1903_v7, %v1905_v33  ;;  %v1909_v14 = vshrl.u32 %v4264_v21, 16  ;;  %v4284_v18 = vsel %vm3240_vm7, 0, %v3239_v23 }
 0x270   : > { %vm1807_vm4 = vcmp.lt.s32.totalorder %v4252_v60, 0  ;;  %v1808_v44 = vsub.s32 0, %v4252_v60  ;;  %v1933_v12 = vshrl.u32 %v1902_v49, 16  ;;  %v1910_v54 = vand.u32 65535, %v1906_v37 }
 0x271   : > { %v1911_v11 = vshrl.u32 %v1906_v37, 16  ;;  %v1932_v29 = vand.u32 65535, %v1902_v49  ;;  %v2014_v1 = vand.u32 2147483647, %v4250_v34  ;;  %v3247_v35 = vadd.s32 4294967169, %v2018_v58 }
 0x272   : > { %v1809_v15 = vsel %vm1807_vm4, %v1808_v44, %v4252_v60  ;;  %v1935_v17 = vmul.u32 %v1933_v12, %v1908_v25  ;;  %v1914_v63 = vmul.u32 %v1910_v54, %v1909_v14  ;;  %v1663_v62 = vsub.s32 4294967266, %v4284_v18 }
 0x273   : > { %v1810_v10 = vclz %v1809_v15  ;;  %v1913_v56 = vmul.u32 %v1911_v11, %v1908_v25  ;;  %v1936_v16 = vmul.u32 %v1932_v29, %v1909_v14  ;;  %v1912_v5 = vmul.u32 %v1910_v54, %v1908_v25 }
 0x274   : > { %v1938_v30 = vshll.u32 %v1935_v17, 16  ;;  %v1875_v27 = vshrl.u32 %v3380_v36, %v4223_v46  ;;  %v1896_v57 = vsel %vm1894_vm3, %v1884_v13, 2102212464  ;;  %v1934_v40 = vmul.u32 %v1932_v29, %v1908_v25 }
 0x275   : > { %v3242_v50 = vadd.s32 4294967294, %v1810_v10  ;;  %v1916_v53 = vshll.u32 %v1913_v56, 16  ;;  %v1915_v19 = vmul.u32 %v1911_v11, %v1909_v14  ;;  %v1918_v23 = vshll.u32 %v1914_v63, 16 }
 0x276   : > { %v1895_v31 = vsel %vm1891_vm2, %v1875_v27, %v1878_v24  ;;  %v1940_v2 = vshll.u32 %v1936_v16, 16  ;;  %v2024_v7 = vadd.s32 1, %v3247_v35  ;;  %vm1942_vm12 = vc.u32 %v1934_v40, %v1938_v30 }
 0x277   : > { %vm3243_vm8 = vcmp.lt.s32.totalorder %v3242_v50, 0  ;;  %vm1920_vm9 = vc.u32 %v1912_v5, %v1916_v53  ;;  %v1922_v26 = vadd.s32 %v1916_v53, %v1912_v5  ;;  %v1944_v15 = vadd.s32 %v1938_v30, %v1934_v40 }
 0x278   : > { %v1921_v44 = vsel %vm1920_vm9, 1, %v3379_v6  ;;  %v4296_v46 = vsel %vm3243_vm8, 0, %v3242_v50  ;;  %v1897_v13 = vsel %vm1893_vm5, %v4245_v9, %v1896_v57  ;;  %v1937_v59 = vmul.u32 %v1933_v12, %v1909_v14 }
 0x279   : > { %v1923_v47 = vadd.s32 %v1921_v44, %v1915_v19  ;;  %vm1924_vm11 = vc.u32 %v1922_v26, %v1918_v23  ;;  %v1917_v10 = vshrl.u32 %v1913_v56, 16  ;;  %v1943_v33 = vsel %vm1942_vm12, 1, %v3379_v6 }
 0x27a   : > { %v1925_v49 = vsel %vm1924_vm11, 1, %v3379_v6  ;;  %vm1946_vm13 = vc.u32 %v1944_v15, %v1940_v2  ;;  %v1664_v37 = vadd.s32 127, %v1663_v62  ;;  %v1945_v25 = vadd.s32 %v1943_v33, %v1937_v59 }
 0x27b   : > { %v1927_v24 = vadd.s32 %v1925_v49, %v1923_v47  ;;  %v1947_v54 = vsel %vm1946_vm13, 1, %v3379_v6  ;;  %v2021_v11 = vand.u32 8388607, %v2014_v1  ;;  %v1898_v29 = vsel %vm1892_vm6, %v1895_v31, %v1897_v13 }
 0x27c   : > { %v1919_v58 = vshrl.u32 %v1914_v63, 16  ;;  %vm2025_vm14 = vcmp.gt.s32.totalorder %v2024_v7, 0  ;;  %v1818_v12 = vsub.s32 4294967266, %v4296_v46  ;;  %v1939_v14 = vshrl.u32 %v1935_v17, 16 }
 0x27d   : > { %v1928_v9 = vadd.s32 %v1927_v24, %v1917_v10  ;;  %v1949_v50 = vadd.s32 %v1947_v54, %v1945_v25  ;;  %v2026_v56 = vsel %vm2025_vm14, %v2024_v7, 0  ;;  %v1643_v35 = vadd.s32 %v4127_v8, %v4145_v39 }
 0x27e   : > { %v1798_v62 = vadd.s32 %v4213_v28, %v4209_v41  ;;  %v2028_v53 = vand.u32 31, %v2026_v56  ;;  %v1659_v61 = vsub.s32 32, %v4284_v18  ;;  %v1941_v30 = vshrl.u32 %v1936_v16, 16 }
 0x27f   : > { %v4313_v5 = vadd.s32 %v1928_v9, %v1919_v58  ;;  %v4316_v63 = vadd.s32 %v1944_v15, %v1940_v2  ;;  %v1950_v27 = vadd.s32 %v1949_v50, %v1939_v14  ;;  %v1665_v57 = vshll.u32 %v1664_v37, 23 }
 0x280   : > { %v1952_v17 = vmul.u32 %v4264_v21, %v1898_v29  ;;  %v2022_v40 = vor.u32 8388608, %v2021_v11  ;;  %v4319_v19 = vsub.s32 32, %v2028_v53  ;;  %v1814_v8 = vsub.s32 32, %v4296_v46 }
 0x281   : > { %v1819_v39 = vadd.s32 127, %v1818_v12  ;;  %v1951_v23 = vadd.s32 %v1950_v27, %v1941_v30  ;;  %vm1954_vm15 = vc.u32 %v4313_v5, %v4316_v63  ;;  %v2031_v41 = vshll.u32 %v3380_v36, %v2028_v53 }
 0x282   : > { %v2032_v28 = vshrl.u32 %v3381_v38, %v4319_v19  ;;  %v2034_v16 = vshll.u32 %v3381_v38, %v2028_v53  ;;  %v2035_v21 = vshrl.u32 %v3382_v42, %v4319_v19  ;;  %v4330_v31 = vshrl.u32 %v2026_v56, 5 }
 0x283   : > { %v1955_v26 = vadd.s32 1, %v1951_v23  ;;  %v2037_v44 = vshll.u32 %v3382_v42, %v2028_v53  ;;  %v2038_v2 = vshrl.u32 %v3383_v45, %v4319_v19  ;;  %v2040_v15 = vshll.u32 %v3383_v45, %v2028_v53 }
 0x284   : > { %v4335_v7 = vor.u32 %v2032_v28, %v2031_v41  ;;  %v4337_v47 = vor.u32 %v2035_v21, %v2034_v16  ;;  %v2041_v13 = vshrl.u32 %v3384_v48, %v4319_v19  ;;  %v2043_v10 = vshll.u32 %v3384_v48, %v2028_v53 }
 0x285   : > { %v1956_v49 = vsel %vm1954_vm15, %v1955_v26, %v1951_v23  ;;  %v4342_v59 = vor.u32 %v2038_v2, %v2037_v44  ;;  %v2044_v24 = vshrl.u32 %v3385_v51, %v4319_v19  ;;  %v1660_v33 = vshll.u32 %v4211_v4, %v4284_v18 }
 0x286   : > { %v1661_v37 = vshrl.u32 %v1643_v35, %v1659_v61  ;;  %v1957_v25 = vadd.s32 %v1956_v49, %v1952_v17  ;;  %v2042_v54 = vor.u32 %v2041_v13, %v2040_v15  ;;  %v1666_v11 = vor.u32 4788187, %v1665_v57 }
 0x287   : > { %v2045_v29 = vor.u32 %v2044_v24, %v2043_v10  ;;  %vm2046_vm0 = vcmp.lt.s32.totalorder %v4330_v31, 1  ;;  %v4350_v58 = vshll.u32 %v2022_v40, 8  ;;  %v1820_v9 = vshll.u32 %v1819_v39, 23 }
 0x288   : > { %v1958_v12 = vadd.s32 536870912, %v1957_v25  ;;  %vm2049_vm1 = vcmp.lt.s32.totalorder %v4330_v31, 4  ;;  %v2054_v14 = vsel %vm2046_vm0, %v4335_v7, %v4337_v47  ;;  %v1816_v50 = vshrl.u32 %v1798_v62, %v1814_v8 }
 0x289   : > { %vm2048_vm2 = vcmp.lt.s32.totalorder %v4330_v31, 3  ;;  %v2055_v4 = vsel %vm2049_vm1, %v2042_v54, 920167782  ;;  %v2058_v18 = vsel %vm2046_vm0, %v4337_v47, %v4342_v59  ;;  %vm2047_vm3 = vcmp.lt.s32.totalorder %v4330_v31, 2 }
 0x28a   : > { %v4364_v56 = vshrl.u32 %v1958_v12, 30  ;;  %v2056_v35 = vsel %vm2048_vm2, %v4342_v59, %v2055_v4  ;;  %v2059_v62 = vsel %vm2049_vm1, %v2045_v29, 1326507024  ;;  %v1662_v53 = vor.u32 %v1661_v37, %v1660_v33 }
 0x28b   : > { %v1815_v61 = vshll.u32 %v4252_v60, %v4296_v46  ;;  %v2057_v30 = vsel %vm2047_vm3, %v2054_v14, %v2056_v35  ;;  %v2060_v27 = vsel %vm2048_vm2, %v2042_v54, %v2059_v62  ;;  %v1667_v57 = vand.u32 2147483647, %v1666_v11 }
 0x28c   : > { %v1821_v17 = vor.u32 4788187, %v1820_v9  ;;  %v1960_v40 = vshll.u32 %v4364_v56, 30  ;;  %v2061_v8 = vsel %vm2047_vm3, %v2058_v18, %v2060_v27  ;;  %v2063_v23 = vand.u32 65535, %v4350_v58 }
 0x28d   : > { %v1817_v39 = vor.u32 %v1816_v50, %v1815_v61  ;;  %v2065_v41 = vand.u32 65535, %v2061_v8  ;;  %v2066_v28 = vshrl.u32 %v2061_v8, 16  ;;  %v2064_v60 = vshrl.u32 %v4350_v58, 16 }
 0x28e   : > { %v1961_v16 = vsub.s32 %v1957_v25, %v1960_v40  ;;  %v2087_v46 = vand.u32 65535, %v2057_v30  ;;  %v2088_v21 = vshrl.u32 %v2057_v30, 16  ;;  %v1669_v26 = vcvt.s32.f32 %v1662_v53 }
 0x28f   : > { %v2068_v44 = vmul.u32 %v2066_v28, %v2063_v23  ;;  %v1822_v2 = vand.u32 2147483647, %v1821_v17  ;;  %v2069_v13 = vmul.u32 %v2065_v41, %v2064_v60  ;;  %v1824_v10 = vcvt.s32.f32 %v1817_v39 }
 0x290   : > { %vm1962_vm4 = vcmp.lt.s32.totalorder %v1961_v16, 0  ;;  %v1963_v15 = vsub.s32 0, %v1961_v16  ;;  %v1670_v49 = vmul.f32 %v1669_v26, %v1667_v57  ;;  %v2067_v24 = vmul.u32 %v2065_v41, %v2063_v23 }
 0x291   : > { %v2071_v33 = vshll.u32 %v2068_v44, 16  ;;  %v2070_v54 = vmul.u32 %v2066_v28, %v2064_v60  ;;  %v2090_v11 = vmul.u32 %v2088_v21, %v2063_v23  ;;  %v2091_v29 = vmul.u32 %v2087_v46, %v2064_v60 }
 0x292   : > { %v1964_v37 = vsel %vm1962_vm4, %v1963_v15, %v1961_v16  ;;  %v2073_v25 = vshll.u32 %v2069_v13, 16  ;;  %v1825_v14 = vmul.f32 %v1824_v10, %v1822_v2  ;;  %v2089_v4 = vmul.u32 %v2087_v46, %v2063_v23 }
 0x293   : > { %v1965_v9 = vclz %v1964_v37  ;;  %vm2075_vm5 = vc.u32 %v2067_v24, %v2071_v33  ;;  %v2077_v12 = vadd.s32 %v2071_v33, %v2067_v24  ;;  %v2093_v18 = vshll.u32 %v2090_v11, 16 }
 0x294   : > { %v2076_v50 = vsel %vm2075_vm5, 1, %v3379_v6  ;;  %v2092_v53 = vmul.u32 %v2088_v21, %v2064_v60  ;;  %v2095_v30 = vshll.u32 %v2091_v29, 16  ;;  %v2072_v57 = vshrl.u32 %v2068_v44, 16 }
 0x295   : > { %v3245_v35 = vadd.s32 4294967294, %v1965_v9  ;;  %v2078_v62 = vadd.s32 %v2076_v50, %v2070_v54  ;;  %vm2079_vm6 = vc.u32 %v2077_v12, %v2073_v25  ;;  %vm2097_vm7 = vc.u32 %v2089_v4, %v2093_v18 }
 0x296   : > { %v2080_v61 = vsel %vm2079_vm6, 1, %v3379_v6  ;;  %v2099_v27 = vadd.s32 %v2093_v18, %v2089_v4  ;;  %v2098_v40 = vsel %vm2097_vm7, 1, %v3379_v6  ;;  %v1953_v8 = vadd.s32 %v4316_v63, %v4313_v5 }
 0x297   : > { %vm3246_vm8 = vcmp.lt.s32.totalorder %v3245_v35, 0  ;;  %v2082_v17 = vadd.s32 %v2080_v61, %v2078_v62  ;;  %v2100_v23 = vadd.s32 %v2098_v40, %v2092_v53  ;;  %v2051_v60 = vsel %vm2049_vm1, %v4342_v59, 2102212464 }
 0x298   : > { %v1968_v39 = vsel %vm3246_vm8, 0, %v3245_v35  ;;  %vm2101_vm9 = vc.u32 %v2099_v27, %v2095_v30  ;;  %v2030_v21 = vshrl.u32 %v3380_v36, %v4319_v19  ;;  %v2074_v26 = vshrl.u32 %v2069_v13, 16 }
 0x299   : > { %v1969_v41 = vsub.s32 32, %v1968_v39  ;;  %v1973_v28 = vsub.s32 4294967266, %v1968_v39  ;;  %v2083_v46 = vadd.s32 %v2082_v17, %v2072_v57  ;;  %v2094_v44 = vshrl.u32 %v2090_v11, 16 }
 0x29a   : > { %v2102_v2 = vsel %vm2101_vm9, 1, %v3379_v6  ;;  %v1970_v15 = vshll.u32 %v1961_v16, %v1968_v39  ;;  %v1671_v24 = vxor.u32 2147483648, %v1670_v49  ;;  %v2050_v33 = vsel %vm2046_vm0, %v2030_v21, %v4335_v7 }
 0x29b   : > { %v1971_v10 = vshrl.u32 %v1953_v8, %v1969_v41  ;;  %v1974_v5 = vadd.s32 127, %v1973_v28  ;;  %v2104_v63 = vadd.s32 %v2102_v2, %v2100_v23  ;;  %v2052_v59 = vsel %vm2048_vm2, %v4337_v47, %v2051_v60 }
 0x29c   : > { %v2084_v37 = vadd.s32 %v2083_v46, %v2074_v26  ;;  %v2096_v13 = vshrl.u32 %v2091_v29, 16  ;;  %v1826_v9 = vxor.u32 2147483648, %v1825_v14  ;;  %v2103_v25 = vadd.s32 %v2099_v27, %v2095_v30 }
 0x29d   : > { %v1972_v54 = vor.u32 %v1971_v10, %v1970_v15  ;;  %v1975_v19 = vshll.u32 %v1974_v5, 23  ;;  %v2105_v11 = vadd.s32 %v2104_v63, %v2094_v44  ;;  %vm1551_vm11 = vcmp.lt.s32.totalorder %v4086_v43, 0 }
 0x29e   : > { %v2053_v12 = vsel %vm2047_vm3, %v2050_v33, %v2052_v59  ;;  %v1672_v7 = vsel %vm1551_vm11, %v1671_v24, %v1670_v49  ;;  %vm2109_vm12 = vc.u32 %v2084_v37, %v2103_v25  ;;  %vm1706_vm13 = vcmp.lt.s32.totalorder %v4092_v52, 0 }
 0x29f   : > { %v1976_v16 = vor.u32 4788187, %v1975_v19  ;;  %v2106_v50 = vadd.s32 %v2105_v11, %v2096_v13  ;;  %v1979_v4 = vcvt.s32.f32 %v1972_v54  ;;  %vm4408_vm14 = vcmp.le.f32.partialorder %v1549_v0, 0.7853982 }
 0x2a0   : > { %v1827_v31 = vsel %vm1706_vm13, %v1826_v9, %v1825_v14  ;;  %v2107_v35 = vmul.u32 %v4350_v58, %v2053_v12  ;;  %v4418_v49 = vsel %vm4408_vm14, %v4086_v43, %v1672_v7  ;;  %vm4422_vm15 = vcmp.le.f32.partialorder %v1704_v22, 0.7853982 }
 0x2a1   : > { %v1977_v47 = vand.u32 2147483647, %v1976_v16  ;;  %v2110_v18 = vadd.s32 1, %v2106_v50  ;;  %v4429_v14 = vsel %vm4422_vm15, %v4092_v52, %v1827_v31  ;;  %v4433_v30 = vmul.f32 %v4418_v49, %v4418_v49 }
 0x2a2   : > { %vm1861_vm0 = vcmp.lt.s32.totalorder %v4185_v20, 0  ;;  %vm4438_vm1 = vcmp.le.f32.partialorder %v1859_v3, 0.7853982  ;;  %v4446_v17 = vmul.f32 %v4429_v14, %v4429_v14  ;;  %v2108_v11 = vadd.s32 %v2103_v25, %v2084_v37 }
 0x2a3   : > { %v1980_v62 = vmul.f32 %v1979_v4, %v1977_v47  ;;  %v2111_v53 = vsel %vm2109_vm12, %v2110_v18, %v2106_v50  ;;  %v1685_v39 = vmul.f32 -0.00019511016, %v4433_v30  ;;  %v1678_v13 = vmul.f32 -0.001358992, %v4433_v30 }
 0x2a4   : > { %v2112_v0 = vadd.s32 %v2111_v53, %v2107_v35  ;;  %v1840_v41 = vmul.f32 -0.00019511016, %v4446_v17  ;;  %v1833_v33 = vmul.f32 -0.001358992, %v4446_v17  ;;  %v1983_v7 = vsub.s32 4, %v4364_v56 }
 0x2a5   : > { %v1981_v58 = vxor.u32 2147483648, %v1980_v62  ;;  %v1686_v46 = vadd.f32 0.008332121, %v1685_v39  ;;  %v1679_v53 = vadd.f32 0.041655596, %v1678_v13  ;;  %v1673_v37 = vsub.s32 4, %v4190_v32 }
 0x2a6   : > { %v2113_v27 = vadd.s32 536870912, %v2112_v0  ;;  %v1841_v26 = vadd.f32 0.008332121, %v1840_v41  ;;  %v1834_v47 = vadd.f32 0.041655596, %v1833_v33  ;;  %vm2016_vm4 = vcmp.lt.s32.totalorder %v4250_v34, 0 }
 0x2a7   : > { %v1982_v57 = vsel %vm1861_vm0, %v1981_v58, %v1980_v62  ;;  %v1687_v10 = vmul.f32 %v1686_v46, %v4433_v30  ;;  %v1828_v62 = vsub.s32 4, %v4239_v55  ;;  %v1680_v46 = vmul.f32 %v1679_v53, %v4433_v30 }
 0x2a8   : > { %v4451_v40 = vsel %vm4438_vm1, %v4185_v20, %v1982_v57  ;;  %v4453_v8 = vshrl.u32 %v2113_v27, 30  ;;  %v1842_v24 = vmul.f32 %v1841_v26, %v4446_v17  ;;  %v1984_v57 = vsel %vm1861_vm0, %v1983_v7, %v4364_v56 }
 0x2a9   : > { %v4457_v3 = vmul.f32 %v4451_v40, %v4451_v40  ;;  %v1688_v54 = vadd.f32 -0.16666654, %v1687_v10  ;;  %v1835_v39 = vmul.f32 %v1834_v47, %v4446_v17  ;;  %v1674_v56 = vsel %vm1551_vm11, %v1673_v37, %v4190_v32 }
 0x2aa   : > { %v2115_v23 = vshll.u32 %v4453_v8, 30  ;;  %v1843_v50 = vadd.f32 -0.16666654, %v1842_v24  ;;  %v1676_v22 = vsel %vm4408_vm14, 0, %v1674_v56  ;;  %vm4501_vm5 = vcmp.le.f32.partialorder %v2014_v1, 0.7853982 }
 0x2ab   : > { %v1995_v60 = vmul.f32 -0.00019511016, %v4457_v3  ;;  %v1988_v63 = vmul.f32 -0.001358992, %v4457_v3  ;;  %v1689_v25 = vmul.f32 %v1688_v54, %v4433_v30  ;;  %v1836_v10 = vadd.f32 -0.4999988, %v1835_v39 }
 0x2ac   : > { %v2116_v28 = vsub.s32 %v2112_v0, %v2115_v23  ;;  %v1844_v23 = vmul.f32 %v1843_v50, %v4446_v17  ;;  %v1693_v50 = vadd.s32 3, %v1676_v22  ;;  %vm2002_vm14 = vweird.f32 %v4185_v20 }
 0x2ad   : > { %v1996_v2 = vadd.f32 0.008332121, %v1995_v60  ;;  %v1989_v12 = vadd.f32 0.041655596, %v1988_v63  ;;  %v1829_v60 = vsel %vm1706_vm13, %v1828_v62, %v4239_v55  ;;  %v1837_v32 = vmul.f32 %v1836_v10, %v4446_v17 }
 0x2ae   : > { %vm2117_vm2 = vcmp.lt.s32.totalorder %v2116_v28, 0  ;;  %v2118_v21 = vsub.s32 0, %v2116_v28  ;;  %v1845_v63 = vadd.f32 1.0, %v1844_v23 }
 0x2af   : > { %v1997_v59 = vmul.f32 %v1996_v2, %v4457_v3  ;;  %v1990_v27 = vmul.f32 %v1989_v12, %v4457_v3  ;;  %v1838_v1 = vadd.f32 1.0, %v1837_v32 }
 0x2b0   : > { %v2119_v44 = vsel %vm2117_vm2, %v2118_v21, %v2116_v28  ;;  %v1986_v21 = vsel %vm4438_vm1, 0, %v1984_v57  ;;  %v1846_v61 = vmul.f32 %v1845_v63, %v4429_v14  ;;  %vm1847_vm1 = vweird.f32 %v4092_v52 }
 0x2b1   : > { %v2120_v15 = vclz %v2119_v44  ;;  %v1998_v4 = vadd.f32 -0.16666654, %v1997_v59  ;;  %v1991_v2 = vadd.f32 -0.4999988, %v1990_v27  ;;  %v2003_v33 = vadd.s32 3, %v1986_v21  ;;  %v2169_v27 = vld [vmem:[%s5136_s5] sm:$0xff] }
 0x2b2   : > { %v1681_v59 = vadd.f32 -0.4999988, %v1680_v46  ;;  %v1855_v37 = vxor.u32 2147483648, %v1838_v1  ;;  %vm1692_vm2 = vweird.f32 %v4086_v43 }
 0x2b3   : > { %v3248_v5 = vadd.s32 4294967294, %v2120_v15  ;;  %v1999_v41 = vmul.f32 %v1998_v4, %v4457_v3  ;;  %v1690_v15 = vadd.f32 1.0, %v1689_v25  ;;  %v2004_v17 = vand.u32 3, %v2003_v33 }
 0x2b4   : > { %v1682_v14 = vmul.f32 %v1681_v59, %v4433_v30  ;;  %v1852_v4 = vxor.u32 2147483648, %v1846_v61  ;;  %v1694_v25 = vand.u32 3, %v1693_v50 }
 0x2b5   : > { %vm3249_vm3 = vcmp.lt.s32.totalorder %v3248_v5, 0  ;;  %v2000_v24 = vadd.f32 1.0, %v1999_v41  ;;  %v1691_v13 = vmul.f32 %v1690_v15, %v4418_v49  ;;  %v2138_v49 = vsub.s32 4, %v4453_v8 }
 0x2b6   : > { %v2123_v19 = vsel %vm3249_vm3, 0, %v3248_v5  ;;  %v1831_v5 = vsel %vm4422_vm15, 0, %v1829_v60  ;;  %vm2005_vm6 = vcmp.lt.s32.totalorder %v2004_v17, 2  ;;  %vm2006_vm7 = vcmp.eq.s32.totalorder %v2004_v17, 0 }
 0x2b7   : > { %v2124_v9 = vsub.s32 32, %v2123_v19  ;;  %v2128_v16 = vsub.s32 4294967266, %v2123_v19  ;;  %v2125_v18 = vshll.u32 %v2116_v28, %v2123_v19  ;;  %v1992_v19 = vmul.f32 %v1991_v2, %v4457_v3 }
 0x2b8   : > { %v1697_v7 = vxor.u32 2147483648, %v1691_v13  ;;  %v2139_v62 = vsel %vm2016_vm4, %v2138_v49, %v4453_v8  ;;  %v1683_v53 = vadd.f32 1.0, %v1682_v14  ;;  %vm2009_vm8 = vcmp.eq.s32.totalorder %v2004_v17, 2 }
 0x2b9   : > { %v2126_v31 = vshrl.u32 %v2108_v11, %v2124_v9  ;;  %v2129_v35 = vadd.s32 127, %v2128_v16  ;;  %v1848_v11 = vadd.s32 3, %v1831_v5  ;;  %v2001_v9 = vmul.f32 %v2000_v24, %v4451_v40 }
 0x2ba   : > { %v1993_v40 = vadd.f32 1.0, %v1992_v19  ;;  %v2141_v57 = vsel %vm4501_vm5, 0, %v2139_v62  ;;  %v1700_v41 = vxor.u32 2147483648, %v1683_v53  ;;  %vm1696_vm13 = vcmp.eq.s32.totalorder %v1694_v25, 0 }
 0x2bb   : > { %v2127_v0 = vor.u32 %v2126_v31, %v2125_v18  ;;  %v2130_v58 = vshll.u32 %v2129_v35, 23  ;;  %v1849_v47 = vand.u32 3, %v1848_v11  ;;  %v2007_v18 = vxor.u32 2147483648, %v2001_v9 }
 0x2bc   : > { %v2010_v30 = vxor.u32 2147483648, %v1993_v40  ;;  %v1698_v5 = vsel %vm1696_vm13, %v1683_v53, %v1697_v7  ;;  %vm1695_vm15 = vcmp.lt.s32.totalorder %v1694_v25, 2  ;;  %vm1699_vm0 = vcmp.eq.s32.totalorder %v1694_v25, 2 }
 0x2bd   : > { %v2131_v28 = vor.u32 4788187, %v2130_v58  ;;  %v2134_v44 = vcvt.s32.f32 %v2127_v0  ;;  %vm1850_vm9 = vcmp.lt.s32.totalorder %v1849_v47, 2  ;;  %v2008_v8 = vsel %vm2006_vm7, %v1993_v40, %v2007_v18 }
 0x2be   : > { %vm1851_vm11 = vcmp.eq.s32.totalorder %v1849_v47, 0  ;;  %vm1854_vm12 = vcmp.eq.s32.totalorder %v1849_v47, 2  ;;  %v2011_v21 = vsel %vm2009_vm8, %v2010_v30, %v2001_v9  ;;  %v1701_v22 = vsel %vm1699_vm0, %v1700_v41, %v1691_v13 }
 0x2bf   : > { %v2132_v26 = vand.u32 2147483647, %v2131_v28  ;;  %v2198_v28 = vsel %vm1258_vm10, %v2169_v27, 0  ;;  %v2012_v2 = vsel %vm2005_vm6, %v2008_v8, %v2011_v21  ;;  %v1856_v56 = vsel %vm1854_vm12, %v1855_v37, %v1846_v61 }
 0x2c0   : > { %v4522_v63 = vand.u32 4294901760, %v2198_v28  ;;  %v2013_v59 = vsel %vm2002_vm14, nan, %v2012_v2  ;;  %v1702_v11 = vsel %vm1695_vm15, %v1698_v5, %v1701_v22  ;;  %vm2157_vm6 = vweird.f32 %v4250_v34 }
 0x2c1   : > { %v2135_v55 = vmul.f32 %v2134_v44, %v2132_v26  ;;  %v1853_v26 = vsel %vm1851_vm11, %v1838_v1, %v1852_v4  ;;  %v2158_v44 = vadd.s32 3, %v2141_v57  ;;  %v4531_v16 = vand.u32 4294901760, %v2013_v59  ;;  %v2171_v1 = vld [vmem:[%s5136_s5 + $0x10] sm:$0xff] }
 0x2c2   : > { %v1857_v24 = vsel %vm1850_vm9, %v1853_v26, %v1856_v56  ;;  %v2230_v20 = vsub.f32 %v2198_v28, %v4522_v63  ;;  %v1703_v49 = vsel %vm1692_vm2, nan, %v1702_v11  ;;  %v2204_v53 = vsel %vm1258_vm10, %v2171_v1, 0 }
 0x2c3   : > { %v2136_v54 = vxor.u32 2147483648, %v2135_v55  ;;  %v2159_v19 = vand.u32 3, %v2158_v44  ;;  %v1858_v9 = vsel %vm1847_vm1, nan, %v1857_v24  ;;  %v2281_v50 = vsub.f32 %v2013_v59, %v4531_v16 }
 0x2c4   : > { %v4535_v17 = vand.u32 4294901760, %v1858_v9  ;;  %v4541_v43 = vand.u32 4294901760, %v1703_v49  ;;  %v4552_v37 = vand.u32 4294901760, %v2204_v53 }
 0x2c5   : > { %v2137_v29 = vsel %vm2016_vm4, %v2136_v54, %v2135_v55  ;;  %v2170_v54 = vld [vmem:[%s5136_s5 + $0x8] sm:$0xff]  ;;  %vm2160_vm3 = vcmp.lt.s32.totalorder %v2159_v19, 2  ;;  %vm2161_vm4 = vcmp.eq.s32.totalorder %v2159_v19, 0  ;;  %v2282_v62 = vand.u32 4294901760, %v2281_v50 }
 0x2c6   : > { %v2140_v3 = vsel %vm4501_vm5, %v4250_v34, %v2137_v29  ;;  %v2201_v29 = vsel %vm1258_vm10, %v2170_v54, 0  ;;  %vm2164_vm5 = vcmp.eq.s32.totalorder %v2159_v19, 2  ;;  %v2287_v4 = vsub.f32 %v1858_v9, %v4535_v17 }
 0x2c7   : > { %v2142_v12 = vmul.f32 %v2140_v3, %v2140_v3  ;;  %v2293_v34 = vsub.f32 %v1703_v49, %v4541_v43  ;;  %v2283_v57 = vsub.f32 %v2281_v50, %v2282_v62 }
 0x2c9   : > { %v2150_v31 = vmul.f32 -0.00019511016, %v2142_v12  ;;  %v2143_v35 = vmul.f32 -0.001358992, %v2142_v12 }
 0x2cb   : > { %v2151_v0 = vadd.f32 0.008332121, %v2150_v31  ;;  %v2144_v58 = vadd.f32 0.041655596, %v2143_v35 }
 0x2cd   : > { %v2152_v39 = vmul.f32 %v2151_v0, %v2142_v12  ;;  %v2145_v23 = vmul.f32 %v2144_v58, %v2142_v12  ;;  %v2288_v58 = vand.u32 4294901760, %v2287_v4 }
 0x2cf   : > { %v2153_v60 = vadd.f32 -0.16666654, %v2152_v39  ;;  %v2146_v46 = vadd.f32 -0.4999988, %v2145_v23  ;;  %v2294_v39 = vand.u32 4294901760, %v2293_v34  ;;  %v2172_v23 = vld [vmem:[%s5136_s5 + $0x18] sm:$0xff]  ;;  %v2289_v41 = vsub.f32 %v2287_v4, %v2288_v58 }
 0x2d0   : > { %v2207_v26 = vsel %vm1258_vm10, %v2172_v23, 0 }
 0x2d1   : > { %v2154_v15 = vmul.f32 %v2153_v60, %v2142_v12  ;;  %v2147_v10 = vmul.f32 %v2146_v46, %v2142_v12  ;;  %v4537_v12 = vand.u32 4294901760, %v2201_v29  ;;  %v2246_v60 = vsub.f32 %v2204_v53, %v4552_v37 }
 0x2d2   : > { %v2284_v46 = vand.u32 4294901760, %v2283_v57  ;;  %v2295_v21 = vsub.f32 %v2293_v34, %v2294_v39  ;;  %v2290_v44 = vand.u32 4294901760, %v2289_v41 }
 0x2d3   : > { %v2155_v55 = vadd.f32 1.0, %v2154_v15  ;;  %v2148_v33 = vadd.f32 1.0, %v2147_v10  ;;  %v2238_v31 = vsub.f32 %v2201_v29, %v4537_v12  ;;  %v2247_v56 = vand.u32 4294901760, %v2246_v60 }
 0x2d4   : > { %v2253_v15 = vand.u32 4294901760, %v2207_v26  ;;  %v2296_v10 = vand.u32 4294901760, %v2295_v21 }
 0x2d5   : > { %v2156_v32 = vmul.f32 %v2155_v55, %v2140_v3  ;;  %v2165_v61 = vxor.u32 2147483648, %v2148_v33  ;;  %v2231_v3 = vand.u32 4294901760, %v2230_v20  ;;  %v2239_v27 = vand.u32 4294901760, %v2238_v31 }
 0x2d6   : > { %v2248_v5 = vsub.f32 %v2246_v60, %v2247_v56  ;;  %v2254_v24 = vsub.f32 %v2207_v26, %v2253_v15 }
 0x2d7   : > { %v2162_v13 = vxor.u32 2147483648, %v2156_v32  ;;  %v2166_v14 = vsel %vm2164_vm5, %v2165_v61, %v2156_v32  ;;  %v2232_v18 = vsub.f32 %v2230_v20, %v2231_v3  ;;  %v2240_v28 = vsub.f32 %v2238_v31, %v2239_v27 }
 0x2d8   : > { %v2249_v55 = vand.u32 4294901760, %v2248_v5 }
 0x2d9   : > { %v2163_v52 = vsel %vm2161_vm4, %v2148_v33, %v2162_v13  ;;  %v2233_v30 = vand.u32 4294901760, %v2232_v18  ;;  %v2241_v2 = vand.u32 4294901760, %v2240_v28  ;;  %v2255_v33 = vand.u32 4294901760, %v2254_v24 }
 0x2da   : > { %v2167_v40 = vsel %vm2160_vm3, %v2163_v52, %v2166_v14  ;;  %v2185_v14 = vpop.permute.xlu0 %2184 }
 0x2db   : > { %v2168_v7 = vsel %vm2157_vm6, nan, %v2167_v40  ;;  %v2256_v59 = vsub.f32 %v2254_v24, %v2255_v33 }
 0x2dc   : > { %v2221_v47 = vand.u32 4294901760, %v2168_v7 }
 0x2dd   : > { %v2257_v22 = vand.u32 4294901760, %v2256_v59 }
 0x2de   : > { %2222 = vmatpush.msrb.mxu0 %v2221_v47  ;;  %2373 = vmatpush.msra.mxu3 %v2221_v47  ;;  %v2275_v35 = vsub.f32 %v2168_v7, %v2221_v47 }
 0x2e0   : > { %2224 = vmatpush.msrb.mxu0 %v4531_v16  ;;  %2329 = vmatpush.msra.mxu2 %v2275_v35  ;;  %v2276_v0 = vand.u32 4294901760, %v2275_v35 }
 0x2e1   : > { %2375 = vmatpush.msra.mxu3 %v4531_v16 }
 0x2e2   : > { %2226 = vmatpush.msrb.mxu0 %v4535_v17  ;;  %2332 = vmatpush.msra.mxu2 %v2281_v50  ;;  %v2277_v25 = vsub.f32 %v2275_v35, %v2276_v0 }
 0x2e3   : > { %2377 = vmatpush.msra.mxu3 %v4535_v17 }
 0x2e4   : > { %2228 = vmatpush.msrb.mxu0 %v4541_v43  ;;  %2335 = vmatpush.msra.mxu2 %v2287_v4  ;;  %v2278_v8 = vand.u32 4294901760, %v2277_v25 }
 0x2e5   : > { %2379 = vmatpush.msra.mxu3 %v4541_v43  ;;  %2234 = vmatmul.f32.vlgmr.msrb.gmra.mxu0 %v2233_v30 }
 0x2e6   : > { %2420 = vmatpush.msra.mxu0 %v2276_v0  ;;  %2279 = vmatpush.msrb.mxu1 %v2278_v8 }
 0x2e7   : > { %2338 = vmatpush.msra.mxu2 %v2293_v34  ;;  %2383 = vmatmul.f32.vlgmr.msra.gmra.mxu3 %v2231_v3 }
 0x2e8   : > { %2424 = vmatpush.msra.mxu0 %v2282_v62  ;;  %2285 = vmatpush.msrb.mxu1 %v2284_v46 }
 0x2e9   : > { %2341 = vmatmul.f32.vlgmr.msra.gmra.mxu2 %v2230_v20 }
 0x2ea   : > { %2428 = vmatpush.msra.mxu0 %v2288_v58  ;;  %2291 = vmatpush.msrb.mxu1 %v2290_v44 }
 0x2ec   : > { %2432 = vmatpush.msra.mxu0 %v2294_v39  ;;  %2297 = vmatpush.msrb.mxu1 %v2296_v10 }
 0x2ed   : > { %2242 = vmatmul.f32.gmra.mxu0 %v2241_v2  ;;  %2299 = vmatmul.f32.vlgmr.msrb.gmra.mxu1 %v4522_v63 }
 0x2ee   : > { %2463 = vmatpush.msra.mxu1 %v2221_v47 }
 0x2ef   : > { %2389 = vmatmul.f32.gmra.mxu3 %v2239_v27 }
 0x2f0   : > { %2465 = vmatpush.msra.mxu1 %v4531_v16  ;;  %v2180_v16 = vpop.permute.xlu2 %2179 }
 0x2f1   : > { %2346 = vmatmul.f32.gmra.mxu2 %v2238_v31 }
 0x2f2   : > { %2467 = vmatpush.msra.mxu1 %v4535_v17 }
 0x2f4   : > { %2469 = vmatpush.msra.mxu1 %v4541_v43 }
 0x2f5   : > { %2250 = vmatmul.f32.gmra.mxu0 %v2249_v55  ;;  %2303 = vmatmul.f32.gmra.mxu1 %v4537_v12 }
 0x2f7   : > { %2395 = vmatmul.f32.gmra.mxu3 %v2247_v56 }
 0x2f9   : > { %2351 = vmatmul.f32.gmra.mxu2 %v2246_v60 }
 0x2fd   : > { %2258 = vmatmul.f32.gmra.mxu0 %v2257_v22  ;;  %2307 = vmatmul.f32.gmra.mxu1 %v4552_v37 }
 0x2ff   : > { %2401 = vmatmul.f32.gmra.mxu3 %v2255_v33 }
 0x301   : > { %2356 = vmatmul.f32.gmra.mxu2 %v2254_v24 }
 0x305   : > { %2311 = vmatmul.f32.gmra.mxu1 %v2253_v15  ;;  %2434 = vmatmul.f32.vlgmr.msra.gmra.mxu0 %v4522_v63 }
 0x30d   : > { %2438 = vmatmul.f32.gmra.mxu0 %v4537_v12  ;;  %2471 = vmatmul.f32.vlgmr.msra.gmra.mxu1 %v4522_v63 }
 0x315   : > { %2442 = vmatmul.f32.gmra.mxu0 %v4552_v37  ;;  %2475 = vmatmul.f32.gmra.mxu1 %v4537_v12 }
 0x31d   : > { %2446 = vmatmul.f32.gmra.mxu0 %v2253_v15  ;;  %2479 = vmatmul.f32.gmra.mxu1 %v4552_v37 }
 0x325   : > { %2483 = vmatmul.f32.gmra.mxu1 %v2253_v15 }
 0x362   : > { %v2235_v54 = vpop.f32.mrf.mxu0 }
 0x363   : > { %v2236_v63 = vadd.f32 %v2235_v54, %v2180_v16 }
 0x36a   : > { %v2243_v19 = vpop.f32.mrf.mxu0  ;;  %v2300_v11 = vpop.f32.mrf.mxu1 }
 0x36b   : > { %v2301_v13 = vadd.f32 %v2300_v11, %v2236_v63  ;;  %v2384_v49 = vpop.f32.mrf.mxu3  ;;  %v2244_v12 = vadd.f32 %v2243_v19, %v2185_v14 }
 0x36c   : > { %v2342_v29 = vpop.f32.mrf.mxu2 }
 0x36d   : > { %v2343_v52 = vadd.f32 %v2342_v29, %v2301_v13 }
 0x36f   : > { %v2385_v40 = vadd.f32 %v2384_v49, %v2343_v52 }
 0x372   : > { %v4575_v32 = vpop.f32.mrf.mxu0  ;;  %v2304_v61 = vpop.f32.mrf.mxu1 }
 0x373   : > { %v2305_v50 = vadd.f32 %v2304_v61, %v2244_v12  ;;  %v2390_v18 = vpop.f32.mrf.mxu3 }
 0x374   : > { %v2347_v43 = vpop.f32.mrf.mxu2 }
 0x375   : > { %v2348_v47 = vadd.f32 %v2347_v43, %v2305_v50 }
 0x377   : > { %v2391_v34 = vadd.f32 %v2390_v18, %v2348_v47 }
 0x37a   : > { %v4577_v9 = vpop.f32.mrf.mxu0  ;;  %v4579_v20 = vpop.f32.mrf.mxu1 }
 0x382   : > { %v4581_v17 = vpop.f32.mrf.mxu1  ;;  %v2435_v3 = vpop.f32.mrf.mxu0 }
 0x383   : > { %v2436_v7 = vadd.f32 %v2435_v3, %v2385_v40 }
 0x38a   : > { %v2472_v1 = vpop.f32.mrf.mxu1  ;;  %v2439_v35 = vpop.f32.mrf.mxu0 }
 0x38b   : > { %v4583_v4 = vadd.f32 %v2472_v1, %v2436_v7  ;;  %v2440_v53 = vadd.f32 %v2439_v35, %v2391_v34 }
 0x38d   : > { %v2490_v31 = vand.u32 2139095040, %v4583_v4  ;;  %v2487_v58 = vand.u32 2147483647, %v4583_v4 }
 0x38f   : > { %v2491_v62 = vshrl.u32 %v2490_v31, 23  ;;  %v2494_v25 = vand.u32 8388607, %v2487_v58  ;;  %v2190_v31 = vpop.permute.xlu1 %2189 }
 0x390   : > { %v2252_v34 = vadd.f32 %v4575_v32, %v2190_v31 }
 0x391   : > { %v3250_v0 = vadd.s32 4294967169, %v2491_v62  ;;  %v2495_v28 = vor.u32 8388608, %v2494_v25 }
 0x392   : > { %v2476_v30 = vpop.f32.mrf.mxu1 }
 0x393   : > { %v2497_v27 = vadd.s32 1, %v3250_v0  ;;  %v4587_v37 = vadd.f32 %v2476_v30, %v2440_v53  ;;  %v4618_v11 = vshll.u32 %v2495_v28, 8  ;;  %v2352_v28 = vpop.f32.mrf.mxu2 }
 0x395   : > { %vm2498_vm10 = vcmp.gt.s32.totalorder %v2497_v27, 0  ;;  %v2645_v39 = vand.u32 2139095040, %v4587_v37  ;;  %v2642_v63 = vand.u32 2147483647, %v4587_v37  ;;  %v2536_v40 = vand.u32 65535, %v4618_v11 }
 0x396   : > { %v2499_v57 = vsel %vm2498_vm10, %v2497_v27, 0  ;;  %v2537_v47 = vshrl.u32 %v4618_v11, 16 }
 0x397   : > { %v2501_v23 = vand.u32 31, %v2499_v57  ;;  %v2646_v41 = vshrl.u32 %v2645_v39, 23  ;;  %v4594_v60 = vshrl.u32 %v2499_v57, 5  ;;  %v2649_v18 = vand.u32 8388607, %v2642_v63 }
 0x398   : > { %v2309_v57 = vadd.f32 %v4579_v20, %v2252_v34 }
 0x399   : > { %v4592_v8 = vsub.s32 32, %v2501_v23  ;;  %v2504_v46 = vshll.u32 %v3380_v36, %v2501_v23  ;;  %v2507_v21 = vshll.u32 %v3381_v38, %v2501_v23  ;;  %v2510_v2 = vshll.u32 %v3382_v42, %v2501_v23 }
 0x39a   : > { %v2513_v15 = vshll.u32 %v3383_v45, %v2501_v23  ;;  %v2516_v5 = vshll.u32 %v3384_v48, %v2501_v23  ;;  %v3253_v22 = vadd.s32 4294967169, %v2646_v41  ;;  %vm2519_vm7 = vcmp.lt.s32.totalorder %v4594_v60, 1 }
 0x39b   : > { %v2505_v26 = vshrl.u32 %v3381_v38, %v4592_v8  ;;  %v2508_v44 = vshrl.u32 %v3382_v42, %v4592_v8  ;;  %v2511_v56 = vshrl.u32 %v3383_v45, %v4592_v8  ;;  %v2514_v10 = vshrl.u32 %v3384_v48, %v4592_v8 }
 0x39c   : > { %v2517_v24 = vshrl.u32 %v3385_v51, %v4592_v8  ;;  %vm2522_vm8 = vcmp.lt.s32.totalorder %v4594_v60, 4  ;;  %vm2521_vm9 = vcmp.lt.s32.totalorder %v4594_v60, 3  ;;  %v2652_v49 = vadd.s32 1, %v3253_v22 }
 0x39d   : > { %v4611_v55 = vor.u32 %v2505_v26, %v2504_v46  ;;  %v4613_v33 = vor.u32 %v2508_v44, %v2507_v21  ;;  %v4615_v59 = vor.u32 %v2511_v56, %v2510_v2  ;;  %v2515_v54 = vor.u32 %v2514_v10, %v2513_v15 }
 0x39e   : > { %v2518_v19 = vor.u32 %v2517_v24, %v2516_v5  ;;  %vm2520_vm11 = vcmp.lt.s32.totalorder %v4594_v60, 2  ;;  %vm2653_vm12 = vcmp.gt.s32.totalorder %v2652_v49, 0  ;;  %v2650_v41 = vor.u32 8388608, %v2649_v18 }
 0x39f   : > { %v2527_v61 = vsel %vm2519_vm7, %v4611_v55, %v4613_v33  ;;  %v2531_v16 = vsel %vm2519_vm7, %v4613_v33, %v4615_v59  ;;  %v2528_v29 = vsel %vm2522_vm8, %v2515_v54, 920167782  ;;  %v2654_v0 = vsel %vm2653_vm12, %v2652_v49, 0 }
 0x3a0   : > { %v2532_v13 = vsel %vm2522_vm8, %v2518_v19, 1326507024  ;;  %v2529_v52 = vsel %vm2521_vm9, %v4615_v59, %v2528_v29  ;;  %v2656_v32 = vand.u32 31, %v2654_v0  ;;  %v2353_v20 = vadd.f32 %v2352_v28, %v2309_v57 }
 0x3a1   : > { %v2533_v14 = vsel %vm2521_vm9, %v2515_v54, %v2532_v13  ;;  %v2530_v3 = vsel %vm2520_vm11, %v2527_v61, %v2529_v52  ;;  %v4669_v5 = vshll.u32 %v2650_v41, 8  ;;  %v4674_v54 = vshrl.u32 %v2654_v0, 5  ;;  %v2396_v13 = vpop.f32.mrf.mxu3 }
 0x3a2   : > { %v2534_v12 = vsel %vm2520_vm11, %v2531_v16, %v2533_v14  ;;  %v2560_v7 = vand.u32 65535, %v2530_v3  ;;  %v2561_v1 = vshrl.u32 %v2530_v3, 16  ;;  %v4666_v15 = vsub.s32 32, %v2656_v32 }
 0x3a3   : > { %v2538_v50 = vand.u32 65535, %v2534_v12  ;;  %v2539_v43 = vshrl.u32 %v2534_v12, 16  ;;  %v2659_v19 = vshll.u32 %v3380_v36, %v2656_v32  ;;  %v2662_v16 = vshll.u32 %v3381_v38, %v2656_v32 }
 0x3a4   : > { %v4654_v53 = vmul.u32 %v2561_v1, %v2536_v40  ;;  %v4657_v25 = vmul.u32 %v2560_v7, %v2537_v47  ;;  %v2562_v39 = vmul.u32 %v2560_v7, %v2536_v40  ;;  %v2565_v22 = vmul.u32 %v2561_v1, %v2537_v47 }
 0x3a5   : > { %v4649_v35 = vmul.u32 %v2539_v43, %v2536_v40  ;;  %v4652_v62 = vmul.u32 %v2538_v50, %v2537_v47  ;;  %v2540_v30 = vmul.u32 %v2538_v50, %v2536_v40  ;;  %v2543_v2 = vmul.u32 %v2539_v43, %v2537_v47 }
 0x3a6   : > { %v2566_v23 = vshll.u32 %v4654_v53, 16  ;;  %v2568_v56 = vshll.u32 %v4657_v25, 16  ;;  %v2660_v61 = vshrl.u32 %v3381_v38, %v4666_v15  ;;  %v2663_v29 = vshrl.u32 %v3382_v42, %v4666_v15 }
 0x3a7   : > { %v2544_v27 = vshll.u32 %v4649_v35, 16  ;;  %v2546_v21 = vshll.u32 %v4652_v62, 16  ;;  %v2665_v14 = vshll.u32 %v3382_v42, %v2656_v32  ;;  %v2666_v3 = vshrl.u32 %v3383_v45, %v4666_v15 }
 0x3a8   : > { %vm2570_vm14 = vc.u32 %v2562_v39, %v2566_v23  ;;  %v4663_v44 = vadd.s32 %v2566_v23, %v2562_v39  ;;  %v4686_v12 = vor.u32 %v2660_v61, %v2659_v19  ;;  %v4688_v40 = vor.u32 %v2663_v29, %v2662_v16 }
 0x3a9   : > { %vm2548_vm13 = vc.u32 %v2540_v30, %v2544_v27  ;;  %v2550_v46 = vadd.s32 %v2544_v27, %v2540_v30  ;;  %v2571_v10 = vsel %vm2570_vm14, 1, %v3379_v6  ;;  %v2668_v50 = vshll.u32 %v3383_v45, %v2656_v32 }
 0x3aa   : > { %v2549_v26 = vsel %vm2548_vm13, 1, %v3379_v6  ;;  %vm2574_vm0 = vc.u32 %v4663_v44, %v2568_v56  ;;  %v2573_v52 = vadd.s32 %v2571_v10, %v2565_v22  ;;  %v2669_v43 = vshrl.u32 %v3384_v48, %v4666_v15 }
 0x3ab   : > { %vm2552_vm15 = vc.u32 %v2550_v46, %v2546_v21  ;;  %v2551_v24 = vadd.s32 %v2549_v26, %v2543_v2  ;;  %v2575_v7 = vsel %vm2574_vm0, 1, %v3379_v6  ;;  %v4694_v1 = vor.u32 %v2666_v3, %v2665_v14  ;;  %v2443_v2 = vpop.f32.mrf.mxu0 }
 0x3ac   : > { %v2553_v49 = vsel %vm2552_vm15, 1, %v3379_v6  ;;  %v2671_v47 = vshll.u32 %v3384_v48, %v2656_v32  ;;  %v2672_v18 = vshrl.u32 %v3385_v51, %v4666_v15  ;;  %v2397_v31 = vadd.f32 %v2396_v13, %v2353_v20 }
 0x3ad   : > { %v2524_v34 = vsel %vm2522_vm8, %v4615_v59, 2102212464  ;;  %v2670_v0 = vor.u32 %v2669_v43, %v2668_v50  ;;  %v2555_v30 = vadd.s32 %v2553_v49, %v2551_v24  ;;  %vm2674_vm1 = vcmp.lt.s32.totalorder %v4674_v54, 1  ;;  %v2480_v49 = vpop.f32.mrf.mxu1 }
 0x3ae   : > { %v2673_v27 = vor.u32 %v2672_v18, %v2671_v47  ;;  %v2691_v57 = vand.u32 65535, %v4669_v5  ;;  %v2545_v39 = vshrl.u32 %v4649_v35, 16  ;;  %v2577_v23 = vadd.s32 %v2575_v7, %v2573_v52 }
 0x3af   : > { %vm2677_vm2 = vcmp.lt.s32.totalorder %v4674_v54, 4  ;;  %v2682_v41 = vsel %vm2674_vm1, %v4686_v12, %v4688_v40  ;;  %vm2676_vm3 = vcmp.lt.s32.totalorder %v4674_v54, 3  ;;  %v2686_v28 = vsel %vm2674_vm1, %v4688_v40, %v4694_v1 }
 0x3b0   : > { %v2683_v59 = vsel %vm2677_vm2, %v2670_v0, 920167782  ;;  %v2687_v35 = vsel %vm2677_vm2, %v2673_v27, 1326507024  ;;  %v2567_v46 = vshrl.u32 %v4654_v53, 16  ;;  %vm2675_vm4 = vcmp.lt.s32.totalorder %v4674_v54, 2 }
 0x3b1   : > { %v2684_v32 = vsel %vm2676_vm3, %v4694_v1, %v2683_v59  ;;  %v2688_v21 = vsel %vm2676_vm3, %v2670_v0, %v2687_v35  ;;  %v2556_v26 = vadd.s32 %v2555_v30, %v2545_v39  ;;  %v2692_v24 = vshrl.u32 %v4669_v5, 16 }
 0x3b2   : > { %v2685_v20 = vsel %vm2675_vm4, %v2682_v41, %v2684_v32  ;;  %v2689_v10 = vsel %vm2675_vm4, %v2686_v28, %v2688_v21  ;;  %v2578_v53 = vadd.s32 %v2577_v23, %v2567_v46  ;;  %v2503_v16 = vshrl.u32 %v3380_v36, %v4592_v8 }
 0x3b3   : > { %v2693_v22 = vand.u32 65535, %v2689_v10  ;;  %v2694_v19 = vshrl.u32 %v2689_v10, 16  ;;  %v2716_v61 = vshrl.u32 %v2685_v20, 16  ;;  %v2547_v29 = vshrl.u32 %v4652_v62, 16 }
 0x3b4   : > { %v2715_v13 = vand.u32 65535, %v2685_v20  ;;  %v2569_v52 = vshrl.u32 %v4657_v25, 16  ;;  %v2444_v14 = vadd.f32 %v2443_v2, %v2397_v31  ;;  %v2523_v43 = vsel %vm2519_vm7, %v2503_v16, %v4611_v55 }
 0x3b5   : > { %v2696_v3 = vmul.u32 %v2694_v19, %v2691_v57  ;;  %v2697_v50 = vmul.u32 %v2693_v22, %v2692_v24  ;;  %v2525_v7 = vsel %vm2521_vm9, %v4613_v33, %v2524_v34  ;;  %v4741_v47 = vadd.s32 %v2556_v26, %v2547_v29 }
 0x3b6   : > { %v2718_v8 = vmul.u32 %v2716_v61, %v2691_v57  ;;  %v2579_v18 = vadd.s32 %v2578_v53, %v2569_v52  ;;  %v2695_v62 = vmul.u32 %v2693_v22, %v2691_v57  ;;  %v4743_v30 = vadd.f32 %v2480_v49, %v2444_v14 }
 0x3b7   : > { %v2699_v0 = vshll.u32 %v2696_v3, 16  ;;  %v4748_v31 = vadd.s32 %v4663_v44, %v2568_v56  ;;  %v2698_v27 = vmul.u32 %v2694_v19, %v2692_v24  ;;  %v2719_v39 = vmul.u32 %v2715_v13, %v2692_v24 }
 0x3b8   : > { %v2721_v55 = vshll.u32 %v2718_v8, 16  ;;  %v2701_v23 = vshll.u32 %v2697_v50, 16  ;;  %v2717_v33 = vmul.u32 %v2715_v13, %v2691_v57  ;;  %v2526_v34 = vsel %vm2520_vm11, %v2523_v43, %v2525_v7 }
 0x3b9   : > { %vm2703_vm5 = vc.u32 %v2695_v62, %v2699_v0  ;;  %v2705_v41 = vadd.s32 %v2699_v0, %v2695_v62  ;;  %vm2582_vm6 = vc.u32 %v4741_v47, %v4748_v31  ;;  %v2583_v28 = vadd.s32 1, %v2579_v18 }
 0x3ba   : > { %v2704_v59 = vsel %vm2703_vm5, 1, %v3379_v6  ;;  %vm2725_vm7 = vc.u32 %v2717_v33, %v2721_v55  ;;  %v2700_v44 = vshrl.u32 %v2696_v3, 16  ;;  %v2720_v35 = vmul.u32 %v2716_v61, %v2692_v24 }
 0x3bb   : > { %v2706_v25 = vadd.s32 %v2704_v59, %v2698_v27  ;;  %vm2707_vm10 = vc.u32 %v2705_v41, %v2701_v23  ;;  %v2723_v46 = vshll.u32 %v2719_v39, 16  ;;  %v2726_v57 = vsel %vm2725_vm7, 1, %v3379_v6 }
 0x3bc   : > { %v2708_v56 = vsel %vm2707_vm10, 1, %v3379_v6  ;;  %v2727_v21 = vadd.s32 %v2721_v55, %v2717_v33  ;;  %v2800_v60 = vand.u32 2139095040, %v4743_v30  ;;  %v2728_v26 = vadd.s32 %v2726_v57, %v2720_v35  ;;  %v2357_v57 = vpop.f32.mrf.mxu2 }
 0x3bd   : > { %v2710_v32 = vadd.s32 %v2708_v56, %v2706_v25  ;;  %v2580_v20 = vmul.u32 %v4618_v11, %v2526_v34  ;;  %v2584_v10 = vsel %vm2582_vm6, %v2583_v28, %v2579_v18  ;;  %v2702_v22 = vshrl.u32 %v2697_v50, 16 }
 0x3be   : > { %vm2729_vm8 = vc.u32 %v2727_v21, %v2723_v46  ;;  %v2722_v24 = vshrl.u32 %v2718_v8, 16  ;;  %v2801_v61 = vshrl.u32 %v2800_v60, 23  ;;  %v2658_v16 = vshrl.u32 %v3380_v36, %v4666_v15 }
 0x3bf   : > { %v2711_v2 = vadd.s32 %v2710_v32, %v2700_v44  ;;  %v2730_v53 = vsel %vm2729_vm8, 1, %v3379_v6  ;;  %v2679_v29 = vsel %vm2677_vm2, %v4694_v1, 2102212464  ;;  %v2585_v13 = vadd.s32 %v2584_v10, %v2580_v20 }
 0x3c0   : > { %v2732_v19 = vadd.s32 %v2730_v53, %v2728_v26  ;;  %v2724_v11 = vshrl.u32 %v2719_v39, 16  ;;  %v3256_v14 = vadd.s32 4294967169, %v2801_v61  ;;  %v2678_v3 = vsel %vm2674_vm1, %v2658_v16, %v4686_v12  ;;  %v2195_v39 = vpop.permute.xlu2 %2194 }
 0x3c1   : > { %v4768_v49 = vadd.s32 %v2711_v2, %v2702_v22  ;;  %v2680_v50 = vsel %vm2676_vm3, %v4688_v40, %v2679_v29  ;;  %v4776_v43 = vadd.s32 %v2727_v21, %v2723_v46  ;;  %v2586_v8 = vadd.s32 536870912, %v2585_v13 }
 0x3c2   : > { %v2733_v52 = vadd.s32 %v2732_v19, %v2722_v24  ;;  %v2807_v7 = vadd.s32 1, %v3256_v14  ;;  %v2681_v18 = vsel %vm2675_vm4, %v2678_v3, %v2680_v50  ;;  %v2260_v23 = vadd.f32 %v4577_v9, %v2195_v39  ;;  %v2402_v19 = vpop.f32.mrf.mxu3 }
 0x3c3   : > { %vm2737_vm9 = vc.u32 %v4768_v49, %v4776_v43  ;;  %v4782_v27 = vshrl.u32 %v2586_v8, 30  ;;  %v2735_v40 = vmul.u32 %v4669_v5, %v2681_v18  ;;  %v2797_v33 = vand.u32 2147483647, %v4743_v30  ;;  %v2484_v18 = vpop.f32.mrf.mxu1 }
 0x3c4   : > { %v2734_v15 = vadd.s32 %v2733_v52, %v2724_v11  ;;  %vm2808_vm11 = vcmp.gt.s32.totalorder %v2807_v7, 0  ;;  %v2313_v59 = vadd.f32 %v4581_v17, %v2260_v23  ;;  %v2447_v52 = vpop.f32.mrf.mxu0 }
 0x3c5   : > { %v2809_v62 = vsel %vm2808_vm11, %v2807_v7, 0  ;;  %v2588_v28 = vshll.u32 %v4782_v27, 30  ;;  %v2804_v46 = vand.u32 8388607, %v2797_v33 }
 0x3c6   : > { %v2738_v1 = vadd.s32 1, %v2734_v15  ;;  %v2811_v12 = vand.u32 31, %v2809_v62  ;;  %v4804_v32 = vshrl.u32 %v2809_v62, 5  ;;  %v2358_v22 = vadd.f32 %v2357_v57, %v2313_v59 }
 0x3c7   : > { %v4813_v20 = vsub.s32 %v2585_v13, %v2588_v28  ;;  %v2805_v61 = vor.u32 8388608, %v2804_v46 }
 0x3c8   : > { %v2739_v0 = vsel %vm2737_vm9, %v2738_v1, %v2734_v15  ;;  %v4785_v55 = vsub.s32 32, %v2811_v12  ;;  %v2814_v25 = vshll.u32 %v3380_v36, %v2811_v12  ;;  %v2817_v9 = vshll.u32 %v3381_v38, %v2811_v12 }
 0x3c9   : > { %v2740_v41 = vadd.s32 %v2739_v0, %v2735_v40  ;;  %v2823_v56 = vshll.u32 %v3383_v45, %v2811_v12  ;;  %v2820_v17 = vshll.u32 %v3382_v42, %v2811_v12  ;;  %v2826_v53 = vshll.u32 %v3384_v48, %v2811_v12 }
 0x3ca   : > { %v2815_v54 = vshrl.u32 %v3381_v38, %v4785_v55  ;;  %v2818_v34 = vshrl.u32 %v3382_v42, %v4785_v55  ;;  %v2824_v5 = vshrl.u32 %v3384_v48, %v4785_v55  ;;  %v2821_v44 = vshrl.u32 %v3383_v45, %v4785_v55 }
 0x3cb   : > { %v2741_v35 = vadd.s32 536870912, %v2740_v41  ;;  %v2827_v2 = vshrl.u32 %v3385_v51, %v4785_v55  ;;  %vm2829_vm12 = vcmp.lt.s32.totalorder %v4804_v32, 1  ;;  %vm2832_vm13 = vcmp.lt.s32.totalorder %v4804_v32, 4 }
 0x3cc   : > { %v4807_v21 = vor.u32 %v2815_v54, %v2814_v25  ;;  %v4809_v60 = vor.u32 %v2818_v34, %v2817_v9  ;;  %v2825_v26 = vor.u32 %v2824_v5, %v2823_v56  ;;  %v4815_v10 = vor.u32 %v2821_v44, %v2820_v17 }
 0x3cd   : > { %v4818_v24 = vshrl.u32 %v2741_v35, 30  ;;  %v2828_v16 = vor.u32 %v2827_v2, %v2826_v53  ;;  %vm2831_vm14 = vcmp.lt.s32.totalorder %v4804_v32, 3  ;;  %v2591_v11 = vsub.s32 0, %v4813_v20 }
 0x3ce   : > { %v2837_v29 = vsel %vm2829_vm12, %v4807_v21, %v4809_v60  ;;  %v2838_v13 = vsel %vm2832_vm13, %v2825_v26, 920167782  ;;  %vm2830_vm15 = vcmp.lt.s32.totalorder %v4804_v32, 2  ;;  %v2403_v3 = vadd.f32 %v2402_v19, %v2358_v22 }
 0x3cf   : > { %v2839_v14 = vsel %vm2831_vm14, %v4815_v10, %v2838_v13  ;;  %vm2590_vm0 = vcmp.lt.s32.totalorder %v4813_v20, 0  ;;  %v2743_v50 = vshll.u32 %v4818_v24, 30  ;;  %v2841_v7 = vsel %vm2829_vm12, %v4809_v60, %v4815_v10 }
 0x3d0   : > { %v2840_v15 = vsel %vm2830_vm15, %v2837_v29, %v2839_v14  ;;  %v2842_v8 = vsel %vm2832_vm13, %v2828_v16, 1326507024  ;;  %v4844_v1 = vshll.u32 %v2805_v61, 8  ;;  %v2448_v62 = vadd.f32 %v2447_v52, %v2403_v3 }
 0x3d1   : > { %v2843_v0 = vsel %vm2831_vm14, %v2825_v26, %v2842_v8  ;;  %v2592_v12 = vsel %vm2590_vm0, %v2591_v11, %v4813_v20  ;;  %v2871_v39 = vshrl.u32 %v2840_v15, 16  ;;  %v4851_v23 = vsub.s32 %v2740_v41, %v2743_v50 }
 0x3d2   : > { %v2844_v40 = vsel %vm2830_vm15, %v2841_v7, %v2843_v0  ;;  %v4853_v54 = vadd.f32 %v2484_v18, %v2448_v62  ;;  %v2846_v34 = vand.u32 65535, %v4844_v1  ;;  %v2847_v59 = vshrl.u32 %v4844_v1, 16 }
 0x3d3   : > { %v2848_v28 = vand.u32 65535, %v2844_v40  ;;  %v2849_v5 = vshrl.u32 %v2844_v40, 16  ;;  %v2593_v25 = vclz %v2592_v12  ;;  %v2746_v35 = vsub.s32 0, %v4851_v23 }
 0x3d4   : > { %v2873_v56 = vmul.u32 %v2871_v39, %v2846_v34  ;;  %v2870_v46 = vand.u32 65535, %v2840_v15  ;;  %vm2745_vm1 = vcmp.lt.s32.totalorder %v4851_v23, 0  ;;  %v2955_v57 = vand.u32 2139095040, %v4853_v54 }
 0x3d5   : > { %v2851_v9 = vmul.u32 %v2849_v5, %v2846_v34  ;;  %v2852_v44 = vmul.u32 %v2848_v28, %v2847_v59  ;;  %v2850_v17 = vmul.u32 %v2848_v28, %v2846_v34  ;;  %v3251_v26 = vadd.s32 4294967294, %v2593_v25 }
 0x3d6   : > { %v2853_v2 = vmul.u32 %v2849_v5, %v2847_v59  ;;  %v2876_v19 = vshll.u32 %v2873_v56, 16  ;;  %v2747_v61 = vsel %vm2745_vm1, %v2746_v35, %v4851_v23  ;;  %v2872_v29 = vmul.u32 %v2870_v46, %v2846_v34 }
 0x3d7   : > { %v2854_v41 = vshll.u32 %v2851_v9, 16  ;;  %v2856_v53 = vshll.u32 %v2852_v44, 16  ;;  %v2874_v13 = vmul.u32 %v2870_v46, %v2847_v59  ;;  %v2956_v52 = vshrl.u32 %v2955_v57, 23 }
 0x3d8   : > { %vm3252_vm4 = vcmp.lt.s32.totalorder %v3251_v26, 0  ;;  %v2875_v3 = vmul.u32 %v2871_v39, %v2847_v59  ;;  %vm2880_vm5 = vc.u32 %v2872_v29, %v2876_v19  ;;  %v2748_v50 = vclz %v2747_v61 }
 0x3d9   : > { %vm2858_vm2 = vc.u32 %v2850_v17, %v2854_v41  ;;  %v2860_v22 = vadd.s32 %v2854_v41, %v2850_v17  ;;  %v2855_v15 = vshrl.u32 %v2851_v9, 16  ;;  %v2881_v8 = vsel %vm2880_vm5, 1, %v3379_v6 }
 0x3da   : > { %v2859_v16 = vsel %vm2858_vm2, 1, %v3379_v6  ;;  %v2878_v18 = vshll.u32 %v2874_v13, 16  ;;  %v2882_v62 = vadd.s32 %v2876_v19, %v2872_v29  ;;  %v2883_v0 = vadd.s32 %v2881_v8, %v2875_v3 }
 0x3db   : > { %v2861_v11 = vadd.s32 %v2859_v16, %v2853_v2  ;;  %vm2862_vm3 = vc.u32 %v2860_v22, %v2856_v53  ;;  %v4864_v12 = vsel %vm3252_vm4, 0, %v3251_v26  ;;  %v3259_v34 = vadd.s32 4294967169, %v2956_v52 }
 0x3dc   : > { %v2863_v14 = vsel %vm2862_vm3, 1, %v3379_v6  ;;  %v2813_v28 = vshrl.u32 %v3380_v36, %v4785_v55  ;;  %v2834_v39 = vsel %vm2832_vm13, %v4815_v10, 2102212464  ;;  %vm2884_vm6 = vc.u32 %v2882_v62, %v2878_v18 }
 0x3dd   : > { %v2865_v7 = vadd.s32 %v2863_v14, %v2861_v11  ;;  %v3254_v59 = vadd.s32 4294967294, %v2748_v50  ;;  %v2857_v5 = vshrl.u32 %v2852_v44, 16  ;;  %v2885_v25 = vsel %vm2884_vm6, 1, %v3379_v6 }
 0x3de   : > { %v2962_v9 = vadd.s32 1, %v3259_v34  ;;  %v2597_v35 = vsub.s32 32, %v4864_v12  ;;  %v2877_v46 = vshrl.u32 %v2873_v56, 16  ;;  %v2887_v17 = vadd.s32 %v2885_v25, %v2883_v0 }
 0x3df   : > { %v2866_v40 = vadd.s32 %v2865_v7, %v2855_v15  ;;  %v2833_v41 = vsel %vm2829_vm12, %v2813_v28, %v4807_v21  ;;  %v2835_v55 = vsel %vm2831_vm14, %v4809_v60, %v2834_v39  ;;  %v2601_v10 = vsub.s32 4294967266, %v4864_v12 }
 0x3e0   : > { %vm2963_vm10 = vcmp.gt.s32.totalorder %v2962_v9, 0  ;;  %v2879_v44 = vshrl.u32 %v2874_v13, 16  ;;  %v2888_v26 = vadd.s32 %v2887_v17, %v2877_v46  ;;  %vm3255_vm7 = vcmp.lt.s32.totalorder %v3254_v59, 0 }
 0x3e1   : > { %v4879_v57 = vadd.s32 %v2866_v40, %v2857_v5  ;;  %v2964_v2 = vsel %vm2963_vm10, %v2962_v9, 0  ;;  %v4882_v53 = vadd.s32 %v2882_v62, %v2878_v18  ;;  %v2581_v22 = vadd.s32 %v4748_v31, %v4741_v47 }
 0x3e2   : > { %v2966_v56 = vand.u32 31, %v2964_v2  ;;  %v2836_v21 = vsel %vm2830_vm15, %v2833_v41, %v2835_v55  ;;  %v2889_v19 = vadd.s32 %v2888_v26, %v2879_v44  ;;  %v2952_v60 = vand.u32 2147483647, %v4853_v54 }
 0x3e3   : > { %vm2892_vm8 = vc.u32 %v4879_v57, %v4882_v53  ;;  %v2599_v16 = vshrl.u32 %v2581_v22, %v2597_v35  ;;  %v2602_v29 = vadd.s32 127, %v2601_v10  ;;  %v2751_v13 = vsel %vm3255_vm7, 0, %v3254_v59 }
 0x3e4   : > { %v4891_v61 = vsub.s32 32, %v2966_v56  ;;  %v2893_v11 = vadd.s32 1, %v2889_v19  ;;  %v2890_v52 = vmul.u32 %v4844_v1, %v2836_v21  ;;  %v2969_v14 = vshll.u32 %v3380_v36, %v2966_v56 }
 0x3e5   : > { %v2978_v31 = vshll.u32 %v3383_v45, %v2966_v56  ;;  %v2756_v7 = vsub.s32 4294967266, %v2751_v13  ;;  %v4904_v1 = vshrl.u32 %v2964_v2, 5  ;;  %v2972_v18 = vshll.u32 %v3381_v38, %v2966_v56 }
 0x3e6   : > { %v2970_v47 = vshrl.u32 %v3381_v38, %v4891_v61  ;;  %v2894_v32 = vsel %vm2892_vm8, %v2893_v11, %v2889_v19  ;;  %v2973_v3 = vshrl.u32 %v3382_v42, %v4891_v61  ;;  %v2976_v50 = vshrl.u32 %v3383_v45, %v4891_v61 }
 0x3e7   : > { %v2979_v15 = vshrl.u32 %v3384_v48, %v4891_v61  ;;  %v2895_v8 = vadd.s32 %v2894_v32, %v2890_v52  ;;  %v2959_v62 = vand.u32 8388607, %v2952_v60  ;;  %v2975_v40 = vshll.u32 %v3382_v42, %v2966_v56 }
 0x3e8   : > { %v4909_v0 = vor.u32 %v2970_v47, %v2969_v14  ;;  %v4912_v39 = vor.u32 %v2973_v3, %v2972_v18  ;;  %v2981_v45 = vshll.u32 %v3384_v48, %v2966_v56  ;;  %v2982_v59 = vshrl.u32 %v3385_v51, %v4891_v61 }
 0x3e9   : > { %v2980_v34 = vor.u32 %v2979_v15, %v2978_v31  ;;  %v2896_v28 = vadd.s32 536870912, %v2895_v8  ;;  %v2598_v5 = vshll.u32 %v4813_v20, %v4864_v12  ;;  %v2603_v38 = vshll.u32 %v2602_v29, 23 }
 0x3ea   : > { %v2752_v25 = vsub.s32 32, %v2751_v13  ;;  %v4919_v9 = vor.u32 %v2976_v50, %v2975_v40  ;;  %v2757_v35 = vadd.s32 127, %v2756_v7  ;;  %v2983_v42 = vor.u32 %v2982_v59, %v2981_v45 }
 0x3eb   : > { %v4921_v46 = vshrl.u32 %v2896_v28, 30  ;;  %vm2987_vm9 = vcmp.lt.s32.totalorder %v4904_v1, 4  ;;  %v2736_v17 = vadd.s32 %v4776_v43, %v4768_v49  ;;  %v2960_v48 = vor.u32 8388608, %v2959_v62 }
 0x3ec   : > { %vm2984_vm11 = vcmp.lt.s32.totalorder %v4904_v1, 1  ;;  %v2993_v51 = vsel %vm2987_vm9, %v2980_v34, 920167782  ;;  %v2600_v20 = vor.u32 %v2599_v16, %v2598_v5  ;;  %vm2986_vm12 = vcmp.lt.s32.totalorder %v4904_v1, 3 }
 0x3ed   : > { %v2898_v12 = vshll.u32 %v4921_v46, 30  ;;  %v2992_v41 = vsel %vm2984_vm11, %v4909_v0, %v4912_v39  ;;  %v2604_v55 = vor.u32 4788187, %v2603_v38  ;;  %v2754_v10 = vshrl.u32 %v2736_v17, %v2752_v25 }
 0x3ee   : > { %v2994_v49 = vsel %vm2986_vm12, %v4919_v9, %v2993_v51  ;;  %v2997_v43 = vsel %vm2987_vm9, %v2983_v42, 1326507024  ;;  %v2758_v44 = vshll.u32 %v2757_v35, 23  ;;  %vm2985_vm13 = vcmp.lt.s32.totalorder %v4904_v1, 2 }
 0x3ef   : > { %v2899_v26 = vsub.s32 %v2895_v8, %v2898_v12  ;;  %v2996_v2 = vsel %vm2984_vm11, %v4912_v39, %v4919_v9  ;;  %v2753_v56 = vshll.u32 %v4851_v23, %v2751_v13  ;;  %v2995_v22 = vsel %vm2985_vm13, %v2992_v41, %v2994_v49 }
 0x3f0   : > { %v2998_v21 = vsel %vm2986_vm12, %v2980_v34, %v2997_v43  ;;  %v4950_v19 = vshll.u32 %v2960_v48, 8  ;;  %v2605_v29 = vand.u32 2147483647, %v2604_v55  ;;  %v2607_v11 = vcvt.s32.f32 %v2600_v20 }
 0x3f1   : > { %vm2900_vm14 = vcmp.lt.s32.totalorder %v2899_v26, 0  ;;  %v2901_v16 = vsub.s32 0, %v2899_v26  ;;  %v2755_v52 = vor.u32 %v2754_v10, %v2753_v56  ;;  %v2999_v14 = vsel %vm2985_vm13, %v2996_v2, %v2998_v21 }
 0x3f2   : > { %v2759_v47 = vor.u32 4788187, %v2758_v44  ;;  %v3003_v32 = vand.u32 65535, %v2999_v14  ;;  %v3026_v23 = vshrl.u32 %v2995_v22, 16  ;;  %v3001_v3 = vand.u32 65535, %v4950_v19 }
 0x3f3   : > { %v2902_v31 = vsel %vm2900_vm14, %v2901_v16, %v2899_v26  ;;  %v3004_v50 = vshrl.u32 %v2999_v14, 16  ;;  %v3025_v15 = vand.u32 65535, %v2995_v22  ;;  %v3002_v7 = vshrl.u32 %v4950_v19, 16 }
 0x3f4   : > { %v2903_v13 = vclz %v2902_v31  ;;  %v4956_v8 = vmul.f32 %v2607_v11, %v2605_v29  ;;  %v2762_v18 = vcvt.s32.f32 %v2755_v52  ;;  %v2760_v34 = vand.u32 2147483647, %v2759_v47 }
 0x3f5   : > { %v3006_v40 = vmul.u32 %v3004_v50, %v3001_v3  ;;  %v2891_v28 = vadd.s32 %v4882_v53, %v4879_v57  ;;  %v3007_v45 = vmul.u32 %v3003_v32, %v3002_v7  ;;  %v3028_v59 = vmul.u32 %v3026_v23, %v3001_v3 }
 0x3f6   : > { %v3257_v62 = vadd.s32 4294967294, %v2903_v13  ;;  %v3005_v5 = vmul.u32 %v3003_v32, %v3001_v3  ;;  %v3027_v25 = vmul.u32 %v3025_v15, %v3001_v3  ;;  %v3008_v42 = vmul.u32 %v3004_v50, %v3002_v7 }
 0x3f7   : > { %v3009_v38 = vshll.u32 %v3006_v40, 16  ;;  %v3029_v17 = vmul.u32 %v3025_v15, %v3002_v7  ;;  %v3031_v48 = vshll.u32 %v3028_v59, 16  ;;  %v3030_v12 = vmul.u32 %v3026_v23, %v3002_v7 }
 0x3f8   : > { %vm3258_vm15 = vcmp.lt.s32.totalorder %v3257_v62, 0  ;;  %v3011_v55 = vshll.u32 %v3007_v45, 16  ;;  %v3010_v11 = vshrl.u32 %v3006_v40, 16  ;;  %v2763_v14 = vmul.f32 %v2762_v18, %v2760_v34 }
 0x3f9   : > { %v2906_v35 = vsel %vm3258_vm15, 0, %v3257_v62  ;;  %vm3013_vm0 = vc.u32 %v3005_v5, %v3009_v38  ;;  %v3015_v49 = vadd.s32 %v3009_v38, %v3005_v5  ;;  %vm3035_vm1 = vc.u32 %v3027_v25, %v3031_v48 }
 0x3fa   : > { %v2907_v51 = vsub.s32 32, %v2906_v35  ;;  %v2911_v20 = vsub.s32 4294967266, %v2906_v35  ;;  %v2908_v41 = vshll.u32 %v2899_v26, %v2906_v35  ;;  %v3014_v10 = vsel %vm3013_vm0, 1, %v3379_v6 }
 0x3fb   : > { %v3016_v43 = vadd.s32 %v3014_v10, %v3008_v42  ;;  %vm3017_vm2 = vc.u32 %v3015_v49, %v3011_v55  ;;  %v3033_v44 = vshll.u32 %v3029_v17, 16  ;;  %v3036_v2 = vsel %vm3035_vm1, 1, %v3379_v6 }
 0x3fc   : > { %v2909_v57 = vshrl.u32 %v2891_v28, %v2907_v51  ;;  %v2912_v53 = vadd.s32 127, %v2911_v20  ;;  %v3037_v56 = vadd.s32 %v3031_v48, %v3027_v25  ;;  %v3018_v16 = vsel %vm3017_vm2, 1, %v3379_v6 }
 0x3fd   : > { %v3038_v29 = vadd.s32 %v3036_v2, %v3030_v12  ;;  %v2989_v26 = vsel %vm2987_vm9, %v4919_v9, 2102212464  ;;  %v3020_v52 = vadd.s32 %v3018_v16, %v3016_v43  ;;  %v2968_v31 = vshrl.u32 %v3380_v36, %v4891_v61 }
 0x3fe   : > { %v2910_v22 = vor.u32 %v2909_v57, %v2908_v41  ;;  %v2913_v21 = vshll.u32 %v2912_v53, 23  ;;  %vm3039_vm3 = vc.u32 %v3037_v56, %v3033_v44  ;;  %v3012_v23 = vshrl.u32 %v3007_v45, 16 }
 0x3ff   : > { %v3040_v32 = vsel %vm3039_vm3, 1, %v3379_v6  ;;  %v3021_v13 = vadd.s32 %v3020_v52, %v3010_v11  ;;  %v3032_v3 = vshrl.u32 %v3028_v59, 16  ;;  %v2988_v9 = vsel %vm2984_vm11, %v2968_v31, %v4909_v0 }
 0x400   : > { %v2914_v47 = vor.u32 4788187, %v2913_v21  ;;  %v3042_v50 = vadd.s32 %v3040_v32, %v3038_v29  ;;  %v2917_v7 = vcvt.s32.f32 %v2910_v22  ;;  %v2990_v18 = vsel %vm2986_vm12, %v4912_v39, %v2989_v26 }
 0x401   : > { %v3022_v62 = vadd.s32 %v3021_v13, %v3012_v23  ;;  %v3034_v40 = vshrl.u32 %v3029_v17, 16  ;;  %v2764_v36 = vxor.u32 2147483648, %v2763_v14  ;;  %v3041_v6 = vadd.s32 %v3037_v56, %v3033_v44 }
 0x402   : > { %v2915_v15 = vand.u32 2147483647, %v2914_v47  ;;  %v3043_v34 = vadd.s32 %v3042_v50, %v3032_v3  ;;  %v2991_v28 = vsel %vm2985_vm13, %v2988_v9, %v2990_v18  ;;  %v2609_v59 = vxor.u32 2147483648, %v4956_v8 }
 0x403   : > { %vm3047_vm4 = vc.u32 %v3022_v62, %v3041_v6  ;;  %vm2644_vm5 = vcmp.lt.s32.totalorder %v4587_v37, 0  ;;  %v3045_v38 = vmul.u32 %v4950_v19, %v2991_v28  ;;  %vm2489_vm6 = vcmp.lt.s32.totalorder %v4583_v4, 0 }
 0x404   : > { %v2918_v61 = vmul.f32 %v2917_v7, %v2915_v15  ;;  %v3044_v45 = vadd.s32 %v3043_v34, %v3034_v40  ;;  %v2765_v39 = vsel %vm2644_vm5, %v2764_v36, %v2763_v14  ;;  %v2610_v1 = vsel %vm2489_vm6, %v2609_v59, %v4956_v8 }
 0x405   : > { %vm4988_vm10 = vcmp.le.f32.partialorder %v2642_v63, 0.7853982  ;;  %vm2799_vm7 = vcmp.lt.s32.totalorder %v4743_v30, 0  ;;  %vm5002_vm8 = vcmp.le.f32.partialorder %v2487_v58, 0.7853982  ;;  %v2611_v52 = vsub.s32 4, %v4782_v27 }
 0x406   : > { %v2919_v0 = vxor.u32 2147483648, %v2918_v61  ;;  %v3048_v5 = vadd.s32 1, %v3044_v45  ;;  %v4996_v19 = vsel %vm4988_vm10, %v4587_v37, %v2765_v39  ;;  %v5009_v48 = vsel %vm5002_vm8, %v4583_v4, %v2610_v1 }
 0x407   : > { %vm5013_vm9 = vcmp.le.f32.partialorder %v2797_v33, 0.7853982  ;;  %v5019_v20 = vmul.f32 %v4996_v19, %v4996_v19  ;;  %v5030_v41 = vmul.f32 %v5009_v48, %v5009_v48  ;;  %v2766_v31 = vsub.s32 4, %v4818_v24 }
 0x408   : > { %v3049_v25 = vsel %vm3047_vm4, %v3048_v5, %v3044_v45  ;;  %v2920_v17 = vsel %vm2799_vm7, %v2919_v0, %v2918_v61  ;;  %v3046_v3 = vadd.s32 %v3041_v6, %v3022_v62  ;;  %v2612_v61 = vsel %vm2489_vm6, %v2611_v52, %v4782_v27 }
 0x409   : > { %v3050_v42 = vadd.s32 %v3049_v25, %v3045_v38  ;;  %v5024_v58 = vsel %vm5013_vm9, %v4743_v30, %v2920_v17  ;;  %v2778_v10 = vmul.f32 -0.00019511016, %v5019_v20  ;;  %v2623_v57 = vmul.f32 -0.00019511016, %v5030_v41 }
 0x40a   : > { %v5035_v55 = vmul.f32 %v5024_v58, %v5024_v58  ;;  %v2771_v21 = vmul.f32 -0.001358992, %v5019_v20  ;;  %v2616_v26 = vmul.f32 -0.001358992, %v5030_v41  ;;  %v2767_v45 = vsel %vm2644_vm5, %v2766_v31, %v4818_v24 }
 0x40b   : > { %v3051_v63 = vadd.s32 536870912, %v3050_v42  ;;  %v2779_v44 = vadd.f32 0.008332121, %v2778_v10  ;;  %v2624_v22 = vadd.f32 0.008332121, %v2623_v57  ;;  %v2921_v38 = vsub.s32 4, %v4921_v46 }
 0x40c   : > { %v2933_v43 = vmul.f32 -0.00019511016, %v5035_v55  ;;  %v2926_v14 = vmul.f32 -0.001358992, %v5035_v55  ;;  %v2772_v32 = vadd.f32 0.041655596, %v2771_v21 }
 0x40d   : > { %v5026_v12 = vshrl.u32 %v3051_v63, 30  ;;  %v2780_v11 = vmul.f32 %v2779_v44, %v5019_v20  ;;  %v2625_v47 = vmul.f32 %v2624_v22, %v5030_v41  ;;  %v2617_v7 = vadd.f32 0.041655596, %v2616_v26 }
 0x40e   : > { %v2934_v16 = vadd.f32 0.008332121, %v2933_v43  ;;  %v2927_v18 = vadd.f32 0.041655596, %v2926_v14  ;;  %v2773_v59 = vmul.f32 %v2772_v32, %v5019_v20  ;;  %v2614_v25 = vsel %vm5002_vm8, 0, %v2612_v61 }
 0x40f   : > { %v3053_v33 = vshll.u32 %v5026_v12, 30  ;;  %v2781_v9 = vadd.f32 -0.16666654, %v2780_v11  ;;  %v2626_v28 = vadd.f32 -0.16666654, %v2625_v47  ;;  %v2618_v5 = vmul.f32 %v2617_v7, %v5030_v41 }
 0x410   : > { %v2935_v13 = vmul.f32 %v2934_v16, %v5035_v55  ;;  %v2928_v27 = vmul.f32 %v2927_v18, %v5035_v55  ;;  %v2769_v24 = vsel %vm4988_vm10, 0, %v2767_v45  ;;  %v2774_v17 = vadd.f32 -0.4999988, %v2773_v59 }
 0x411   : > { %v3054_v49 = vsub.s32 %v3050_v42, %v3053_v33  ;;  %v2782_v39 = vmul.f32 %v2781_v9, %v5019_v20  ;;  %v2627_v42 = vmul.f32 %v2626_v28, %v5030_v41  ;;  %v2631_v57 = vadd.s32 3, %v2614_v25 }
 0x412   : > { %v2936_v62 = vadd.f32 -0.16666654, %v2935_v13  ;;  %v2922_v8 = vsel %vm2799_vm7, %v2921_v38, %v4921_v46  ;;  %v2786_v43 = vadd.s32 3, %v2769_v24  ;;  %v2929_v44 = vadd.f32 -0.4999988, %v2928_v27  ;;  %v3114_v27 = vpop.permute.xlu0 %3113 }
 0x413   : > { %vm3055_vm11 = vcmp.lt.s32.totalorder %v3054_v49, 0  ;;  %v3056_v53 = vsub.s32 0, %v3054_v49  ;;  %v2775_v22 = vmul.f32 %v2774_v17, %v5019_v20  ;;  %v2924_v35 = vsel %vm5013_vm9, 0, %v2922_v8 }
 0x414   : > { %v2937_v63 = vmul.f32 %v2936_v62, %v5035_v55  ;;  %v2632_v26 = vand.u32 3, %v2631_v57  ;;  %vm2954_vm13 = vcmp.lt.s32.totalorder %v4853_v54, 0  ;;  %v2787_v52 = vand.u32 3, %v2786_v43 }
 0x415   : > { %v3057_v2 = vsel %vm3055_vm11, %v3056_v53, %v3054_v49  ;;  %v2783_v53 = vadd.f32 1.0, %v2782_v39  ;;  %v2930_v46 = vmul.f32 %v2929_v44, %v5035_v55  ;;  %vm5077_vm14 = vcmp.le.f32.partialorder %v2952_v60, 0.7853982 }
 0x416   : > { %v3058_v56 = vclz %v3057_v2  ;;  %v2938_v21 = vadd.f32 1.0, %v2937_v63  ;;  %v3076_v47 = vsub.s32 4, %v5026_v12  ;;  %v2776_v31 = vadd.f32 1.0, %v2775_v22  ;;  %v3124_v22 = vpop.permute.xlu2 %3123 }
 0x417   : > { %v2784_v11 = vmul.f32 %v2783_v53, %v4996_v19  ;;  %vm2633_vm15 = vcmp.lt.s32.totalorder %v2632_v26, 2  ;;  %v2931_v13 = vadd.f32 1.0, %v2930_v46  ;;  %vm2789_vm0 = vcmp.eq.s32.totalorder %v2787_v52, 0  ;;  %v3119_v53 = vpop.permute.xlu1 %3118 }
 0x418   : > { %v3260_v29 = vadd.s32 4294967294, %v3058_v56  ;;  %v2628_v56 = vadd.f32 1.0, %v2627_v42  ;;  %v2939_v55 = vmul.f32 %v2938_v21, %v5024_v58  ;;  %v3077_v7 = vsel %vm2954_vm13, %v3076_v47, %v5026_v12 }
 0x419   : > { %v2793_v9 = vxor.u32 2147483648, %v2776_v31  ;;  %vm2634_vm1 = vcmp.eq.s32.totalorder %v2632_v26, 0  ;;  %vm2637_vm2 = vcmp.eq.s32.totalorder %v2632_v26, 2  ;;  %v2948_v61 = vxor.u32 2147483648, %v2931_v13 }
 0x41a   : > { %vm3261_vm12 = vcmp.lt.s32.totalorder %v3260_v29, 0  ;;  %v2629_v20 = vmul.f32 %v2628_v56, %v5009_v48  ;;  %v2945_v18 = vxor.u32 2147483648, %v2939_v55  ;;  %v3079_v28 = vsel %vm5077_vm14, 0, %v3077_v7  ;;  %v3129_v26 = vpop.permute.xlu0 %3128 }
 0x41b   : > { %v3061_v23 = vsel %vm3261_vm12, 0, %v3260_v29  ;;  %vm2788_vm3 = vcmp.lt.s32.totalorder %v2787_v52, 2  ;;  %vm2792_vm4 = vcmp.eq.s32.totalorder %v2787_v52, 2  ;;  %v3096_v25 = vadd.s32 3, %v3079_v28 }
 0x41c   : > { %v3062_v50 = vsub.s32 32, %v3061_v23  ;;  %v3066_v15 = vsub.s32 4294967266, %v3061_v23  ;;  %v3063_v40 = vshll.u32 %v3054_v49, %v3061_v23  ;;  %v2619_v49 = vadd.f32 -0.4999988, %v2618_v5 }
 0x41d   : > { %v2790_v23 = vxor.u32 2147483648, %v2784_v11  ;;  %vm2785_vm7 = vweird.f32 %v4587_v37  ;;  %vm2630_vm8 = vweird.f32 %v4583_v4  ;;  %vm2940_vm9 = vweird.f32 %v4743_v30 }
 0x41e   : > { %v3064_v34 = vshrl.u32 %v3046_v3, %v3062_v50  ;;  %v3067_v36 = vadd.s32 127, %v3066_v15  ;;  %v2620_v29 = vmul.f32 %v2619_v49, %v5030_v41  ;;  %v2941_v41 = vadd.s32 3, %v2924_v35 }
 0x41f   : > { %v2635_v15 = vxor.u32 2147483648, %v2629_v20  ;;  %v3097_v57 = vand.u32 3, %v3096_v25 }
 0x420   : > { %v3065_v6 = vor.u32 %v3064_v34, %v3063_v40  ;;  %v3068_v0 = vshll.u32 %v3067_v36, 23  ;;  %v2621_v60 = vadd.f32 1.0, %v2620_v29  ;;  %v2942_v48 = vand.u32 3, %v2941_v41 }
 0x421   : > { %v2791_v36 = vsel %vm2789_vm0, %v2776_v31, %v2790_v23  ;;  %vm3099_vm11 = vcmp.eq.s32.totalorder %v3097_v57, 0  ;;  %vm3102_vm12 = vcmp.eq.s32.totalorder %v3097_v57, 2 }
 0x422   : > { %v3069_v1 = vor.u32 4788187, %v3068_v0  ;;  %v3072_v10 = vcvt.s32.f32 %v3065_v6  ;;  %v2638_v58 = vxor.u32 2147483648, %v2621_v60  ;;  %v2636_v62 = vsel %vm2634_vm1, %v2621_v60, %v2635_v15 }
 0x423   : > { %vm2944_vm5 = vcmp.eq.s32.totalorder %v2942_v48, 0  ;;  %v2794_v6 = vsel %vm2792_vm4, %v2793_v9, %v2784_v11  ;;  %vm2947_vm6 = vcmp.eq.s32.totalorder %v2942_v48, 2  ;;  %vm2943_vm10 = vcmp.lt.s32.totalorder %v2942_v48, 2 }
 0x424   : > { %v3070_v33 = vand.u32 2147483647, %v3069_v1  ;;  %v2946_v12 = vsel %vm2944_vm5, %v2931_v13, %v2945_v18  ;;  %v2639_v39 = vsel %vm2637_vm2, %v2638_v58, %v2629_v20  ;;  %v2795_v38 = vsel %vm2788_vm3, %v2791_v36, %v2794_v6 }
 0x425   : > { %v2949_v1 = vsel %vm2947_vm6, %v2948_v61, %v2939_v55  ;;  %v2640_v17 = vsel %vm2633_vm15, %v2636_v62, %v2639_v39 }
 0x426   : > { %v3073_v2 = vmul.f32 %v3072_v10, %v3070_v33  ;;  %v2950_v63 = vsel %vm2943_vm10, %v2946_v12, %v2949_v1  ;;  %v2796_v33 = vsel %vm2785_vm7, nan, %v2795_v38  ;;  %v2641_v8 = vsel %vm2630_vm8, nan, %v2640_v17 }
 0x427   : > { %v2951_v43 = vsel %vm2940_vm9, nan, %v2950_v63  ;;  %v3132_v56 = vmul.f32 %v3119_v53, %v2796_v33  ;;  %v3131_v21 = vmul.f32 %v3114_v27, %v2641_v8 }
 0x428   : > { %v3074_v16 = vxor.u32 2147483648, %v3073_v2 }
 0x429   : > { %v3135_v29 = vadd.f32 %v3132_v56, %v3131_v21 }
 0x42a   : > { %v3075_v51 = vsel %vm2954_vm13, %v3074_v16, %v3073_v2  ;;  %v3133_v16 = vmul.f32 %v3124_v22, %v2951_v43  ;;  %vm3098_vm13 = vcmp.lt.s32.totalorder %v3097_v57, 2 }
 0x42b   : > { %v3078_v19 = vsel %vm5077_vm14, %v4853_v54, %v3075_v51  ;;  %vm3095_vm14 = vweird.f32 %v4853_v54 }
 0x42c   : > { %v3080_v32 = vmul.f32 %v3078_v19, %v3078_v19  ;;  %v3136_v46 = vadd.f32 %v3135_v29, %v3133_v16 }
 0x42e   : > { %v3081_v3 = vmul.f32 -0.001358992, %v3080_v32  ;;  %v3088_v50 = vmul.f32 -0.00019511016, %v3080_v32 }
 0x430   : > { %v3082_v40 = vadd.f32 0.041655596, %v3081_v3  ;;  %v3089_v34 = vadd.f32 0.008332121, %v3088_v50 }
 0x432   : > { %v3083_v45 = vmul.f32 %v3082_v40, %v3080_v32  ;;  %v3090_v59 = vmul.f32 %v3089_v34, %v3080_v32 }
 0x434   : > { %v3084_v0 = vadd.f32 -0.4999988, %v3083_v45  ;;  %v3091_v5 = vadd.f32 -0.16666654, %v3090_v59 }
 0x436   : > { %v3085_v42 = vmul.f32 %v3084_v0, %v3080_v32  ;;  %v3092_v24 = vmul.f32 %v3091_v5, %v3080_v32 }
 0x438   : > { %v3086_v10 = vadd.f32 1.0, %v3085_v42  ;;  %v3093_v49 = vadd.f32 1.0, %v3092_v24 }
 0x43a   : > { %v3094_v44 = vmul.f32 %v3093_v49, %v3078_v19  ;;  %v3103_v2 = vxor.u32 2147483648, %v3086_v10  ;;  %v3148_v19 = vpop.permute.xlu1 %3147 }
 0x43b   : > { %v3150_v54 = vperm.slane %v3148_v19, 0 }
 0x43c   : > { %v3100_v35 = vxor.u32 2147483648, %v3094_v44  ;;  %v3104_v4 = vsel %vm3102_vm12, %v3103_v2, %v3094_v44 }
 0x43e   : > { %v3101_v37 = vsel %vm3099_vm11, %v3086_v10, %v3100_v35 }
 0x43f   : > { %v3105_v30 = vsel %vm3098_vm13, %v3101_v37, %v3104_v4 }
 0x440   : > { %v3106_v11 = vsel %vm3095_vm14, nan, %v3105_v30 }
 0x441   : > { %v3134_v52 = vmul.f32 %v3129_v26, %v3106_v11 }
 0x443   : > { %v3137_v14 = vadd.f32 %v3136_v46, %v3134_v52 }
 0x445   : > { %v3138_v51 = vrot.slane %v3137_v14, 4 }
 0x447   : > { %v3139_v20 = vadd.f32 %v3138_v51, %v3137_v14 }
 0x449   : > { %v3140_v41 = vrot.slane %v3139_v20, 2 }
 0x44b   : > { %v3141_v47 = vadd.f32 %v3140_v41, %v3139_v20 }
 0x44d   : > { %v3142_v31 = vrot.slane %v3141_v47, 1 }
 0x44f   : > { %v3143_v55 = vadd.f32 %v3142_v31, %v3141_v47 }
 0x451   : > { %v3151_v32 = vadd.f32 %v3150_v54, %v3143_v55 }
 0x453   : > { %3152 = vst [vmem:[%s324_s22] sm:$0x1] %v3151_v32 }
 0x454   : > { %3342 = shalt.err (!%p3339_p3)
}
 0x455   : > { %3266 = dma.vmem_to_hbm [thread:$0]  (%p3477_p5), %s3165_s23, 16, %s3167_s24, %s3154_s25  }
 0x456 PF: > { %p3272_p4 = scmp.ge.s32.totalorder %s3377_s14, 2  ;;  %s3178_s10 = sand.u32 1, %s3365_s11  }
 0x457   : > { %s3179_s17 = scalar_lea.sflag [#allocation4], %s3178_s10 }
 0x458   : > { %p3269_p7 = pnand %p3272_p4, %p3481_p6 }
 0x45a   : > { %p3270_p8 = pneg %p3269_p7 }
 0x45c   : > { %3360 = dma.done.wait (%p3270_p8), %s3179_s17, 16  }
 0x45d   : > { %3362 = vsyncadd (%p3270_p8), %s3179_s17, 4294967280  ;;  %p21_p9 = scmp.ge.s32.totalorder %s3464_s16, 4   ;;  %s5167_s11 = smov %s3369_s12 }
 0x45e   : > { %s5168_s12 = smov %s3373_s13  ;;  %s5169_s13 = smov %s3475_s19 }
 0x45f   : > { %s5170_s14 = smov %s3464_s16  ;;  %23 = sbr.rel (!%p21_p9) target bundleno = 6 (0x6), region = 91 }
 0x464   :  { %3184 = vsyncpa [#allocation4], 1 }
 0x465   :  { %3186 = vsyncpa [#allocation4 + $0x1], 1 }

</bundles_post_ra>
